<compile_context>
chip_gen: v7x
topology: tpu7x:2x2x1
jax: 0.10.0
libtpu: 0.0.40
codegen_flags: <defaults>
</compile_context>

<pallas_src>
import functools

import jax
import jax.numpy as jnp
from jax.experimental import pallas as pl
from jax.experimental.pallas import tpu as pltpu

BN_EPS = 1e-5
LANE = 128
SUBLANE = 8


def _round_up(x, m):
    return (x + m - 1) // m * m


def _pick_tile(requested, m, align, bytes_per_row, budget=24 << 20):
    """Largest row tile <= requested keeping the double-buffered working set under budget."""
    t = max(align, min(int(requested), int(budget // max(1, 2 * bytes_per_row))))
    if t >= m:
        return m                       # single block covering the full extent is always legal
    return max(align, (t // align) * align)


# ----------------------------- Pallas kernels ---------------------------------
def _make_pass1_kernel(stride, Ho, Wo, Wps, with_skip):
    """conv3x3(stride) via 9 shifted-window matmuls (+ optional 1x1-stride skip conv).

    Input layout: x_ref is (stride*stride, 1, L, Cin) -- the zero-padded image, phase-
    decomposed by `stride` and flattened over (rows, cols) so every tap is a pure row-offset
    2-D slice.  Output rows use the padded-width layout (P = Ho*Wps rows per image); the
    columns wo in [Wo, Wps) are garbage and are masked out of the BN statistics here and in
    pass 2, then stripped by the wrapper at the end.
    """
    P = Ho * Wps
    taps = [(kh, kw) for kh in range(3) for kw in range(3)]

    def tap_lhs(x_ref, kh, kw):
        ph = (kh % stride) * stride + (kw % stride)
        off = (kh // stride) * Wps + (kw // stride)
        return x_ref[ph, 0, off:off + P, :]

    def accumulate(x_ref, w1_ref, acc_ref):
        for idx, (kh, kw) in enumerate(taps):
            c = jnp.dot(tap_lhs(x_ref, kh, kw), w1_ref[idx],
                        preferred_element_type=jnp.float32)
            if idx == 0:
                acc_ref[...] = c
            else:
                acc_ref[...] += c

    def col_mask():
        pos = jax.lax.broadcasted_iota(jnp.int32, (P, 1), 0)
        return (pos % Wps) < Wo

    if with_skip:
        def kernel(x_ref, w1_ref, ws_ref, h1_ref, sk_ref, st_ref, acc_ref):
            accumulate(x_ref, w1_ref, acc_ref)
            h1 = acc_ref[...]
            skv = jnp.dot(tap_lhs(x_ref, 1, 1), ws_ref[...],
                          preferred_element_type=jnp.float32)
            valid = col_mask()
            h1m = jnp.where(valid, h1, 0.0)
            skm = jnp.where(valid, skv, 0.0)
            st_ref[0, 0:1, :] = jnp.sum(h1m, axis=0, keepdims=True)
            st_ref[0, 1:2, :] = jnp.sum(h1m * h1m, axis=0, keepdims=True)
            st_ref[0, 2:3, :] = jnp.sum(skm, axis=0, keepdims=True)
            st_ref[0, 3:4, :] = jnp.sum(skm * skm, axis=0, keepdims=True)
            h1_ref[0, :, :] = h1.astype(h1_ref.dtype)
            sk_ref[0, :, :] = skv.astype(sk_ref.dtype)
    else:
        def kernel(x_ref, w1_ref, h1_ref, st_ref, acc_ref):
            accumulate(x_ref, w1_ref, acc_ref)
            h1 = acc_ref[...]
            valid = col_mask()
            h1m = jnp.where(valid, h1, 0.0)
            st_ref[0, 0:1, :] = jnp.sum(h1m, axis=0, keepdims=True)
            st_ref[0, 1:2, :] = jnp.sum(h1m * h1m, axis=0, keepdims=True)
            h1_ref[0, :, :] = h1.astype(h1_ref.dtype)

    return kernel


def _make_pass2_kernel(tile_m, m_flat, wps, wo, mm_dtype):
    """relu(h1*sc1+sh1) @ W2, plus per-tile per-channel sum/sumsq of the f32 result."""
    def kernel(h1_ref, sc1_ref, sh1_ref, w2_ref, h2_ref, st_ref):
        a = jnp.maximum(h1_ref[...].astype(jnp.float32) * sc1_ref[...] + sh1_ref[...], 0.0)
        h2 = jnp.dot(a.astype(mm_dtype), w2_ref[...], preferred_element_type=jnp.float32)
        rows = (pl.program_id(0) * tile_m
                + jax.lax.broadcasted_iota(jnp.int32, (tile_m, 1), 0))
        # mask padded-width garbage columns and the grid-edge out-of-bounds rows
        valid = (rows < m_flat) & ((rows % wps) < wo)
        h2m = jnp.where(valid, h2, 0.0)
        st_ref[0, 0:1, :] = jnp.sum(h2m, axis=0, keepdims=True)
        st_ref[0, 1:2, :] = jnp.sum(h2m * h2m, axis=0, keepdims=True)
        h2_ref[...] = h2.astype(h2_ref.dtype)
    return kernel


def _pass3_conv_skip_kernel(h2_ref, sk_ref, sc2_ref, sh2_ref, scs_ref, shs_ref, o_ref):
    v = (h2_ref[...].astype(jnp.float32) * sc2_ref[...] + sh2_ref[...]
         + sk_ref[...].astype(jnp.float32) * scs_ref[...] + shs_ref[...])
    o_ref[...] = jnp.maximum(v, 0.0).astype(o_ref.dtype)


def _pass3_identity_kernel(h2_ref, xs_ref, sc2_ref, sh2_ref, o_ref):
    v = (h2_ref[...].astype(jnp.float32) * sc2_ref[...] + sh2_ref[...]
         + xs_ref[...].astype(jnp.float32))
    o_ref[...] = jnp.maximum(v, 0.0).astype(o_ref.dtype)


# ------------------------------- glue (plain JAX) ------------------------------
def _bn_affine(stats, g, b, count, c_out, c_pad):
    """stats: [k, 2, c_pad] (row0=sum, row1=sumsq) -> folded (scale, shift), both (1, c_pad)."""
    total = jnp.sum(stats, axis=0)                          # (2, c_pad)
    mean = total[0] / count
    var = jnp.maximum(total[1] / count - mean * mean, 0.0)  # biased var, clamped >= 0
    g_p = jnp.pad(g.reshape(-1).astype(jnp.float32), (0, c_pad - c_out))
    b_p = jnp.pad(b.reshape(-1).astype(jnp.float32), (0, c_pad - c_out))
    scale = g_p * jax.lax.rsqrt(var + BN_EPS)
    shift = b_p - mean * scale
    return scale.reshape(1, c_pad), shift.reshape(1, c_pad)


def resblock_forward(x, params, *, in_channels, out_channels, stride=None,
                     tile_rows_bn=1024, tile_rows_out=2048,
                     matmul_dtype=jnp.bfloat16):
    """Pallas-backed ResBlock forward. x: NCHW float32 -> NCHW float32.

    matmul_dtype=float32 reproduces the PyTorch module exactly; bfloat16 (default) uses the
    native MXU dtype and bf16 inter-pass intermediates (BN stats still taken in f32).
    """
    s = int(stride or (1 if in_channels >= out_channels else 2))
    identity_skip = (s == 1 and in_channels == out_channels)

    x = x.astype(jnp.float32)
    N, Cin, H, W = x.shape
    Cout = out_channels
    Ho = (H + 2 - 3) // s + 1
    Wo = (W + 2 - 3) // s + 1
    Hp, Wp = H + 2, W + 2
    Hps, Wps = -(-Hp // s), -(-Wp // s)
    P = Ho * Wps                           # rows per image in the padded-width flat layout
    off_max = (2 // s) * Wps + (2 // s)    # largest tap row offset (kh=kw=2)
    Cp = _round_up(Cout, LANE)
    Mflat = N * P
    count = N * Ho * Wo                    # true BN sample count per channel

    interm_dtype = matmul_dtype
    mm_sz = jnp.dtype(matmul_dtype).itemsize
    it_sz = jnp.dtype(interm_dtype).itemsize
    align = 16 if it_sz < 4 else SUBLANE   # bf16 packs 16 rows per vreg

    # ---- input prep: NHWC, zero-pad spatially, phase-decompose for the stride, flatten ----
    xh = x.transpose(0, 2, 3, 1)                                     # module contract is NCHW
    xp = jnp.pad(xh, ((0, 0), (1, 1), (1, 1), (0, 0)))
    if s == 1:
        flat = xp.reshape(N, Hp * Wp, Cin)[None]                     # (1, N, Hp*Wp, Cin)
    else:
        xp2 = jnp.pad(xp, ((0, 0), (0, Hps * s - Hp), (0, Wps * s - Wp), (0, 0)))
        flat = (xp2.reshape(N, Hps, s, Wps, s, Cin)
                .transpose(2, 4, 0, 1, 3, 5)
                .reshape(s * s, N, Hps * Wps, Cin))
    L = _round_up(max(P + off_max, flat.shape[2]), SUBLANE)
    flat = jnp.pad(flat, ((0, 0), (0, 0), (0, L - flat.shape[2]), (0, 0))).astype(matmul_dtype)

    # ---- weight prep: one (Cin, Cp) slice per 3x3 tap, lane-padded output channels ----
    w1_taps = params["w1"].transpose(2, 3, 1, 0).reshape(9, in_channels, Cout)
    w1_taps = jnp.pad(w1_taps, ((0, 0), (0, 0), (0, Cp - Cout))).astype(matmul_dtype)
    w2_p = jnp.pad(params["w2"].reshape(Cout, Cout).T,
                   ((0, Cp - Cout), (0, Cp - Cout))).astype(matmul_dtype)
    if not identity_skip:
        ws_p = jnp.pad(params["ws"].reshape(Cout, in_channels).T,
                       ((0, 0), (0, Cp - Cout))).astype(matmul_dtype)

    def cparams(working_bytes):
        return pltpu.CompilerParams(
            dimension_semantics=("parallel",),                       # v7x: split across 2 TCs
            vmem_limit_bytes=int(min(max(4 * working_bytes, 16 << 20), 48 << 20)),
        )

    # --------------------------- pass 1: conv3x3 (+ 1x1 skip conv) --------------------------
    x_spec = pl.BlockSpec((s * s, 1, L, Cin), lambda n: (0, n, 0, 0))
    w1_spec = pl.BlockSpec((9, Cin, Cp), lambda n: (0, 0, 0))
    img_spec = pl.BlockSpec((1, P, Cp), lambda n: (n, 0, 0))
    n_stat = 2 if identity_skip else 4
    st1_spec = pl.BlockSpec((1, n_stat, Cp), lambda n: (n, 0, 0))

    est1 = (s * s * L * Cin * mm_sz * 2 + 10 * Cin * Cp * mm_sz * 2
            + (1 if identity_skip else 2) * P * Cp * it_sz * 2 + P * Cp * 4 + n_stat * Cp * 8)
    flops1 = 2 * N * P * Cin * Cp * (9 + (0 if identity_skip else 1))
    bytes1 = int(flat.size * mm_sz + 10 * Cin * Cp * mm_sz
                 + (1 if identity_skip else 2) * Mflat * Cp * it_sz + N * n_stat * Cp * 4)

    if identity_skip:
        h1, st1 = pl.pallas_call(
            _make_pass1_kernel(s, Ho, Wo, Wps, with_skip=False),
            grid=(N,),
            in_specs=[x_spec, w1_spec],
            out_specs=(img_spec, st1_spec),
            out_shape=(jax.ShapeDtypeStruct((N, P, Cp), interm_dtype),
                       jax.ShapeDtypeStruct((N, n_stat, Cp), jnp.float32)),
            scratch_shapes=[pltpu.VMEM((P, Cp), jnp.float32)],
            compiler_params=cparams(est1),
            cost_estimate=pl.CostEstimate(flops=int(flops1), transcendentals=0,
                                          bytes_accessed=bytes1),
        )(flat, w1_taps)
        sk = None
    else:
        h1, sk, st1 = pl.pallas_call(
            _make_pass1_kernel(s, Ho, Wo, Wps, with_skip=True),
            grid=(N,),
            in_specs=[x_spec, w1_spec, pl.BlockSpec((Cin, Cp), lambda n: (0, 0))],
            out_specs=(img_spec, img_spec, st1_spec),
            out_shape=(jax.ShapeDtypeStruct((N, P, Cp), interm_dtype),
                       jax.ShapeDtypeStruct((N, P, Cp), interm_dtype),
                       jax.ShapeDtypeStruct((N, n_stat, Cp), jnp.float32)),
            scratch_shapes=[pltpu.VMEM((P, Cp), jnp.float32)],
            compiler_params=cparams(est1),
            cost_estimate=pl.CostEstimate(flops=int(flops1), transcendentals=0,
                                          bytes_accessed=bytes1),
        )(flat, w1_taps, ws_p)

    sc1, sh1 = _bn_affine(st1[:, 0:2, :], params["g1"], params["b1"], count, Cout, Cp)
    if not identity_skip:
        scs, shs = _bn_affine(st1[:, 2:4, :], params["gs"], params["bs"], count, Cout, Cp)

    h1_2d = h1.reshape(Mflat, Cp)

    # --------------------------- pass 2: BN1 affine + ReLU + conv1x1 ------------------------
    tile_bn = _pick_tile(tile_rows_bn, Mflat, align, Cp * (2 * it_sz + 12))
    nt2 = pl.cdiv(Mflat, tile_bn)
    row_bn = pl.BlockSpec((tile_bn, Cp), lambda i: (i, 0))
    vec = pl.BlockSpec((1, Cp), lambda i: (0, 0))
    est2 = tile_bn * Cp * (2 * it_sz + 8) * 2 + Cp * Cp * mm_sz * 2

    h2, st2 = pl.pallas_call(
        _make_pass2_kernel(tile_bn, Mflat, Wps, Wo, matmul_dtype),
        grid=(nt2,),
        in_specs=[row_bn, vec, vec, pl.BlockSpec((Cp, Cp), lambda i: (0, 0))],
        out_specs=(row_bn, pl.BlockSpec((1, 2, Cp), lambda i: (i, 0, 0))),
        out_shape=(jax.ShapeDtypeStruct((Mflat, Cp), interm_dtype),
                   jax.ShapeDtypeStruct((nt2, 2, Cp), jnp.float32)),
        compiler_params=cparams(est2),
        cost_estimate=pl.CostEstimate(flops=int(2 * Mflat * Cp * Cp + 6 * Mflat * Cp),
                                      transcendentals=0,
                                      bytes_accessed=int(2 * Mflat * Cp * it_sz + Cp * Cp * mm_sz)),
    )(h1_2d, sc1, sh1, w2_p)

    sc2, sh2 = _bn_affine(st2, params["g2"], params["b2"], count, Cout, Cp)

    # --------------------------- pass 3: BN2 affine + skip + ReLU ---------------------------
    tile_out = _pick_tile(tile_rows_out, Mflat, align, Cp * (3 * it_sz + 8))
    nt3 = pl.cdiv(Mflat, tile_out)
    row_out = pl.BlockSpec((tile_out, Cp), lambda i: (i, 0))
    vec3 = pl.BlockSpec((1, Cp), lambda i: (0, 0))
    est3 = tile_out * Cp * (3 * it_sz + 8) * 2

    if identity_skip:
        xs = xp.reshape(N, Hp * Wp, Cin)[:, Wp + 1:Wp + 1 + P, :]    # center tap == x (f32)
        xs = jnp.pad(xs, ((0, 0), (0, 0), (0, Cp - Cout))).reshape(Mflat, Cp)
        out_flat = pl.pallas_call(
            _pass3_identity_kernel,
            grid=(nt3,),
            in_specs=[row_out, row_out, vec3, vec3],
            out_specs=row_out,
            out_shape=jax.ShapeDtypeStruct((Mflat, Cp), interm_dtype),
            input_output_aliases={0: 0},                              # reuse the h2 buffer
            compiler_params=cparams(est3),
            cost_estimate=pl.CostEstimate(flops=int(4 * Mflat * Cp), transcendentals=0,
                                          bytes_accessed=int(3 * Mflat * Cp * 4)),
        )(h2, xs, sc2, sh2)
    else:
        sk_2d = sk.reshape(Mflat, Cp)
        out_flat = pl.pallas_call(
            _pass3_conv_skip_kernel,
            grid=(nt3,),
            in_specs=[row_out, row_out, vec3, vec3, vec3, vec3],
            out_specs=row_out,
            out_shape=jax.ShapeDtypeStruct((Mflat, Cp), interm_dtype),
            input_output_aliases={0: 0},                              # reuse the h2 buffer
            compiler_params=cparams(est3),
            cost_estimate=pl.CostEstimate(flops=int(6 * Mflat * Cp), transcendentals=0,
                                          bytes_accessed=int(3 * Mflat * Cp * it_sz)),
        )(h2, sk_2d, sc2, sh2, scs, shs)

    # strip padded-width garbage columns + lane padding, restore NCHW module contract
    out = out_flat.reshape(N, Ho, Wps, Cp)[:, :, :Wo, :Cout]
    return out.astype(jnp.float32).transpose(0, 3, 1, 2)


# ------------------------------ pure-JAX reference -----------------------------
def resblock_reference(x, params, in_channels, out_channels, stride=None):
    stride = stride or (1 if in_channels >= out_channels else 2)
    identity_skip = (stride == 1 and in_channels == out_channels)

    def conv(y, w, s, pad):
        return jax.lax.conv_general_dilated(
            y, w, (s, s), pad, dimension_numbers=("NCHW", "OIHW", "NCHW"))

    def bn(y, g, b):
        mu = y.mean(axis=(0, 2, 3), keepdims=True)
        var = ((y - mu) ** 2).mean(axis=(0, 2, 3), keepdims=True)
        return (y - mu) / jnp.sqrt(var + BN_EPS) * g[None, :, None, None] + b[None, :, None, None]

    h = conv(x, params["w1"], stride, [(1, 1), (1, 1)])
    h = jax.nn.relu(bn(h, params["g1"], params["b1"]))
    h = bn(conv(h, params["w2"], 1, [(0, 0), (0, 0)]), params["g2"], params["b2"])
    sk = x if identity_skip else bn(conv(x, params["ws"], stride, [(0, 0), (0, 0)]),
                                    params["gs"], params["bs"])
    return jax.nn.relu(h + sk)


# --------------------------------- params --------------------------------------
def make_params(key, in_channels, out_channels):
    ks = jax.random.split(key, 9)
    return {
        "w1": 0.1 * jax.random.normal(ks[0], (out_channels, in_channels, 3, 3), jnp.float32),
        "g1": 1.0 + 0.1 * jax.random.normal(ks[1], (out_channels,), jnp.float32),
        "b1": 0.1 * jax.random.normal(ks[2], (out_channels,), jnp.float32),
        "w2": 0.1 * jax.random.normal(ks[3], (out_channels, out_channels, 1, 1), jnp.float32),
        "g2": 1.0 + 0.1 * jax.random.normal(ks[4], (out_channels,), jnp.float32),
        "b2": 0.1 * jax.random.normal(ks[5], (out_channels,), jnp.float32),
        "ws": 0.1 * jax.random.normal(ks[6], (out_channels, in_channels, 1, 1), jnp.float32),
        "gs": 1.0 + 0.1 * jax.random.normal(ks[7], (out_channels,), jnp.float32),
        "bs": 0.1 * jax.random.normal(ks[8], (out_channels,), jnp.float32),
    }


if __name__ == "__main__":
    key = jax.random.PRNGKey(0)
    kx, kp1, kp2, kp3 = jax.random.split(key, 4)

    N, H, W = 2, 16, 16

    # Case 1: in < out -> stride 2, conv+BN skip, exact f32 path.
    C_in, C_out = 4, 8
    x = jax.random.normal(kx, (N, C_in, H, W), jnp.float32)
    params = make_params(kp1, C_in, C_out)
    fwd = jax.jit(functools.partial(resblock_forward, in_channels=C_in, out_channels=C_out,
                                    matmul_dtype=jnp.float32))
    out = jax.block_until_ready(fwd(x, params))
    ref = jax.block_until_ready(resblock_reference(x, params, C_in, C_out))
    assert out.shape == (N, C_out, H // 2, W // 2), out.shape
    assert jnp.allclose(out, ref, rtol=1e-3, atol=1e-3), float(jnp.max(jnp.abs(out - ref)))

    # Case 2: identity skip (stride 1, in == out); small row tiles exercise cross-tile BN
    # statistics accumulation and the partial edge-block masking in passes 2/3.
    params_id = make_params(kp2, C_in, C_in)
    fwd_id = jax.jit(functools.partial(resblock_forward, in_channels=C_in, out_channels=C_in,
                                       matmul_dtype=jnp.float32,
                                       tile_rows_bn=128, tile_rows_out=256))
    out_id = jax.block_until_ready(fwd_id(x, params_id))
    ref_id = jax.block_until_ready(resblock_reference(x, params_id, C_in, C_in))
    assert out_id.shape == (N, C_in, H, W), out_id.shape
    assert jnp.allclose(out_id, ref_id, rtol=1e-3, atol=1e-3), \
        float(jnp.max(jnp.abs(out_id - ref_id)))

    # Case 3: in > out -> stride 1 with a conv+BN skip (exercises the stride-1 skip-conv path).
    C_in3, C_out3 = 8, 4
    x3 = jax.random.normal(kp3, (N, C_in3, H, W), jnp.float32)
    params3 = make_params(kp2, C_in3, C_out3)
    fwd3 = jax.jit(functools.partial(resblock_forward, in_channels=C_in3, out_channels=C_out3,
                                     matmul_dtype=jnp.float32))
    out3 = jax.block_until_ready(fwd3(x3, params3))
    ref3 = jax.block_until_ready(resblock_reference(x3, params3, C_in3, C_out3))
    assert out3.shape == (N, C_out3, H, W), out3.shape
    assert jnp.allclose(out3, ref3, rtol=1e-3, atol=1e-3), float(jnp.max(jnp.abs(out3 - ref3)))

    # Case 4: default bf16 MXU path (bf16 operands + bf16 intermediates); loose tolerance.
    fwd_bf = jax.jit(functools.partial(resblock_forward, in_channels=C_in, out_channels=C_out))
    out_bf = jax.block_until_ready(fwd_bf(x, params))
    assert out_bf.shape == ref.shape
    assert jnp.allclose(out_bf, ref, rtol=2.5e-1, atol=2.5e-1), \
        float(jnp.max(jnp.abs(out_bf - ref)))

    print("KERNEL_OK")
</pallas_src>

<mosaic_0001>
module attributes {stable_mosaic.version = 11 : i64} {
  func.func @kernel(%arg0: i32, %arg1: memref<4x1x88x4xf32, #tpu.memory_space<vmem>>, %arg2: memref<9x4x128xf32, #tpu.memory_space<vmem>>, %arg3: memref<4x128xf32, #tpu.memory_space<vmem>>, %arg4: memref<1x72x128xf32, #tpu.memory_space<vmem>>, %arg5: memref<1x72x128xf32, #tpu.memory_space<vmem>>, %arg6: memref<1x4x128xf32, #tpu.memory_space<vmem>>, %arg7: memref<72x128xf32, #tpu.memory_space<vmem>>) attributes {dimension_semantics = [#tpu.dimension_semantics<parallel>], iteration_bounds = array<i64: 2>, scalar_prefetch = 0 : i64, scratch_operands = 1 : i64, tpu.core_type = #tpu.core_type<tc>, window_params = [{transform_indices = @transform_0, window_bounds = array<i64: 4, 1, 88, 4>}, {pipeline_mode = #tpu.pipeline_mode<synchronous>, transform_indices = @transform_1, window_bounds = array<i64: 9, 4, 128>}, {pipeline_mode = #tpu.pipeline_mode<synchronous>, transform_indices = @transform_2, window_bounds = array<i64: 4, 128>}, {transform_indices = @transform_3, window_bounds = array<i64: 1, 72, 128>}, {transform_indices = @transform_4, window_bounds = array<i64: 1, 72, 128>}, {transform_indices = @transform_5, window_bounds = array<i64: 1, 4, 128>}]} {
    %c0 = arith.constant 0 : index
    %c0_0 = arith.constant 0 : index
    %c0_1 = arith.constant 0 : index
    %c0_2 = arith.constant 0 : index
    %0 = vector.load %arg1[%c0, %c0_0, %c0_1, %c0_2] : memref<4x1x88x4xf32, #tpu.memory_space<vmem>>, vector<1x1x72x4xf32>
    %1 = vector.shape_cast %0 : vector<1x1x72x4xf32> to vector<72x4xf32>
    %c0_3 = arith.constant 0 : index
    %c0_4 = arith.constant 0 : index
    %c0_5 = arith.constant 0 : index
    %2 = vector.load %arg2[%c0_3, %c0_4, %c0_5] : memref<9x4x128xf32, #tpu.memory_space<vmem>>, vector<1x4x128xf32>
    %3 = vector.shape_cast %2 : vector<1x4x128xf32> to vector<4x128xf32>
    %cst = arith.constant dense<0.000000e+00> : vector<72x128xf32>
    %4 = tpu.matmul %1, %3, %cst {dimension_numbers = #tpu.dot_dimension_numbers<[1], [0], [0], [1], [0, 0, 1, 1], [], []>} : vector<72x4xf32>, vector<4x128xf32>, vector<72x128xf32> -> vector<72x128xf32>
    %c0_6 = arith.constant 0 : index
    %c0_7 = arith.constant 0 : index
    %5 = vector.load %arg7[%c0_6, %c0_7] : memref<72x128xf32, #tpu.memory_space<vmem>>, vector<72x128xf32>
    tpu.vector_store %arg7[%c0_6, %c0_7], %4 {strides = array<i32>} : memref<72x128xf32, #tpu.memory_space<vmem>>, vector<72x128xf32>,
    %c1 = arith.constant 1 : index
    %c0_8 = arith.constant 0 : index
    %c0_9 = arith.constant 0 : index
    %c0_10 = arith.constant 0 : index
    %6 = vector.load %arg1[%c1, %c0_8, %c0_9, %c0_10] : memref<4x1x88x4xf32, #tpu.memory_space<vmem>>, vector<1x1x72x4xf32>
    %7 = vector.shape_cast %6 : vector<1x1x72x4xf32> to vector<72x4xf32>
    %c1_11 = arith.constant 1 : index
    %c0_12 = arith.constant 0 : index
    %c0_13 = arith.constant 0 : index
    %8 = vector.load %arg2[%c1_11, %c0_12, %c0_13] : memref<9x4x128xf32, #tpu.memory_space<vmem>>, vector<1x4x128xf32>
    %9 = vector.shape_cast %8 : vector<1x4x128xf32> to vector<4x128xf32>
    %cst_14 = arith.constant dense<0.000000e+00> : vector<72x128xf32>
    %10 = tpu.matmul %7, %9, %cst_14 {dimension_numbers = #tpu.dot_dimension_numbers<[1], [0], [0], [1], [0, 0, 1, 1], [], []>} : vector<72x4xf32>, vector<4x128xf32>, vector<72x128xf32> -> vector<72x128xf32>
    %c0_15 = arith.constant 0 : index
    %c0_16 = arith.constant 0 : index
    %11 = vector.load %arg7[%c0_15, %c0_16] : memref<72x128xf32, #tpu.memory_space<vmem>>, vector<72x128xf32>
    %12 = arith.addf %11, %10 : vector<72x128xf32>
    %c0_17 = arith.constant 0 : index
    %c0_18 = arith.constant 0 : index
    %13 = vector.load %arg7[%c0_17, %c0_18] : memref<72x128xf32, #tpu.memory_space<vmem>>, vector<72x128xf32>
    tpu.vector_store %arg7[%c0_17, %c0_18], %12 {strides = array<i32>} : memref<72x128xf32, #tpu.memory_space<vmem>>, vector<72x128xf32>,
    %c0_19 = arith.constant 0 : index
    %c0_20 = arith.constant 0 : index
    %c1_21 = arith.constant 1 : index
    %c0_22 = arith.constant 0 : index
    %14 = vector.load %arg1[%c0_19, %c0_20, %c1_21, %c0_22] : memref<4x1x88x4xf32, #tpu.memory_space<vmem>>, vector<1x1x72x4xf32>
    %15 = vector.shape_cast %14 : vector<1x1x72x4xf32> to vector<72x4xf32>
    %c2 = arith.constant 2 : index
    %c0_23 = arith.constant 0 : index
    %c0_24 = arith.constant 0 : index
    %16 = vector.load %arg2[%c2, %c0_23, %c0_24] : memref<9x4x128xf32, #tpu.memory_space<vmem>>, vector<1x4x128xf32>
    %17 = vector.shape_cast %16 : vector<1x4x128xf32> to vector<4x128xf32>
    %cst_25 = arith.constant dense<0.000000e+00> : vector<72x128xf32>
    %18 = tpu.matmul %15, %17, %cst_25 {dimension_numbers = #tpu.dot_dimension_numbers<[1], [0], [0], [1], [0, 0, 1, 1], [], []>} : vector<72x4xf32>, vector<4x128xf32>, vector<72x128xf32> -> vector<72x128xf32>
    %c0_26 = arith.constant 0 : index
    %c0_27 = arith.constant 0 : index
    %19 = vector.load %arg7[%c0_26, %c0_27] : memref<72x128xf32, #tpu.memory_space<vmem>>, vector<72x128xf32>
    %20 = arith.addf %19, %18 : vector<72x128xf32>
    %c0_28 = arith.constant 0 : index
    %c0_29 = arith.constant 0 : index
    %21 = vector.load %arg7[%c0_28, %c0_29] : memref<72x128xf32, #tpu.memory_space<vmem>>, vector<72x128xf32>
    tpu.vector_store %arg7[%c0_28, %c0_29], %20 {strides = array<i32>} : memref<72x128xf32, #tpu.memory_space<vmem>>, vector<72x128xf32>,
    %c2_30 = arith.constant 2 : index
    %c0_31 = arith.constant 0 : index
    %c0_32 = arith.constant 0 : index
    %c0_33 = arith.constant 0 : index
    %22 = vector.load %arg1[%c2_30, %c0_31, %c0_32, %c0_33] : memref<4x1x88x4xf32, #tpu.memory_space<vmem>>, vector<1x1x72x4xf32>
    %23 = vector.shape_cast %22 : vector<1x1x72x4xf32> to vector<72x4xf32>
    %c3 = arith.constant 3 : index
    %c0_34 = arith.constant 0 : index
    %c0_35 = arith.constant 0 : index
    %24 = vector.load %arg2[%c3, %c0_34, %c0_35] : memref<9x4x128xf32, #tpu.memory_space<vmem>>, vector<1x4x128xf32>
    %25 = vector.shape_cast %24 : vector<1x4x128xf32> to vector<4x128xf32>
    %cst_36 = arith.constant dense<0.000000e+00> : vector<72x128xf32>
    %26 = tpu.matmul %23, %25, %cst_36 {dimension_numbers = #tpu.dot_dimension_numbers<[1], [0], [0], [1], [0, 0, 1, 1], [], []>} : vector<72x4xf32>, vector<4x128xf32>, vector<72x128xf32> -> vector<72x128xf32>
    %c0_37 = arith.constant 0 : index
    %c0_38 = arith.constant 0 : index
    %27 = vector.load %arg7[%c0_37, %c0_38] : memref<72x128xf32, #tpu.memory_space<vmem>>, vector<72x128xf32>
    %28 = arith.addf %27, %26 : vector<72x128xf32>
    %c0_39 = arith.constant 0 : index
    %c0_40 = arith.constant 0 : index
    %29 = vector.load %arg7[%c0_39, %c0_40] : memref<72x128xf32, #tpu.memory_space<vmem>>, vector<72x128xf32>
    tpu.vector_store %arg7[%c0_39, %c0_40], %28 {strides = array<i32>} : memref<72x128xf32, #tpu.memory_space<vmem>>, vector<72x128xf32>,
    %c3_41 = arith.constant 3 : index
    %c0_42 = arith.constant 0 : index
    %c0_43 = arith.constant 0 : index
    %c0_44 = arith.constant 0 : index
    %30 = vector.load %arg1[%c3_41, %c0_42, %c0_43, %c0_44] : memref<4x1x88x4xf32, #tpu.memory_space<vmem>>, vector<1x1x72x4xf32>
    %31 = vector.shape_cast %30 : vector<1x1x72x4xf32> to vector<72x4xf32>
    %c4 = arith.constant 4 : index
    %c0_45 = arith.constant 0 : index
    %c0_46 = arith.constant 0 : index
    %32 = vector.load %arg2[%c4, %c0_45, %c0_46] : memref<9x4x128xf32, #tpu.memory_space<vmem>>, vector<1x4x128xf32>
    %33 = vector.shape_cast %32 : vector<1x4x128xf32> to vector<4x128xf32>
    %cst_47 = arith.constant dense<0.000000e+00> : vector<72x128xf32>
    %34 = tpu.matmul %31, %33, %cst_47 {dimension_numbers = #tpu.dot_dimension_numbers<[1], [0], [0], [1], [0, 0, 1, 1], [], []>} : vector<72x4xf32>, vector<4x128xf32>, vector<72x128xf32> -> vector<72x128xf32>
    %c0_48 = arith.constant 0 : index
    %c0_49 = arith.constant 0 : index
    %35 = vector.load %arg7[%c0_48, %c0_49] : memref<72x128xf32, #tpu.memory_space<vmem>>, vector<72x128xf32>
    %36 = arith.addf %35, %34 : vector<72x128xf32>
    %c0_50 = arith.constant 0 : index
    %c0_51 = arith.constant 0 : index
    %37 = vector.load %arg7[%c0_50, %c0_51] : memref<72x128xf32, #tpu.memory_space<vmem>>, vector<72x128xf32>
    tpu.vector_store %arg7[%c0_50, %c0_51], %36 {strides = array<i32>} : memref<72x128xf32, #tpu.memory_space<vmem>>, vector<72x128xf32>,
    %c2_52 = arith.constant 2 : index
    %c0_53 = arith.constant 0 : index
    %c1_54 = arith.constant 1 : index
    %c0_55 = arith.constant 0 : index
    %38 = vector.load %arg1[%c2_52, %c0_53, %c1_54, %c0_55] : memref<4x1x88x4xf32, #tpu.memory_space<vmem>>, vector<1x1x72x4xf32>
    %39 = vector.shape_cast %38 : vector<1x1x72x4xf32> to vector<72x4xf32>
    %c5 = arith.constant 5 : index
    %c0_56 = arith.constant 0 : index
    %c0_57 = arith.constant 0 : index
    %40 = vector.load %arg2[%c5, %c0_56, %c0_57] : memref<9x4x128xf32, #tpu.memory_space<vmem>>, vector<1x4x128xf32>
    %41 = vector.shape_cast %40 : vector<1x4x128xf32> to vector<4x128xf32>
    %cst_58 = arith.constant dense<0.000000e+00> : vector<72x128xf32>
    %42 = tpu.matmul %39, %41, %cst_58 {dimension_numbers = #tpu.dot_dimension_numbers<[1], [0], [0], [1], [0, 0, 1, 1], [], []>} : vector<72x4xf32>, vector<4x128xf32>, vector<72x128xf32> -> vector<72x128xf32>
    %c0_59 = arith.constant 0 : index
    %c0_60 = arith.constant 0 : index
    %43 = vector.load %arg7[%c0_59, %c0_60] : memref<72x128xf32, #tpu.memory_space<vmem>>, vector<72x128xf32>
    %44 = arith.addf %43, %42 : vector<72x128xf32>
    %c0_61 = arith.constant 0 : index
    %c0_62 = arith.constant 0 : index
    %45 = vector.load %arg7[%c0_61, %c0_62] : memref<72x128xf32, #tpu.memory_space<vmem>>, vector<72x128xf32>
    tpu.vector_store %arg7[%c0_61, %c0_62], %44 {strides = array<i32>} : memref<72x128xf32, #tpu.memory_space<vmem>>, vector<72x128xf32>,
    %c0_63 = arith.constant 0 : index
    %c0_64 = arith.constant 0 : index
    %c9 = arith.constant 9 : index
    %c0_65 = arith.constant 0 : index
    %46 = vector.load %arg1[%c0_63, %c0_64, %c9, %c0_65] : memref<4x1x88x4xf32, #tpu.memory_space<vmem>>, vector<1x1x72x4xf32>
    %47 = vector.shape_cast %46 : vector<1x1x72x4xf32> to vector<72x4xf32>
    %c6 = arith.constant 6 : index
    %c0_66 = arith.constant 0 : index
    %c0_67 = arith.constant 0 : index
    %48 = vector.load %arg2[%c6, %c0_66, %c0_67] : memref<9x4x128xf32, #tpu.memory_space<vmem>>, vector<1x4x128xf32>
    %49 = vector.shape_cast %48 : vector<1x4x128xf32> to vector<4x128xf32>
    %cst_68 = arith.constant dense<0.000000e+00> : vector<72x128xf32>
    %50 = tpu.matmul %47, %49, %cst_68 {dimension_numbers = #tpu.dot_dimension_numbers<[1], [0], [0], [1], [0, 0, 1, 1], [], []>} : vector<72x4xf32>, vector<4x128xf32>, vector<72x128xf32> -> vector<72x128xf32>
    %c0_69 = arith.constant 0 : index
    %c0_70 = arith.constant 0 : index
    %51 = vector.load %arg7[%c0_69, %c0_70] : memref<72x128xf32, #tpu.memory_space<vmem>>, vector<72x128xf32>
    %52 = arith.addf %51, %50 : vector<72x128xf32>
    %c0_71 = arith.constant 0 : index
    %c0_72 = arith.constant 0 : index
    %53 = vector.load %arg7[%c0_71, %c0_72] : memref<72x128xf32, #tpu.memory_space<vmem>>, vector<72x128xf32>
    tpu.vector_store %arg7[%c0_71, %c0_72], %52 {strides = array<i32>} : memref<72x128xf32, #tpu.memory_space<vmem>>, vector<72x128xf32>,
    %c1_73 = arith.constant 1 : index
    %c0_74 = arith.constant 0 : index
    %c9_75 = arith.constant 9 : index
    %c0_76 = arith.constant 0 : index
    %54 = vector.load %arg1[%c1_73, %c0_74, %c9_75, %c0_76] : memref<4x1x88x4xf32, #tpu.memory_space<vmem>>, vector<1x1x72x4xf32>
    %55 = vector.shape_cast %54 : vector<1x1x72x4xf32> to vector<72x4xf32>
    %c7 = arith.constant 7 : index
    %c0_77 = arith.constant 0 : index
    %c0_78 = arith.constant 0 : index
    %56 = vector.load %arg2[%c7, %c0_77, %c0_78] : memref<9x4x128xf32, #tpu.memory_space<vmem>>, vector<1x4x128xf32>
    %57 = vector.shape_cast %56 : vector<1x4x128xf32> to vector<4x128xf32>
    %cst_79 = arith.constant dense<0.000000e+00> : vector<72x128xf32>
    %58 = tpu.matmul %55, %57, %cst_79 {dimension_numbers = #tpu.dot_dimension_numbers<[1], [0], [0], [1], [0, 0, 1, 1], [], []>} : vector<72x4xf32>, vector<4x128xf32>, vector<72x128xf32> -> vector<72x128xf32>
    %c0_80 = arith.constant 0 : index
    %c0_81 = arith.constant 0 : index
    %59 = vector.load %arg7[%c0_80, %c0_81] : memref<72x128xf32, #tpu.memory_space<vmem>>, vector<72x128xf32>
    %60 = arith.addf %59, %58 : vector<72x128xf32>
    %c0_82 = arith.constant 0 : index
    %c0_83 = arith.constant 0 : index
    %61 = vector.load %arg7[%c0_82, %c0_83] : memref<72x128xf32, #tpu.memory_space<vmem>>, vector<72x128xf32>
    tpu.vector_store %arg7[%c0_82, %c0_83], %60 {strides = array<i32>} : memref<72x128xf32, #tpu.memory_space<vmem>>, vector<72x128xf32>,
    %c0_84 = arith.constant 0 : index
    %c0_85 = arith.constant 0 : index
    %c10 = arith.constant 10 : index
    %c0_86 = arith.constant 0 : index
    %62 = vector.load %arg1[%c0_84, %c0_85, %c10, %c0_86] : memref<4x1x88x4xf32, #tpu.memory_space<vmem>>, vector<1x1x72x4xf32>
    %63 = vector.shape_cast %62 : vector<1x1x72x4xf32> to vector<72x4xf32>
    %c8 = arith.constant 8 : index
    %c0_87 = arith.constant 0 : index
    %c0_88 = arith.constant 0 : index
    %64 = vector.load %arg2[%c8, %c0_87, %c0_88] : memref<9x4x128xf32, #tpu.memory_space<vmem>>, vector<1x4x128xf32>
    %65 = vector.shape_cast %64 : vector<1x4x128xf32> to vector<4x128xf32>
    %cst_89 = arith.constant dense<0.000000e+00> : vector<72x128xf32>
    %66 = tpu.matmul %63, %65, %cst_89 {dimension_numbers = #tpu.dot_dimension_numbers<[1], [0], [0], [1], [0, 0, 1, 1], [], []>} : vector<72x4xf32>, vector<4x128xf32>, vector<72x128xf32> -> vector<72x128xf32>
    %c0_90 = arith.constant 0 : index
    %c0_91 = arith.constant 0 : index
    %67 = vector.load %arg7[%c0_90, %c0_91] : memref<72x128xf32, #tpu.memory_space<vmem>>, vector<72x128xf32>
    %68 = arith.addf %67, %66 : vector<72x128xf32>
    %c0_92 = arith.constant 0 : index
    %c0_93 = arith.constant 0 : index
    %69 = vector.load %arg7[%c0_92, %c0_93] : memref<72x128xf32, #tpu.memory_space<vmem>>, vector<72x128xf32>
    tpu.vector_store %arg7[%c0_92, %c0_93], %68 {strides = array<i32>} : memref<72x128xf32, #tpu.memory_space<vmem>>, vector<72x128xf32>,
    %c0_94 = arith.constant 0 : index
    %c0_95 = arith.constant 0 : index
    %70 = vector.load %arg7[%c0_94, %c0_95] : memref<72x128xf32, #tpu.memory_space<vmem>>, vector<72x128xf32>
    %c3_96 = arith.constant 3 : index
    %c0_97 = arith.constant 0 : index
    %c0_98 = arith.constant 0 : index
    %c0_99 = arith.constant 0 : index
    %71 = vector.load %arg1[%c3_96, %c0_97, %c0_98, %c0_99] : memref<4x1x88x4xf32, #tpu.memory_space<vmem>>, vector<1x1x72x4xf32>
    %72 = vector.shape_cast %71 : vector<1x1x72x4xf32> to vector<72x4xf32>
    %c0_100 = arith.constant 0 : index
    %c0_101 = arith.constant 0 : index
    %73 = vector.load %arg3[%c0_100, %c0_101] : memref<4x128xf32, #tpu.memory_space<vmem>>, vector<4x128xf32>
    %cst_102 = arith.constant dense<0.000000e+00> : vector<72x128xf32>
    %74 = tpu.matmul %72, %73, %cst_102 {dimension_numbers = #tpu.dot_dimension_numbers<[1], [0], [0], [1], [0, 0, 1, 1], [], []>} : vector<72x4xf32>, vector<4x128xf32>, vector<72x128xf32> -> vector<72x128xf32>
    %75 = tpu.iota {dimensions = array<i32: 0>} : vector<72x1xi32>
    %c9_i32 = arith.constant 9 : i32
    %c0_i32 = arith.constant 0 : i32
    %76 = arith.cmpi eq, %c9_i32, %c0_i32 : i32
    %c1_i32 = arith.constant 1 : i32
    %77 = arith.select %76, %c1_i32, %c9_i32 : i32
    %78 = vector.broadcast %77 : i32 to vector<72x1xi32>
    %79 = arith.remsi %75, %78 : vector<72x1xi32>
    %c0_i32_103 = arith.constant 0 : i32
    %80 = vector.broadcast %c0_i32_103 : i32 to vector<72x1xi32>
    %81 = arith.cmpi ne, %79, %80 : vector<72x1xi32>
    %c0_i32_104 = arith.constant 0 : i32
    %82 = vector.broadcast %c0_i32_104 : i32 to vector<72x1xi32>
    %83 = arith.cmpi slt, %79, %82 : vector<72x1xi32>
    %c0_i32_105 = arith.constant 0 : i32
    %84 = arith.cmpi slt, %77, %c0_i32_105 : i32
    %85 = vector.broadcast %84 : i1 to vector<72x1xi1>
    %86 = vector.broadcast %85 : vector<72x1xi1> to vector<72x1xi1>
    %87 = arith.xori %83, %86 : vector<72x1xi1>
    %88 = arith.andi %87, %81 : vector<72x1xi1>
    %89 = vector.broadcast %77 : i32 to vector<72x1xi32>
    %90 = arith.addi %79, %89 : vector<72x1xi32>
    %91 = arith.select %88, %90, %79 : vector<72x1xi1>, vector<72x1xi32>
    %c8_i32 = arith.constant 8 : i32
    %92 = vector.broadcast %c8_i32 : i32 to vector<72x1xi32>
    %93 = arith.cmpi slt, %91, %92 : vector<72x1xi32>
    %cst_106 = arith.constant 0.000000e+00 : f32
    %94 = vector.shape_cast %93 : vector<72x1xi1> to vector<72x1xi1>
    %95 = vector.broadcast %94 : vector<72x1xi1> to vector<72x128xi1>
    %96 = vector.broadcast %cst_106 : f32 to vector<72x128xf32>
    %97 = arith.select %95, %70, %96 : vector<72x128xi1>, vector<72x128xf32>
    %cst_107 = arith.constant 0.000000e+00 : f32
    %98 = vector.shape_cast %93 : vector<72x1xi1> to vector<72x1xi1>
    %99 = vector.broadcast %98 : vector<72x1xi1> to vector<72x128xi1>
    %100 = vector.broadcast %cst_107 : f32 to vector<72x128xf32>
    %101 = arith.select %99, %74, %100 : vector<72x128xi1>, vector<72x128xf32>
    %cst_108 = arith.constant dense<0.000000e+00> : vector<128xf32>
    %102 = vector.multi_reduction <add>, %97, %cst_108 [0] : vector<72x128xf32> to vector<128xf32>
    %103 = vector.shape_cast %102 : vector<128xf32> to vector<1x128xf32>
    %c0_109 = arith.constant 0 : index
    %c0_110 = arith.constant 0 : index
    %c0_111 = arith.constant 0 : index
    %104 = vector.load %arg6[%c0_109, %c0_110, %c0_111] : memref<1x4x128xf32, #tpu.memory_space<vmem>>, vector<1x1x128xf32>
    %105 = vector.shape_cast %104 : vector<1x1x128xf32> to vector<1x128xf32>
    %106 = vector.shape_cast %103 : vector<1x128xf32> to vector<1x1x128xf32>
    tpu.vector_store %arg6[%c0_109, %c0_110, %c0_111], %106 {strides = array<i32>} : memref<1x4x128xf32, #tpu.memory_space<vmem>>, vector<1x1x128xf32>,
    %107 = arith.mulf %97, %97 : vector<72x128xf32>
    %cst_112 = arith.constant dense<0.000000e+00> : vector<128xf32>
    %108 = vector.multi_reduction <add>, %107, %cst_112 [0] : vector<72x128xf32> to vector<128xf32>
    %109 = vector.shape_cast %108 : vector<128xf32> to vector<1x128xf32>
    %c0_113 = arith.constant 0 : index
    %c1_114 = arith.constant 1 : index
    %c0_115 = arith.constant 0 : index
    %110 = vector.load %arg6[%c0_113, %c1_114, %c0_115] : memref<1x4x128xf32, #tpu.memory_space<vmem>>, vector<1x1x128xf32>
    %111 = vector.shape_cast %110 : vector<1x1x128xf32> to vector<1x128xf32>
    %112 = vector.shape_cast %109 : vector<1x128xf32> to vector<1x1x128xf32>
    tpu.vector_store %arg6[%c0_113, %c1_114, %c0_115], %112 {strides = array<i32>} : memref<1x4x128xf32, #tpu.memory_space<vmem>>, vector<1x1x128xf32>,
    %cst_116 = arith.constant dense<0.000000e+00> : vector<128xf32>
    %113 = vector.multi_reduction <add>, %101, %cst_116 [0] : vector<72x128xf32> to vector<128xf32>
    %114 = vector.shape_cast %113 : vector<128xf32> to vector<1x128xf32>
    %c0_117 = arith.constant 0 : index
    %c2_118 = arith.constant 2 : index
    %c0_119 = arith.constant 0 : index
    %115 = vector.load %arg6[%c0_117, %c2_118, %c0_119] : memref<1x4x128xf32, #tpu.memory_space<vmem>>, vector<1x1x128xf32>
    %116 = vector.shape_cast %115 : vector<1x1x128xf32> to vector<1x128xf32>
    %117 = vector.shape_cast %114 : vector<1x128xf32> to vector<1x1x128xf32>
    tpu.vector_store %arg6[%c0_117, %c2_118, %c0_119], %117 {strides = array<i32>} : memref<1x4x128xf32, #tpu.memory_space<vmem>>, vector<1x1x128xf32>,
    %118 = arith.mulf %101, %101 : vector<72x128xf32>
    %cst_120 = arith.constant dense<0.000000e+00> : vector<128xf32>
    %119 = vector.multi_reduction <add>, %118, %cst_120 [0] : vector<72x128xf32> to vector<128xf32>
    %120 = vector.shape_cast %119 : vector<128xf32> to vector<1x128xf32>
    %c0_121 = arith.constant 0 : index
    %c3_122 = arith.constant 3 : index
    %c0_123 = arith.constant 0 : index
    %121 = vector.load %arg6[%c0_121, %c3_122, %c0_123] : memref<1x4x128xf32, #tpu.memory_space<vmem>>, vector<1x1x128xf32>
    %122 = vector.shape_cast %121 : vector<1x1x128xf32> to vector<1x128xf32>
    %123 = vector.shape_cast %120 : vector<1x128xf32> to vector<1x1x128xf32>
    tpu.vector_store %arg6[%c0_121, %c3_122, %c0_123], %123 {strides = array<i32>} : memref<1x4x128xf32, #tpu.memory_space<vmem>>, vector<1x1x128xf32>,
    %c0_124 = arith.constant 0 : index
    %c0_125 = arith.constant 0 : index
    %c0_126 = arith.constant 0 : index
    %124 = vector.load %arg4[%c0_124, %c0_125, %c0_126] : memref<1x72x128xf32, #tpu.memory_space<vmem>>, vector<1x72x128xf32>
    %125 = vector.shape_cast %124 : vector<1x72x128xf32> to vector<72x128xf32>
    %126 = vector.shape_cast %70 : vector<72x128xf32> to vector<1x72x128xf32>
    tpu.vector_store %arg4[%c0_124, %c0_125, %c0_126], %126 {strides = array<i32>} : memref<1x72x128xf32, #tpu.memory_space<vmem>>, vector<1x72x128xf32>,
    %c0_127 = arith.constant 0 : index
    %c0_128 = arith.constant 0 : index
    %c0_129 = arith.constant 0 : index
    %127 = vector.load %arg5[%c0_127, %c0_128, %c0_129] : memref<1x72x128xf32, #tpu.memory_space<vmem>>, vector<1x72x128xf32>
    %128 = vector.shape_cast %127 : vector<1x72x128xf32> to vector<72x128xf32>
    %129 = vector.shape_cast %74 : vector<72x128xf32> to vector<1x72x128xf32>
    tpu.vector_store %arg5[%c0_127, %c0_128, %c0_129], %129 {strides = array<i32>} : memref<1x72x128xf32, #tpu.memory_space<vmem>>, vector<1x72x128xf32>,
    return
  }
  func.func @transform_0(%arg0: i32) -> (i32, i32, i32, i32) {
    %c0_i32 = arith.constant 0 : i32
    %c0_i32_0 = arith.constant 0 : i32
    %c0_i32_1 = arith.constant 0 : i32
    %c0_i32_2 = arith.constant 0 : i32
    return %c0_i32, %arg0, %c0_i32_0, %c0_i32_1 : i32, i32, i32, i32
  }
  func.func @transform_1(%arg0: i32) -> (i32, i32, i32) {
    %c0_i32 = arith.constant 0 : i32
    %c0_i32_0 = arith.constant 0 : i32
    %c0_i32_1 = arith.constant 0 : i32
    %c0_i32_2 = arith.constant 0 : i32
    return %c0_i32, %c0_i32_0, %c0_i32_1 : i32, i32, i32
  }
  func.func @transform_2(%arg0: i32) -> (i32, i32) {
    %c0_i32 = arith.constant 0 : i32
    %c0_i32_0 = arith.constant 0 : i32
    %c0_i32_1 = arith.constant 0 : i32
    return %c0_i32, %c0_i32_0 : i32, i32
  }
  func.func @transform_3(%arg0: i32) -> (i32, i32, i32) {
    %c0_i32 = arith.constant 0 : i32
    %c0_i32_0 = arith.constant 0 : i32
    %c0_i32_1 = arith.constant 0 : i32
    return %arg0, %c0_i32, %c0_i32_0 : i32, i32, i32
  }
  func.func @transform_4(%arg0: i32) -> (i32, i32, i32) {
    %c0_i32 = arith.constant 0 : i32
    %c0_i32_0 = arith.constant 0 : i32
    %c0_i32_1 = arith.constant 0 : i32
    return %arg0, %c0_i32, %c0_i32_0 : i32, i32, i32
  }
  func.func @transform_5(%arg0: i32) -> (i32, i32, i32) {
    %c0_i32 = arith.constant 0 : i32
    %c0_i32_0 = arith.constant 0 : i32
    %c0_i32_1 = arith.constant 0 : i32
    return %arg0, %c0_i32, %c0_i32_0 : i32, i32, i32
  }
}

module attributes {stable_mosaic.version = 11 : i64} {
  func.func @_pass3_conv_skip_kernel(%arg0: i32, %arg1: memref<144x128xf32, #tpu.memory_space<vmem>>, %arg2: memref<144x128xf32, #tpu.memory_space<vmem>>, %arg3: memref<1x128xf32, #tpu.memory_space<vmem>>, %arg4: memref<1x128xf32, #tpu.memory_space<vmem>>, %arg5: memref<1x128xf32, #tpu.memory_space<vmem>>, %arg6: memref<1x128xf32, #tpu.memory_space<vmem>>, %arg7: memref<144x128xf32, #tpu.memory_space<vmem>>) attributes {dimension_semantics = [#tpu.dimension_semantics<parallel>], iteration_bounds = array<i64: 1>, scalar_prefetch = 0 : i64, scratch_operands = 0 : i64, tpu.core_type = #tpu.core_type<tc>, window_params = [{transform_indices = @transform_0, window_bounds = array<i64: 144, 128>}, {transform_indices = @transform_1, window_bounds = array<i64: 144, 128>}, {pipeline_mode = #tpu.pipeline_mode<synchronous>, transform_indices = @transform_2, window_bounds = array<i64: 1, 128>}, {pipeline_mode = #tpu.pipeline_mode<synchronous>, transform_indices = @transform_3, window_bounds = array<i64: 1, 128>}, {pipeline_mode = #tpu.pipeline_mode<synchronous>, transform_indices = @transform_4, window_bounds = array<i64: 1, 128>}, {pipeline_mode = #tpu.pipeline_mode<synchronous>, transform_indices = @transform_5, window_bounds = array<i64: 1, 128>}, {transform_indices = @transform_6, window_bounds = array<i64: 144, 128>}]} {
    %c0 = arith.constant 0 : index
    %c0_0 = arith.constant 0 : index
    %0 = vector.load %arg1[%c0, %c0_0] : memref<144x128xf32, #tpu.memory_space<vmem>>, vector<144x128xf32>
    %c0_1 = arith.constant 0 : index
    %c0_2 = arith.constant 0 : index
    %1 = vector.load %arg3[%c0_1, %c0_2] : memref<1x128xf32, #tpu.memory_space<vmem>>, vector<1x128xf32>
    %2 = vector.broadcast %1 : vector<1x128xf32> to vector<144x128xf32>
    %3 = arith.mulf %0, %2 : vector<144x128xf32>
    %c0_3 = arith.constant 0 : index
    %c0_4 = arith.constant 0 : index
    %4 = vector.load %arg4[%c0_3, %c0_4] : memref<1x128xf32, #tpu.memory_space<vmem>>, vector<1x128xf32>
    %5 = vector.broadcast %4 : vector<1x128xf32> to vector<144x128xf32>
    %6 = arith.addf %3, %5 : vector<144x128xf32>
    %c0_5 = arith.constant 0 : index
    %c0_6 = arith.constant 0 : index
    %7 = vector.load %arg2[%c0_5, %c0_6] : memref<144x128xf32, #tpu.memory_space<vmem>>, vector<144x128xf32>
    %c0_7 = arith.constant 0 : index
    %c0_8 = arith.constant 0 : index
    %8 = vector.load %arg5[%c0_7, %c0_8] : memref<1x128xf32, #tpu.memory_space<vmem>>, vector<1x128xf32>
    %9 = vector.broadcast %8 : vector<1x128xf32> to vector<144x128xf32>
    %10 = arith.mulf %7, %9 : vector<144x128xf32>
    %11 = arith.addf %6, %10 : vector<144x128xf32>
    %c0_9 = arith.constant 0 : index
    %c0_10 = arith.constant 0 : index
    %12 = vector.load %arg6[%c0_9, %c0_10] : memref<1x128xf32, #tpu.memory_space<vmem>>, vector<1x128xf32>
    %13 = vector.broadcast %12 : vector<1x128xf32> to vector<144x128xf32>
    %14 = arith.addf %11, %13 : vector<144x128xf32>
    %cst = arith.constant 0.000000e+00 : f32
    %15 = vector.broadcast %cst : f32 to vector<144x128xf32>
    %16 = arith.maximumf %14, %15 : vector<144x128xf32>
    %c0_11 = arith.constant 0 : index
    %c0_12 = arith.constant 0 : index
    %17 = vector.load %arg7[%c0_11, %c0_12] : memref<144x128xf32, #tpu.memory_space<vmem>>, vector<144x128xf32>
    tpu.vector_store %arg7[%c0_11, %c0_12], %16 {strides = array<i32>} : memref<144x128xf32, #tpu.memory_space<vmem>>, vector<144x128xf32>,
    return
  }
  func.func @transform_0(%arg0: i32) -> (i32, i32) {
    %c0_i32 = arith.constant 0 : i32
    %c0_i32_0 = arith.constant 0 : i32
    return %arg0, %c0_i32 : i32, i32
  }
  func.func @transform_1(%arg0: i32) -> (i32, i32) {
    %c0_i32 = arith.constant 0 : i32
    %c0_i32_0 = arith.constant 0 : i32
    return %arg0, %c0_i32 : i32, i32
  }
  func.func @transform_2(%arg0: i32) -> (i32, i32) {
    %c0_i32 = arith.constant 0 : i32
    %c0_i32_0 = arith.constant 0 : i32
    %c0_i32_1 = arith.constant 0 : i32
    return %c0_i32, %c0_i32_0 : i32, i32
  }
  func.func @transform_3(%arg0: i32) -> (i32, i32) {
    %c0_i32 = arith.constant 0 : i32
    %c0_i32_0 = arith.constant 0 : i32
    %c0_i32_1 = arith.constant 0 : i32
    return %c0_i32, %c0_i32_0 : i32, i32
  }
  func.func @transform_4(%arg0: i32) -> (i32, i32) {
    %c0_i32 = arith.constant 0 : i32
    %c0_i32_0 = arith.constant 0 : i32
    %c0_i32_1 = arith.constant 0 : i32
    return %c0_i32, %c0_i32_0 : i32, i32
  }
  func.func @transform_5(%arg0: i32) -> (i32, i32) {
    %c0_i32 = arith.constant 0 : i32
    %c0_i32_0 = arith.constant 0 : i32
    %c0_i32_1 = arith.constant 0 : i32
    return %c0_i32, %c0_i32_0 : i32, i32
  }
  func.func @transform_6(%arg0: i32) -> (i32, i32) {
    %c0_i32 = arith.constant 0 : i32
    %c0_i32_0 = arith.constant 0 : i32
    return %arg0, %c0_i32 : i32, i32
  }
}

module attributes {stable_mosaic.version = 11 : i64} {
  func.func @kernel(%arg0: i32, %arg1: memref<144x128xf32, #tpu.memory_space<vmem>>, %arg2: memref<1x128xf32, #tpu.memory_space<vmem>>, %arg3: memref<1x128xf32, #tpu.memory_space<vmem>>, %arg4: memref<128x128xf32, #tpu.memory_space<vmem>>, %arg5: memref<144x128xf32, #tpu.memory_space<vmem>>, %arg6: memref<1x2x128xf32, #tpu.memory_space<vmem>>) attributes {dimension_semantics = [#tpu.dimension_semantics<parallel>], iteration_bounds = array<i64: 1>, scalar_prefetch = 0 : i64, scratch_operands = 0 : i64, tpu.core_type = #tpu.core_type<tc>, window_params = [{transform_indices = @transform_0, window_bounds = array<i64: 144, 128>}, {pipeline_mode = #tpu.pipeline_mode<synchronous>, transform_indices = @transform_1, window_bounds = array<i64: 1, 128>}, {pipeline_mode = #tpu.pipeline_mode<synchronous>, transform_indices = @transform_2, window_bounds = array<i64: 1, 128>}, {pipeline_mode = #tpu.pipeline_mode<synchronous>, transform_indices = @transform_3, window_bounds = array<i64: 128, 128>}, {transform_indices = @transform_4, window_bounds = array<i64: 144, 128>}, {transform_indices = @transform_5, window_bounds = array<i64: 1, 2, 128>}]} {
    %c0 = arith.constant 0 : index
    %c0_0 = arith.constant 0 : index
    %0 = vector.load %arg1[%c0, %c0_0] : memref<144x128xf32, #tpu.memory_space<vmem>>, vector<144x128xf32>
    %c0_1 = arith.constant 0 : index
    %c0_2 = arith.constant 0 : index
    %1 = vector.load %arg2[%c0_1, %c0_2] : memref<1x128xf32, #tpu.memory_space<vmem>>, vector<1x128xf32>
    %2 = vector.broadcast %1 : vector<1x128xf32> to vector<144x128xf32>
    %3 = arith.mulf %0, %2 : vector<144x128xf32>
    %c0_3 = arith.constant 0 : index
    %c0_4 = arith.constant 0 : index
    %4 = vector.load %arg3[%c0_3, %c0_4] : memref<1x128xf32, #tpu.memory_space<vmem>>, vector<1x128xf32>
    %5 = vector.broadcast %4 : vector<1x128xf32> to vector<144x128xf32>
    %6 = arith.addf %3, %5 : vector<144x128xf32>
    %cst = arith.constant 0.000000e+00 : f32
    %7 = vector.broadcast %cst : f32 to vector<144x128xf32>
    %8 = arith.maximumf %6, %7 : vector<144x128xf32>
    %c0_5 = arith.constant 0 : index
    %c0_6 = arith.constant 0 : index
    %9 = vector.load %arg4[%c0_5, %c0_6] : memref<128x128xf32, #tpu.memory_space<vmem>>, vector<128x128xf32>
    %cst_7 = arith.constant dense<0.000000e+00> : vector<144x128xf32>
    %10 = tpu.matmul %8, %9, %cst_7 {dimension_numbers = #tpu.dot_dimension_numbers<[1], [0], [0], [1], [0, 0, 1, 1], [], []>} : vector<144x128xf32>, vector<128x128xf32>, vector<144x128xf32> -> vector<144x128xf32>
    %c144_i32 = arith.constant 144 : i32
    %11 = arith.muli %arg0, %c144_i32 : i32
    %12 = tpu.iota {dimensions = array<i32: 0>} : vector<144x1xi32>
    %13 = vector.broadcast %11 : i32 to vector<144x1xi32>
    %14 = arith.addi %13, %12 : vector<144x1xi32>
    %c144_i32_8 = arith.constant 144 : i32
    %15 = vector.broadcast %c144_i32_8 : i32 to vector<144x1xi32>
    %16 = arith.cmpi slt, %14, %15 : vector<144x1xi32>
    %c9_i32 = arith.constant 9 : i32
    %c0_i32 = arith.constant 0 : i32
    %17 = arith.cmpi eq, %c9_i32, %c0_i32 : i32
    %c1_i32 = arith.constant 1 : i32
    %18 = arith.select %17, %c1_i32, %c9_i32 : i32
    %19 = vector.broadcast %18 : i32 to vector<144x1xi32>
    %20 = arith.remsi %14, %19 : vector<144x1xi32>
    %c0_i32_9 = arith.constant 0 : i32
    %21 = vector.broadcast %c0_i32_9 : i32 to vector<144x1xi32>
    %22 = arith.cmpi ne, %20, %21 : vector<144x1xi32>
    %c0_i32_10 = arith.constant 0 : i32
    %23 = vector.broadcast %c0_i32_10 : i32 to vector<144x1xi32>
    %24 = arith.cmpi slt, %20, %23 : vector<144x1xi32>
    %c0_i32_11 = arith.constant 0 : i32
    %25 = arith.cmpi slt, %18, %c0_i32_11 : i32
    %26 = vector.broadcast %25 : i1 to vector<144x1xi1>
    %27 = vector.broadcast %26 : vector<144x1xi1> to vector<144x1xi1>
    %28 = arith.xori %24, %27 : vector<144x1xi1>
    %29 = arith.andi %28, %22 : vector<144x1xi1>
    %30 = vector.broadcast %18 : i32 to vector<144x1xi32>
    %31 = arith.addi %20, %30 : vector<144x1xi32>
    %32 = arith.select %29, %31, %20 : vector<144x1xi1>, vector<144x1xi32>
    %c8_i32 = arith.constant 8 : i32
    %33 = vector.broadcast %c8_i32 : i32 to vector<144x1xi32>
    %34 = arith.cmpi slt, %32, %33 : vector<144x1xi32>
    %35 = arith.andi %16, %34 : vector<144x1xi1>
    %cst_12 = arith.constant 0.000000e+00 : f32
    %36 = vector.shape_cast %35 : vector<144x1xi1> to vector<144x1xi1>
    %37 = vector.broadcast %36 : vector<144x1xi1> to vector<144x128xi1>
    %38 = vector.broadcast %cst_12 : f32 to vector<144x128xf32>
    %39 = arith.select %37, %10, %38 : vector<144x128xi1>, vector<144x128xf32>
    %cst_13 = arith.constant dense<0.000000e+00> : vector<128xf32>
    %40 = vector.multi_reduction <add>, %39, %cst_13 [0] : vector<144x128xf32> to vector<128xf32>
    %41 = vector.shape_cast %40 : vector<128xf32> to vector<1x128xf32>
    %c0_14 = arith.constant 0 : index
    %c0_15 = arith.constant 0 : index
    %c0_16 = arith.constant 0 : index
    %42 = vector.load %arg6[%c0_14, %c0_15, %c0_16] : memref<1x2x128xf32, #tpu.memory_space<vmem>>, vector<1x1x128xf32>
    %43 = vector.shape_cast %42 : vector<1x1x128xf32> to vector<1x128xf32>
    %44 = vector.shape_cast %41 : vector<1x128xf32> to vector<1x1x128xf32>
    tpu.vector_store %arg6[%c0_14, %c0_15, %c0_16], %44 {strides = array<i32>} : memref<1x2x128xf32, #tpu.memory_space<vmem>>, vector<1x1x128xf32>,
    %45 = arith.mulf %39, %39 : vector<144x128xf32>
    %cst_17 = arith.constant dense<0.000000e+00> : vector<128xf32>
    %46 = vector.multi_reduction <add>, %45, %cst_17 [0] : vector<144x128xf32> to vector<128xf32>
    %47 = vector.shape_cast %46 : vector<128xf32> to vector<1x128xf32>
    %c0_18 = arith.constant 0 : index
    %c1 = arith.constant 1 : index
    %c0_19 = arith.constant 0 : index
    %48 = vector.load %arg6[%c0_18, %c1, %c0_19] : memref<1x2x128xf32, #tpu.memory_space<vmem>>, vector<1x1x128xf32>
    %49 = vector.shape_cast %48 : vector<1x1x128xf32> to vector<1x128xf32>
    %50 = vector.shape_cast %47 : vector<1x128xf32> to vector<1x1x128xf32>
    tpu.vector_store %arg6[%c0_18, %c1, %c0_19], %50 {strides = array<i32>} : memref<1x2x128xf32, #tpu.memory_space<vmem>>, vector<1x1x128xf32>,
    %c0_20 = arith.constant 0 : index
    %c0_21 = arith.constant 0 : index
    %51 = vector.load %arg5[%c0_20, %c0_21] : memref<144x128xf32, #tpu.memory_space<vmem>>, vector<144x128xf32>
    tpu.vector_store %arg5[%c0_20, %c0_21], %10 {strides = array<i32>} : memref<144x128xf32, #tpu.memory_space<vmem>>, vector<144x128xf32>,
    return
  }
  func.func @transform_0(%arg0: i32) -> (i32, i32) {
    %c0_i32 = arith.constant 0 : i32
    %c0_i32_0 = arith.constant 0 : i32
    return %arg0, %c0_i32 : i32, i32
  }
  func.func @transform_1(%arg0: i32) -> (i32, i32) {
    %c0_i32 = arith.constant 0 : i32
    %c0_i32_0 = arith.constant 0 : i32
    %c0_i32_1 = arith.constant 0 : i32
    return %c0_i32, %c0_i32_0 : i32, i32
  }
  func.func @transform_2(%arg0: i32) -> (i32, i32) {
    %c0_i32 = arith.constant 0 : i32
    %c0_i32_0 = arith.constant 0 : i32
    %c0_i32_1 = arith.constant 0 : i32
    return %c0_i32, %c0_i32_0 : i32, i32
  }
  func.func @transform_3(%arg0: i32) -> (i32, i32) {
    %c0_i32 = arith.constant 0 : i32
    %c0_i32_0 = arith.constant 0 : i32
    %c0_i32_1 = arith.constant 0 : i32
    return %c0_i32, %c0_i32_0 : i32, i32
  }
  func.func @transform_4(%arg0: i32) -> (i32, i32) {
    %c0_i32 = arith.constant 0 : i32
    %c0_i32_0 = arith.constant 0 : i32
    return %arg0, %c0_i32 : i32, i32
  }
  func.func @transform_5(%arg0: i32) -> (i32, i32, i32) {
    %c0_i32 = arith.constant 0 : i32
    %c0_i32_0 = arith.constant 0 : i32
    %c0_i32_1 = arith.constant 0 : i32
    return %arg0, %c0_i32, %c0_i32_0 : i32, i32, i32
  }
}

</mosaic_0001>

<bundles_post_ra>
// kernel: resblock_forward.5
= control target key start
LH: loop header
LB: loop body
LE: loop exit
PB: predicated region body
PF: predicated region fallthrough
CT: control target
= control target key end

     0   :  { %s510_s0 = inlined_call_operand.vmem [shape: f32[144,128], index: 0, kind: input, shape index: {}, may-alias: {0,6}]   ;;  %s511_s1 = inlined_call_operand.vmem [shape: f32[144,128], index: 1, kind: input, shape index: {}]   ;;  %s512_s2 = inlined_call_operand.vmem [shape: f32[1,128], index: 2, kind: input, shape index: {}]   ;;  %s513_s3 = inlined_call_operand.vmem [shape: f32[1,128], index: 3, kind: input, shape index: {}]   ;;  %s514_s4 = inlined_call_operand.vmem [shape: f32[1,128], index: 4, kind: input, shape index: {}]   ;;  %s515_s5 = inlined_call_operand.vmem [shape: f32[1,128], index: 5, kind: input, shape index: {}]   ;;  %s516_s6 = inlined_call_operand.vmem [shape: f32[144,128], index: 6, kind: output, shape index: {}, may-alias: {0,6}]  }
   0x1   :  { %v23_v0 = vld [vmem:[%s510_s0] sm:$0xff]  ;;  %v24_v8 = vld [vmem:[%s510_s0 + $0x8] sm:$0xff]  ;;  %v25_v10 = vld [vmem:[%s510_s0 + $0x10] sm:$0xff] }
   0x2   :  { %v262_v1 = vld [vmem:[%s512_s2] ss:$0 sm:$0xff]  ;;  %v92_v9 = vld [vmem:[%s511_s1 + $0x8] sm:$0xff]  ;;  %v93_v15 = vld [vmem:[%s511_s1 + $0x10] sm:$0xff] }
   0x3   :  { %v267_v2 = vld [vmem:[%s513_s3] ss:$0 sm:$0xff]  ;;  %v48_v3 = vmul.f32 %v262_v1, %v23_v0  ;;  %v49_v12 = vmul.f32 %v262_v1, %v24_v8  ;;  %v50_v14 = vmul.f32 %v262_v1, %v25_v10  ;;  %v26_v16 = vld [vmem:[%s510_s0 + $0x18] sm:$0xff]  ;;  %v28_v23 = vld [vmem:[%s510_s0 + $0x28] sm:$0xff] }
   0x4   :  { %v91_v4 = vld [vmem:[%s511_s1] sm:$0xff]  ;;  %v94_v17 = vld [vmem:[%s511_s1 + $0x18] sm:$0xff]  ;;  %v51_v19 = vmul.f32 %v262_v1, %v26_v16  ;;  %v96_v28 = vld [vmem:[%s511_s1 + $0x28] sm:$0xff]  ;;  %v53_v33 = vmul.f32 %v262_v1, %v28_v23 }
   0x5   :  { %v276_v5 = vld [vmem:[%s514_s4] ss:$0 sm:$0xff]  ;;  %v73_v11 = vadd.f32 %v267_v2, %v48_v3  ;;  %v74_v25 = vadd.f32 %v267_v2, %v49_v12  ;;  %v75_v26 = vadd.f32 %v267_v2, %v50_v14  ;;  %v29_v29 = vld [vmem:[%s510_s0 + $0x30] sm:$0xff]  ;;  %v30_v39 = vld [vmem:[%s510_s0 + $0x38] sm:$0xff] }
   0x6   :  { %v116_v6 = vmul.f32 %v276_v5, %v91_v4  ;;  %v282_v7 = vld [vmem:[%s515_s5] ss:$0 sm:$0xff]  ;;  %v117_v13 = vmul.f32 %v276_v5, %v92_v9  ;;  %v118_v18 = vmul.f32 %v276_v5, %v93_v15  ;;  %v119_v20 = vmul.f32 %v276_v5, %v94_v17  ;;  %v97_v30 = vld [vmem:[%s511_s1 + $0x30] sm:$0xff]  ;;  %v98_v44 = vld [vmem:[%s511_s1 + $0x38] sm:$0xff] }
   0x7   :  { %v27_v21 = vld [vmem:[%s510_s0 + $0x20] sm:$0xff]  ;;  %v76_v31 = vadd.f32 %v267_v2, %v51_v19  ;;  %v121_v34 = vmul.f32 %v276_v5, %v96_v28  ;;  %v78_v41 = vadd.f32 %v267_v2, %v53_v33  ;;  %v54_v42 = vmul.f32 %v262_v1, %v29_v29  ;;  %v32_v55 = vld [vmem:[%s510_s0 + $0x48] sm:$0xff]  ;;  %v101_v4 = vld [vmem:[%s511_s1 + $0x50] sm:$0xff] }
   0x8   :  { %v95_v22 = vld [vmem:[%s511_s1 + $0x20] sm:$0xff]  ;;  %v134_v24 = vadd.f32 %v116_v6, %v73_v11  ;;  %v52_v27 = vmul.f32 %v262_v1, %v27_v21  ;;  %v135_v36 = vadd.f32 %v117_v13, %v74_v25  ;;  %v136_v37 = vadd.f32 %v118_v18, %v75_v26  ;;  %v100_v60 = vld [vmem:[%s511_s1 + $0x48] sm:$0xff]  ;;  %v102_v12 = vld [vmem:[%s511_s1 + $0x58] sm:$0xff] }
   0x9   :  { %v120_v32 = vmul.f32 %v276_v5, %v95_v22  ;;  %v137_v40 = vadd.f32 %v119_v20, %v76_v31  ;;  %v122_v43 = vmul.f32 %v276_v5, %v97_v30  ;;  %v139_v50 = vadd.f32 %v121_v34, %v78_v41  ;;  %v31_v53 = vld [vmem:[%s510_s0 + $0x40] sm:$0xff] }
   0xa   :  { %v159_v35 = vadd.f32 %v282_v7, %v134_v24  ;;  %v77_v38 = vadd.f32 %v267_v2, %v52_v27  ;;  %v160_v46 = vadd.f32 %v282_v7, %v135_v36  ;;  %v161_v47 = vadd.f32 %v282_v7, %v136_v37  ;;  %v99_v54 = vld [vmem:[%s511_s1 + $0x40] sm:$0xff] }
   0xb   :  { %v162_v49 = vadd.f32 %v282_v7, %v137_v40  ;;  %v79_v51 = vadd.f32 %v267_v2, %v54_v42  ;;  %v55_v52 = vmul.f32 %v262_v1, %v30_v39  ;;  %v123_v59 = vmul.f32 %v276_v5, %v98_v44  ;;  %v103_v22 = vld [vmem:[%s511_s1 + $0x60] sm:$0xff]  ;;  %v105_v42 = vld [vmem:[%s511_s1 + $0x70] sm:$0xff] }
   0xc   :  { %v177_v45 = vmax.f32 %v159_v35, 0.0  ;;  %v138_v48 = vadd.f32 %v120_v32, %v77_v38  ;;  %v178_v56 = vmax.f32 %v160_v46, 0.0  ;;  %v179_v57 = vmax.f32 %v161_v47, 0.0  ;;  %v104_v32 = vld [vmem:[%s511_s1 + $0x68] sm:$0xff] }
   0xd   :  { %v180_v61 = vmax.f32 %v162_v49, 0.0  ;;  %v164_v62 = vadd.f32 %v282_v7, %v139_v50  ;;  %v140_v63 = vadd.f32 %v122_v43, %v79_v51  ;;  %v80_v0 = vadd.f32 %v267_v2, %v55_v52 }
   0xe   :  { %195 = vst [vmem:[%s516_s6] sm:$0xff] %v177_v45  ;;  %v163_v58 = vadd.f32 %v282_v7, %v138_v48  ;;  %v56_v8 = vmul.f32 %v262_v1, %v31_v53  ;;  %v124_v9 = vmul.f32 %v276_v5, %v99_v54  ;;  %v57_v10 = vmul.f32 %v262_v1, %v32_v55  ;;  %v106_v48 = vld [vmem:[%s511_s1 + $0x78] sm:$0xff] }
   0xf   :  { %v182_v13 = vmax.f32 %v164_v62, 0.0  ;;  %v165_v14 = vadd.f32 %v282_v7, %v140_v63  ;;  %v141_v15 = vadd.f32 %v123_v59, %v80_v0  ;;  %v125_v16 = vmul.f32 %v276_v5, %v100_v60  ;;  %v108_v0 = vld [vmem:[%s511_s1 + $0x88] sm:$0xff] }
  0x10   :  { %v181_v6 = vmax.f32 %v163_v58, 0.0  ;;  %v81_v18 = vadd.f32 %v267_v2, %v56_v8  ;;  %v82_v19 = vadd.f32 %v267_v2, %v57_v10  ;;  %v126_v21 = vmul.f32 %v276_v5, %v101_v4  ;;  %v107_v58 = vld [vmem:[%s511_s1 + $0x80] sm:$0xff] }
  0x11   :  { %v183_v24 = vmax.f32 %v165_v14, 0.0  ;;  %v166_v25 = vadd.f32 %v282_v7, %v141_v15  ;;  %v127_v27 = vmul.f32 %v276_v5, %v102_v12  ;;  %v128_v36 = vmul.f32 %v276_v5, %v103_v22 }
  0x12   :  { %v142_v28 = vadd.f32 %v124_v9, %v81_v18  ;;  %v143_v29 = vadd.f32 %v125_v16, %v82_v19  ;;  %v129_v45 = vmul.f32 %v276_v5, %v104_v32  ;;  %v131_v63 = vmul.f32 %v276_v5, %v106_v48 }
  0x13   :  { %v184_v34 = vmax.f32 %v166_v25, 0.0  ;;  %v133_v16 = vmul.f32 %v276_v5, %v108_v0 }
  0x14   :  { %v167_v38 = vadd.f32 %v282_v7, %v142_v28  ;;  %v168_v39 = vadd.f32 %v282_v7, %v143_v29 }
  0x15   :  { %v33_v3 = vld [vmem:[%s510_s0 + $0x50] sm:$0xff] }
  0x16   :  { %196 = vst [vmem:[%s516_s6 + $0x8] sm:$0xff] %v178_v56  ;;  %197 = vst [vmem:[%s516_s6 + $0x10] sm:$0xff] %v179_v57  ;;  %v58_v20 = vmul.f32 %v262_v1, %v33_v3  ;;  %v185_v49 = vmax.f32 %v167_v38, 0.0  ;;  %v186_v50 = vmax.f32 %v168_v39, 0.0  ;;  %v130_v57 = vmul.f32 %v276_v5, %v105_v42 }
  0x18   :  { %v83_v30 = vadd.f32 %v267_v2, %v58_v20 }
  0x1a   :  { %v144_v40 = vadd.f32 %v126_v21, %v83_v30 }
  0x1c   :  { %v169_v51 = vadd.f32 %v282_v7, %v144_v40 }
  0x1d   :  { %v34_v11 = vld [vmem:[%s510_s0 + $0x58] sm:$0xff] }
  0x1e   :  { %198 = vst [vmem:[%s516_s6 + $0x18] sm:$0xff] %v180_v61  ;;  %v59_v26 = vmul.f32 %v262_v1, %v34_v11  ;;  %v187_v60 = vmax.f32 %v169_v51, 0.0  ;;  %v132_v11 = vmul.f32 %v276_v5, %v107_v58 }
  0x20   :  { %v84_v35 = vadd.f32 %v267_v2, %v59_v26 }
  0x22   :  { %v145_v43 = vadd.f32 %v127_v27, %v84_v35 }
  0x24   :  { %v170_v54 = vadd.f32 %v282_v7, %v145_v43 }
  0x25   :  { %v35_v17 = vld [vmem:[%s510_s0 + $0x60] sm:$0xff] }
  0x26   :  { %199 = vst [vmem:[%s516_s6 + $0x20] sm:$0xff] %v181_v6  ;;  %v60_v31 = vmul.f32 %v262_v1, %v35_v17  ;;  %v188_v3 = vmax.f32 %v170_v54, 0.0 }
  0x28   :  { %v85_v41 = vadd.f32 %v267_v2, %v60_v31 }
  0x2a   :  { %v146_v52 = vadd.f32 %v128_v36, %v85_v41 }
  0x2c   :  { %v171_v61 = vadd.f32 %v282_v7, %v146_v52 }
  0x2d   :  { %v36_v23 = vld [vmem:[%s510_s0 + $0x68] sm:$0xff] }
  0x2e   :  { %200 = vst [vmem:[%s516_s6 + $0x28] sm:$0xff] %v182_v13  ;;  %v61_v37 = vmul.f32 %v262_v1, %v36_v23  ;;  %v189_v9 = vmax.f32 %v171_v61, 0.0 }
  0x30   :  { %v86_v44 = vadd.f32 %v267_v2, %v61_v37 }
  0x32   :  { %v147_v55 = vadd.f32 %v129_v45, %v86_v44 }
  0x34   :  { %v172_v4 = vadd.f32 %v282_v7, %v147_v55 }
  0x35   :  { %v37_v33 = vld [vmem:[%s510_s0 + $0x70] sm:$0xff] }
  0x36   :  { %201 = vst [vmem:[%s516_s6 + $0x30] sm:$0xff] %v183_v24  ;;  %202 = vst [vmem:[%s516_s6 + $0x38] sm:$0xff] %v184_v34  ;;  %v62_v46 = vmul.f32 %v262_v1, %v37_v33  ;;  %v190_v13 = vmax.f32 %v172_v4, 0.0 }
  0x38   :  { %v87_v56 = vadd.f32 %v267_v2, %v62_v46 }
  0x3a   :  { %v148_v6 = vadd.f32 %v130_v57, %v87_v56 }
  0x3c   :  { %v173_v14 = vadd.f32 %v282_v7, %v148_v6 }
  0x3d   :  { %v38_v47 = vld [vmem:[%s510_s0 + $0x78] sm:$0xff]  ;;  %v39_v53 = vld [vmem:[%s510_s0 + $0x80] sm:$0xff]  ;;  %v40_v59 = vld [vmem:[%s510_s0 + $0x88] sm:$0xff] }
  0x3e   :  { %203 = vst [vmem:[%s516_s6 + $0x40] sm:$0xff] %v185_v49  ;;  %204 = vst [vmem:[%s516_s6 + $0x48] sm:$0xff] %v186_v50  ;;  %v63_v62 = vmul.f32 %v262_v1, %v38_v47  ;;  %v64_v8 = vmul.f32 %v262_v1, %v39_v53  ;;  %v65_v12 = vmul.f32 %v262_v1, %v40_v59  ;;  %v191_v1 = vmax.f32 %v173_v14, 0.0 }
  0x3f   :  { %205 = vst [vmem:[%s516_s6 + $0x50] sm:$0xff] %v187_v60  ;;  %206 = vst [vmem:[%s516_s6 + $0x58] sm:$0xff] %v188_v3 }
  0x40   :  { %v88_v10 = vadd.f32 %v267_v2, %v63_v62  ;;  %v89_v15 = vadd.f32 %v267_v2, %v64_v8  ;;  %207 = vst [vmem:[%s516_s6 + $0x60] sm:$0xff] %v189_v9  ;;  %v90_v18 = vadd.f32 %v267_v2, %v65_v12  ;;  %208 = vst [vmem:[%s516_s6 + $0x68] sm:$0xff] %v190_v13 }
  0x41   :  { %209 = vst [vmem:[%s516_s6 + $0x70] sm:$0xff] %v191_v1 }
  0x42   :  { %v149_v17 = vadd.f32 %v131_v63, %v88_v10  ;;  %v150_v19 = vadd.f32 %v132_v11, %v89_v15  ;;  %v151_v21 = vadd.f32 %v133_v16, %v90_v18 }
  0x44   :  { %v174_v20 = vadd.f32 %v282_v7, %v149_v17  ;;  %v175_v5 = vadd.f32 %v282_v7, %v150_v19  ;;  %v176_v23 = vadd.f32 %v282_v7, %v151_v21 }
  0x46   :  { %v192_v22 = vmax.f32 %v174_v20, 0.0  ;;  %v193_v24 = vmax.f32 %v175_v5, 0.0  ;;  %v194_v2 = vmax.f32 %v176_v23, 0.0 }
  0x48   :  { %210 = vst [vmem:[%s516_s6 + $0x78] sm:$0xff] %v192_v22  ;;  %211 = vst [vmem:[%s516_s6 + $0x80] sm:$0xff] %v193_v24 }
  0x49   :  { %212 = vst [vmem:[%s516_s6 + $0x88] sm:$0xff] %v194_v2 }

// kernel: resblock_forward.4
= control target key start
LH: loop header
LB: loop body
LE: loop exit
PB: predicated region body
PF: predicated region fallthrough
CT: control target
= control target key end

     0   :  { %s1723_s3 = inlined_call_operand.vmem [shape: f32[128,128], index: 3, kind: input, shape index: {}]   ;;  %s1724_s0 = inlined_call_operand.vmem [shape: f32[144,128], index: 0, kind: input, shape index: {}]   ;;  %s1725_s1 = inlined_call_operand.vmem [shape: f32[1,128], index: 1, kind: input, shape index: {}]   ;;  %s1726_s2 = inlined_call_operand.vmem [shape: f32[1,128], index: 2, kind: input, shape index: {}]   ;;  %s1727_s4 = inlined_call_operand.vmem [shape: f32[144,128], index: 4, kind: output, shape index: {0}]   ;;  %s1728_s5 = inlined_call_operand.vmem [shape: f32[1,2,128], index: 5, kind: output, shape index: {1}]  }
   0x1   :  { %v105_v0 = vld [vmem:[%s1723_s3] sm:$0xff]  ;;  %v106_v1 = vld [vmem:[%s1723_s3 + $0x8] sm:$0xff]  ;;  %v107_v2 = vld [vmem:[%s1723_s3 + $0x10] sm:$0xff] }
   0x2   :  { %v898_v3 = vpack.c.bf16 %v106_v1, %v105_v0  ;;  %v108_v4 = vld [vmem:[%s1723_s3 + $0x18] sm:$0xff]  ;;  %v109_v6 = vld [vmem:[%s1723_s3 + $0x20] sm:$0xff]  ;;  %v110_v7 = vld [vmem:[%s1723_s3 + $0x28] sm:$0xff] }
   0x3   :  { %v902_v5 = vpack.c.bf16 %v108_v4, %v107_v2  ;;  %v906_v8 = vpack.c.bf16 %v110_v7, %v109_v6  ;;  %v19_v9 = vld [vmem:[%s1724_s0] sm:$0xff]  ;;  %v111_v11 = vld [vmem:[%s1723_s3 + $0x30] sm:$0xff]  ;;  %v112_v12 = vld [vmem:[%s1723_s3 + $0x38] sm:$0xff] }
   0x4   :  { %899 = vmatprep.subr.bf16.mxu0 %v898_v3  ;;  %930 = vmatprep.subr.bf16.mxu1 %v898_v3  ;;  %v1036_v10 = vld [vmem:[%s1725_s1] ss:$0 sm:$0xff]  ;;  %v910_v16 = vpack.c.bf16 %v112_v12, %v111_v11  ;;  %v114_v18 = vld [vmem:[%s1723_s3 + $0x48] sm:$0xff]  ;;  %v29_v20 = vld [vmem:[%s1724_s0 + $0x50] sm:$0xff] }
   0x5   :  { %901 = vmatpush3.bf16.msra.mxu0 %v898_v3  ;;  %938 = vmatpush3.bf16.msra.mxu1 %v898_v3  ;;  %v44_v13 = vmul.f32 %v1036_v10, %v19_v9  ;;  %v1048_v14 = vld [vmem:[%s1726_s2] ss:$0 sm:$0xff]  ;;  %v54_v22 = vmul.f32 %v1036_v10, %v29_v20  ;;  %v115_v23 = vld [vmem:[%s1723_s3 + $0x50] sm:$0xff]  ;;  %v116_v24 = vld [vmem:[%s1723_s3 + $0x58] sm:$0xff] }
   0x6   :  { %903 = vmatprep.subr.bf16.mxu0 %v902_v5  ;;  %931 = vmatprep.subr.bf16.mxu1 %v902_v5  ;;  %v113_v17 = vld [vmem:[%s1723_s3 + $0x40] sm:$0xff]  ;;  %v918_v26 = vpack.c.bf16 %v116_v24, %v115_v23  ;;  %v118_v29 = vld [vmem:[%s1723_s3 + $0x68] sm:$0xff]  ;;  %v30_v31 = vld [vmem:[%s1724_s0 + $0x58] sm:$0xff] }
   0x7   :  { %v69_v15 = vadd.f32 %v1048_v14, %v44_v13  ;;  %v914_v21 = vpack.c.bf16 %v114_v18, %v113_v17  ;;  %v79_v25 = vadd.f32 %v1048_v14, %v54_v22  ;;  %v117_v28 = vld [vmem:[%s1723_s3 + $0x60] sm:$0xff]  ;;  %v20_v30 = vld [vmem:[%s1724_s0 + $0x8] sm:$0xff]  ;;  %v21_v33 = vld [vmem:[%s1724_s0 + $0x10] sm:$0xff]  ;;  %v55_v40 = vmul.f32 %v1036_v10, %v30_v31 }
   0x8   :  { %v922_v32 = vpack.c.bf16 %v118_v29, %v117_v28  ;;  %v31_v34 = vld [vmem:[%s1724_s0 + $0x60] sm:$0xff]  ;;  %v119_v35 = vld [vmem:[%s1723_s3 + $0x70] sm:$0xff]  ;;  %v120_v36 = vld [vmem:[%s1723_s3 + $0x78] sm:$0xff]  ;;  %v45_v37 = vmul.f32 %v1036_v10, %v20_v30  ;;  %v46_v41 = vmul.f32 %v1036_v10, %v21_v33 }
   0x9   :  { %905 = vmatpush3.bf16.msra.mxu0 %v902_v5  ;;  %939 = vmatpush3.bf16.msra.mxu1 %v902_v5  ;;  %v87_v19 = vmax.f32 %v69_v15, 0.0  ;;  %v97_v27 = vmax.f32 %v79_v25, 0.0  ;;  %v22_v38 = vld [vmem:[%s1724_s0 + $0x18] sm:$0xff]  ;;  %v23_v39 = vld [vmem:[%s1724_s0 + $0x20] sm:$0xff]  ;;  %v56_v42 = vmul.f32 %v1036_v10, %v31_v34  ;;  %v32_v43 = vld [vmem:[%s1724_s0 + $0x68] sm:$0xff]  ;;  %v926_v44 = vpack.c.bf16 %v120_v36, %v119_v35 }
   0xa   :  { %907 = vmatprep.subr.bf16.mxu0 %v906_v8  ;;  %932 = vmatprep.subr.bf16.mxu1 %v906_v8  ;;  %v33_v45 = vld [vmem:[%s1724_s0 + $0x70] sm:$0xff]  ;;  %v47_v46 = vmul.f32 %v1036_v10, %v22_v38  ;;  %v48_v47 = vmul.f32 %v1036_v10, %v23_v39  ;;  %v70_v48 = vadd.f32 %v1048_v14, %v45_v37  ;;  %v24_v49 = vld [vmem:[%s1724_s0 + $0x28] sm:$0xff]  ;;  %v34_v56 = vld [vmem:[%s1724_s0 + $0x78] sm:$0xff]  ;;  %v277_v35 = vlaneseq }
   0xb   :  { %871 = vmatprep.mubr.f32.mxu0 %v87_v19  ;;  %886 = vmatprep.mubr.f32.mxu1 %v97_v27  ;;  %v25_v50 = vld [vmem:[%s1724_s0 + $0x30] sm:$0xff]  ;;  %v80_v51 = vadd.f32 %v1048_v14, %v55_v40  ;;  %v57_v52 = vmul.f32 %v1036_v10, %v32_v43  ;;  %v71_v53 = vadd.f32 %v1048_v14, %v46_v41  ;;  %v35_v57 = vld [vmem:[%s1724_s0 + $0x80] sm:$0xff]  ;;  %v26_v63 = vld [vmem:[%s1724_s0 + $0x38] sm:$0xff] }
   0xc   :  { %v81_v54 = vadd.f32 %v1048_v14, %v56_v42  ;;  %v58_v55 = vmul.f32 %v1036_v10, %v33_v45  ;;  %v72_v58 = vadd.f32 %v1048_v14, %v47_v46  ;;  %v73_v59 = vadd.f32 %v1048_v14, %v48_v47  ;;  %v36_v7 = vld [vmem:[%s1724_s0 + $0x88] sm:$0xff] }
   0xd   :  { %909 = vmatpush3.bf16.msra.mxu0 %v906_v8  ;;  %940 = vmatpush3.bf16.msra.mxu1 %v906_v8  ;;  %v49_v60 = vmul.f32 %v1036_v10, %v24_v49  ;;  %v50_v61 = vmul.f32 %v1036_v10, %v25_v50  ;;  %v88_v62 = vmax.f32 %v70_v48, 0.0  ;;  %v98_v0 = vmax.f32 %v80_v51, 0.0  ;;  %v27_v8 = vld [vmem:[%s1724_s0 + $0x40] sm:$0xff]  ;;  %v28_v20 = vld [vmem:[%s1724_s0 + $0x48] sm:$0xff] }
   0xe   :  { %911 = vmatprep.subr.bf16.mxu0 %v910_v16  ;;  %933 = vmatprep.subr.bf16.mxu1 %v910_v16  ;;  %v82_v1 = vadd.f32 %v1048_v14, %v57_v52  ;;  %v59_v2 = vmul.f32 %v1036_v10, %v34_v56  ;;  %v89_v3 = vmax.f32 %v71_v53, 0.0  ;;  %v99_v4 = vmax.f32 %v81_v54, 0.0 }
   0xf   :  { %v83_v5 = vadd.f32 %v1048_v14, %v58_v55  ;;  %v60_v6 = vmul.f32 %v1036_v10, %v35_v57  ;;  %v90_v9 = vmax.f32 %v72_v58, 0.0  ;;  %v74_v11 = vadd.f32 %v1048_v14, %v49_v60 }
  0x10   :  { %v51_v12 = vmul.f32 %v1036_v10, %v26_v63  ;;  %v91_v13 = vmax.f32 %v73_v59, 0.0  ;;  %v100_v15 = vmax.f32 %v82_v1, 0.0  ;;  %v61_v17 = vmul.f32 %v1036_v10, %v36_v7 }
  0x11   :  { %913 = vmatpush3.bf16.msra.mxu0 %v910_v16  ;;  %941 = vmatpush3.bf16.msra.mxu1 %v910_v16  ;;  %v84_v16 = vadd.f32 %v1048_v14, %v59_v2  ;;  %v75_v18 = vadd.f32 %v1048_v14, %v50_v61  ;;  %v52_v19 = vmul.f32 %v1036_v10, %v27_v8  ;;  %v92_v23 = vmax.f32 %v74_v11, 0.0 }
  0x12   :  { %915 = vmatprep.subr.bf16.mxu0 %v914_v21  ;;  %934 = vmatprep.subr.bf16.mxu1 %v914_v21  ;;  %v85_v22 = vadd.f32 %v1048_v14, %v60_v6  ;;  %v76_v24 = vadd.f32 %v1048_v14, %v51_v12  ;;  %v53_v25 = vmul.f32 %v1036_v10, %v28_v20  ;;  %v1160_v36 = vshrl.u32 %v277_v35, 7 }
  0x13   :  { %v86_v27 = vadd.f32 %v1048_v14, %v61_v17  ;;  %v93_v28 = vmax.f32 %v75_v18, 0.0  ;;  %v77_v29 = vadd.f32 %v1048_v14, %v52_v19 }
  0x14   :  { %v103_v30 = vmax.f32 %v85_v22, 0.0  ;;  %v94_v31 = vmax.f32 %v76_v24, 0.0  ;;  %v279_v37 = vadd.s32 8, %v1160_v36  ;;  %v281_v41 = vadd.s32 24, %v1160_v36 }
  0x15   :  { %917 = vmatpush3.bf16.msra.mxu0 %v914_v21  ;;  %942 = vmatpush3.bf16.msra.mxu1 %v914_v21  ;;  %v101_v21 = vmax.f32 %v83_v5, 0.0  ;;  %v104_v33 = vmax.f32 %v86_v27, 0.0  ;;  %v95_v34 = vmax.f32 %v77_v29, 0.0  ;;  %v280_v42 = vadd.s32 16, %v1160_v36 }
  0x16   :  { %919 = vmatprep.subr.bf16.mxu0 %v918_v26  ;;  %935 = vmatprep.subr.bf16.mxu1 %v918_v26  ;;  %v1163_v38 = vmul.u32.u64.low 3817748708, %v279_v37  ;;  %v1164_v39 = vmul.u32.u64.high 3817748708, %v279_v37, %v1163_v38  ;;  %v283_v43 = vadd.s32 40, %v1160_v36  ;;  %v282_v47 = vadd.s32 32, %v1160_v36 }
  0x17   :  { %v1174_v45 = vmul.u32.u64.low 3817748708, %v281_v41  ;;  %v1175_v46 = vmul.u32.u64.high 3817748708, %v281_v41, %v1174_v45  ;;  %v1179_v49 = vmul.u32.u64.low 3817748708, %v280_v42  ;;  %v1180_v50 = vmul.u32.u64.high 3817748708, %v280_v42, %v1179_v49 }
  0x18   :  { %v1182_v51 = vmul.u32.u64.low 3817748708, %v283_v43  ;;  %v1183_v52 = vmul.u32.u64.high 3817748708, %v283_v43, %v1182_v51  ;;  %v1185_v54 = vmul.u32.u64.low 3817748708, %v282_v47  ;;  %v1186_v55 = vmul.u32.u64.high 3817748708, %v282_v47, %v1185_v54 }
  0x19   :  { %921 = vmatpush3.bf16.msra.mxu0 %v918_v26  ;;  %943 = vmatpush3.bf16.msra.mxu1 %v918_v26  ;;  %v102_v26 = vmax.f32 %v84_v16, 0.0  ;;  %v1189_v57 = vadd.s32 56, %v1160_v36  ;;  %v1192_v58 = vadd.s32 48, %v1160_v36  ;;  %v372_v60 = vshrl.u32 %v1175_v46, 3 }
  0x1a   :  { %923 = vmatprep.subr.bf16.mxu0 %v922_v32  ;;  %936 = vmatprep.subr.bf16.mxu1 %v922_v32  ;;  %v1198_v61 = vadd.s32 72, %v1160_v36  ;;  %v361_v63 = vshrl.u32 %v1180_v50, 3  ;;  %v394_v2 = vshrl.u32 %v1183_v52, 3  ;;  %v383_v6 = vshrl.u32 %v1186_v55, 3 }
  0x1b   :  { %v373_v5 = vmul.u32 9, %v372_v60  ;;  %v1216_v7 = vadd.s32 64, %v1160_v36  ;;  %v1224_v11 = vadd.s32 88, %v1160_v36  ;;  %v1231_v17 = vadd.s32 80, %v1160_v36 }
  0x1c   :  { %v362_v12 = vmul.u32 9, %v361_v63  ;;  %v395_v16 = vmul.u32 9, %v394_v2 }
  0x1d   :  { %925 = vmatpush3.bf16.msra.mxu0 %v922_v32  ;;  %944 = vmatpush3.bf16.msra.mxu1 %v922_v32  ;;  %v78_v32 = vadd.f32 %v1048_v14, %v53_v25  ;;  %v1167_v14 = vmul.u32.u64.low 3817748708, %v1160_v36  ;;  %v1168_v40 = vmul.u32.u64.high 3817748708, %v1160_v36, %v1167_v14  ;;  %v1239_v19 = vsub.s32 %v281_v41, %v373_v5 }
  0x1e   :  { %927 = vmatprep.subr.bf16.mxu0 %v926_v44  ;;  %937 = vmatprep.subr.bf16.mxu1 %v926_v44  ;;  %v384_v20 = vmul.u32 9, %v383_v6  ;;  %v1250_v24 = vmul.u32.u64.low 3817748708, %v1224_v11  ;;  %v1251_v25 = vmul.u32.u64.high 3817748708, %v1224_v11, %v1250_v24 }
  0x1f   :  { %v96_v10 = vmax.f32 %v78_v32, 0.0  ;;  %v339_v48 = vshrl.u32 %v1168_v40, 3  ;;  %vm534_vm6 = vcmp.ne.s32.totalorder %v1239_v19, 0  ;;  %vm552_vm7 = vcmp.lt.s32.totalorder %v1239_v19, 0 }
  0x20   :  { %vm1288_vm12 = vmand %vm552_vm7, %vm534_vm6  ;;  %v460_v46 = vshrl.u32 %v1251_v25, 3 }
  0x21   :  { %929 = vmatpush3.bf16.msra.mxu0 %v926_v44  ;;  %945 = vmatpush3.bf16.msra.mxu1 %v926_v44  ;;  %v350_v44 = vshrl.u32 %v1164_v39, 3  ;;  %v340_v56 = vmul.u32 9, %v339_v48  ;;  %v1281_v39 = vadd.s32 96, %v1160_v36 }
  0x22   :  { %v461_v2 = vmul.u32 9, %v460_v46 }
  0x23   :  { %v351_v53 = vmul.u32 9, %v350_v44 }
  0x24   :  { %872 = vmatmul.mubr.f32.vlgmr.msra.gmra.mrb[0].mxu0 %v88_v62  ;;  %887 = vmatmul.mubr.f32.vlgmr.msra.gmra.mrb[0].mxu1 %v98_v0  ;;  %v1201_v62 = vsub.s32 %v1160_v36, %v340_v56  ;;  %v1205_v0 = vmul.u32.u64.low 3817748708, %v1189_v57  ;;  %v1206_v1 = vmul.u32.u64.high 3817748708, %v1189_v57, %v1205_v0 }
  0x25   :  { %874 = vmatprep.mubr.f32.mxu0 %v89_v3  ;;  %889 = vmatprep.mubr.f32.mxu1 %v99_v4  ;;  %v1194_v59 = vsub.s32 %v279_v37, %v351_v53  ;;  %v1210_v3 = vmul.u32.u64.low 3817748708, %v1192_v58  ;;  %v1211_v4 = vmul.u32.u64.high 3817748708, %v1192_v58, %v1210_v3  ;;  %v1276_v37 = vadd.s32 104, %v1160_v36 }
  0x26   :  { %vm531_vm2 = vcmp.ne.s32.totalorder %v1201_v62, 0  ;;  %vm549_vm3 = vcmp.lt.s32.totalorder %v1201_v62, 0  ;;  %v416_v27 = vshrl.u32 %v1206_v1, 3 }
  0x27   :  { %vm532_vm0 = vcmp.ne.s32.totalorder %v1194_v59, 0  ;;  %vm550_vm1 = vcmp.lt.s32.totalorder %v1194_v59, 0  ;;  %vm1245_vm5 = vmand %vm549_vm3, %vm531_vm2  ;;  %v405_v29 = vshrl.u32 %v1211_v4, 3  ;;  %v1354_v4 = vadd.s32 120, %v1160_v36 }
  0x28   :  { %875 = vmatmul.mubr.f32.gmra.mrb[2].mxu0 %v90_v9  ;;  %890 = vmatmul.mubr.f32.gmra.mrb[2].mxu1 %v100_v15  ;;  %v1220_v8 = vmul.u32.u64.low 3817748708, %v1198_v61  ;;  %v1221_v9 = vmul.u32.u64.high 3817748708, %v1198_v61, %v1220_v8  ;;  %v585_v15 = vadd.s32 9, %v1201_v62  ;;  %vm1235_vm4 = vmand %vm550_vm1, %vm532_vm0  ;;  %v417_v38 = vmul.u32 9, %v416_v27 }
  0x29   :  { %877 = vmatprep.mubr.f32.mxu0 %v91_v13  ;;  %892 = vmatprep.mubr.f32.mxu1 %v101_v21  ;;  %v586_v13 = vadd.s32 9, %v1194_v59  ;;  %v1242_v21 = vmul.u32.u64.low 3817748708, %v1216_v7  ;;  %v1243_v22 = vmul.u32.u64.high 3817748708, %v1216_v7, %v1242_v21  ;;  %v406_v40 = vmul.u32 9, %v405_v29 }
  0x2a   :  { %v438_v35 = vshrl.u32 %v1221_v9, 3  ;;  %v1311_v51 = vsub.s32 %v1189_v57, %v417_v38  ;;  %v1314_v52 = vmul.u32.u64.low 3817748708, %v1281_v39  ;;  %v1315_v53 = vmul.u32.u64.high 3817748708, %v1281_v39, %v1314_v52 }
  0x2b   :  { %v604_v32 = vsel %vm1235_vm4, %v586_v13, %v1194_v59  ;;  %v1322_v55 = vsub.s32 %v1192_v58, %v406_v40 }
  0x2c   :  { %878 = vmatmul.mubr.f32.gmra.mrb[4].mxu0 %v92_v23  ;;  %893 = vmatmul.mubr.f32.gmra.mrb[4].mxu1 %v102_v26  ;;  %v1253_v26 = vsub.s32 %v280_v42, %v362_v12  ;;  %v439_v45 = vmul.u32 9, %v438_v35  ;;  %vm1325_vm2 = vcmp.lt.s32.totalorder %v604_v32, 8  ;;  %vm538_vm4 = vcmp.ne.s32.totalorder %v1311_v51, 0 }
  0x2d   :  { %880 = vmatprep.mubr.f32.mxu0 %v93_v28  ;;  %895 = vmatprep.mubr.f32.mxu1 %v103_v30  ;;  %v1256_v28 = vsub.s32 %v283_v43, %v395_v16  ;;  %v427_v43 = vshrl.u32 %v1243_v22, 3  ;;  %v1357_v5 = vadd.s32 9, %v1311_v51  ;;  %vm537_vm6 = vcmp.ne.s32.totalorder %v1322_v55, 0 }
  0x2e   :  { %vm533_vm8 = vcmp.ne.s32.totalorder %v1253_v26, 0  ;;  %vm551_vm9 = vcmp.lt.s32.totalorder %v1253_v26, 0  ;;  %v587_v14 = vadd.s32 9, %v1253_v26  ;;  %v1346_v1 = vsub.s32 %v1198_v61, %v439_v45 }
  0x2f   :  { %vm536_vm10 = vcmp.ne.s32.totalorder %v1256_v28, 0  ;;  %vm554_vm11 = vcmp.lt.s32.totalorder %v1256_v28, 0  ;;  %v590_v42 = vadd.s32 9, %v1256_v28  ;;  %vm1296_vm15 = vmand %vm551_vm9, %vm533_vm8  ;;  %v428_v60 = vmul.u32 9, %v427_v43 }
  0x30   :  { %881 = vmatmul.mubr.f32.gmra.mrb[6].mxu0 %v94_v31  ;;  %896 = vmatmul.mubr.f32.gmra.mrb[6].mxu1 %v104_v33  ;;  %v1260_v30 = vmul.u32.u64.low 3817748708, %v1231_v17  ;;  %v1261_v31 = vmul.u32.u64.high 3817748708, %v1231_v17, %v1260_v30  ;;  %v603_v33 = vsel %vm1245_vm5, %v585_v15, %v1201_v62  ;;  %vm1305_vm0 = vmand %vm554_vm11, %vm536_vm10  ;;  %v1333_v62 = vadd.s32 112, %v1160_v36 }
  0x31   :  { %883 = vmatprep.mubr.f32.mxu0 %v95_v34  ;;  %v1270_v34 = vsub.s32 %v282_v47, %v384_v20  ;;  %v1302_v47 = vmul.u32.u64.low 3817748708, %v1276_v37  ;;  %v1303_v48 = vmul.u32.u64.high 3817748708, %v1276_v37, %v1302_v47  ;;  %vm1335_vm3 = vcmp.lt.s32.totalorder %v603_v33, 8 }
  0x32   :  { %v449_v56 = vshrl.u32 %v1261_v31, 3  ;;  %v605_v58 = vsel %vm1296_vm15, %v587_v14, %v1253_v26  ;;  %v608_v0 = vsel %vm1305_vm0, %v590_v42, %v1256_v28  ;;  %vm556_vm5 = vcmp.lt.s32.totalorder %v1311_v51, 0 }
  0x33   :  { %vm535_vm13 = vcmp.ne.s32.totalorder %v1270_v34, 0  ;;  %vm553_vm14 = vcmp.lt.s32.totalorder %v1270_v34, 0  ;;  %v589_v50 = vadd.s32 9, %v1270_v34  ;;  %v1361_v61 = vadd.s32 128, %v1160_v36  ;;  %vm1375_vm9 = vmand %vm556_vm5, %vm538_vm4 }
  0x34   :  { %884 = vmatmul.mubr.f32.gmra.mrb[8].mxu0 %v96_v10  ;;  %v588_v10 = vadd.s32 9, %v1239_v19  ;;  %vm1317_vm1 = vmand %vm553_vm14, %vm535_vm13  ;;  %v450_v6 = vmul.u32 9, %v449_v56  ;;  %vm555_vm7 = vcmp.lt.s32.totalorder %v1322_v55, 0  ;;  %v1365_v8 = vsub.s32 %v1216_v7, %v428_v60 }
  0x35   :  { %v607_v3 = vsel %vm1317_vm1, %v589_v50, %v1270_v34  ;;  %v1368_v9 = vmul.u32.u64.low 3817748708, %v1333_v62  ;;  %v1369_v12 = vmul.u32.u64.high 3817748708, %v1333_v62, %v1368_v9  ;;  %v1380_v16 = vadd.s32 9, %v1322_v55  ;;  %vm1415_vm13 = vmand %vm555_vm7, %vm537_vm6 }
  0x36   :  { %v606_v57 = vsel %vm1288_vm12, %v588_v10, %v1239_v19  ;;  %vm540_vm10 = vcmp.ne.s32.totalorder %v1346_v1, 0  ;;  %v1384_v7 = vsub.s32 %v1224_v11, %v461_v2  ;;  %v482_v18 = vshrl.u32 %v1303_v48, 3 }
  0x37   :  { %vm1371_vm8 = vcmp.lt.s32.totalorder %v606_v57, 8  ;;  %v471_v19 = vshrl.u32 %v1315_v53, 3  ;;  %v1389_v20 = vmul.u32.u64.low 3817748708, %v1354_v4  ;;  %v1390_v21 = vmul.u32.u64.high 3817748708, %v1354_v4, %v1389_v20 }
  0x38   :  { %v1393_v22 = vadd.s32 136, %v1160_v36  ;;  %vm558_vm11 = vcmp.lt.s32.totalorder %v1346_v1, 0  ;;  %v1397_v23 = vsub.s32 %v1231_v17, %v450_v6  ;;  %vm1403_vm12 = vcmp.lt.s32.totalorder %v605_v58, 8 }
  0x39   :  { %v1400_v24 = vmul.u32.u64.low 3817748708, %v1361_v61  ;;  %v1401_v11 = vmul.u32.u64.high 3817748708, %v1361_v61, %v1400_v24  ;;  %v610_v26 = vsel %vm1375_vm9, %v1357_v5, %v1311_v51  ;;  %vm539_vm14 = vcmp.ne.s32.totalorder %v1365_v8, 0  ;;  %vm1436_vm5 = vmand %vm558_vm11, %vm540_vm10 }
  0x3a   :  { %vm557_vm15 = vcmp.lt.s32.totalorder %v1365_v8, 0  ;;  %vm1421_vm0 = vcmp.lt.s32.totalorder %v608_v0, 8  ;;  %vm1425_vm1 = vcmp.lt.s32.totalorder %v607_v3, 8  ;;  %v594_v28 = vadd.s32 9, %v1346_v1 }
  0x3b   :  { %v593_v29 = vadd.s32 9, %v1365_v8  ;;  %vm542_vm4 = vcmp.ne.s32.totalorder %v1384_v7, 0  ;;  %v483_v30 = vmul.u32 9, %v482_v18  ;;  %vm560_vm6 = vcmp.lt.s32.totalorder %v1384_v7, 0  ;;  %vm1460_vm7 = vmand %vm557_vm15, %vm539_vm14 }
  0x3c   :  { %v472_v34 = vmul.u32 9, %v471_v19  ;;  %v1444_v10 = vmul.u32.u64.low 3817748708, %v1393_v22  ;;  %v1445_v35 = vmul.u32.u64.high 3817748708, %v1393_v22, %v1444_v10  ;;  %v609_v40 = vsel %vm1415_vm13, %v1380_v16, %v1322_v55 }
  0x3d   :  { %vm559_vm9 = vcmp.lt.s32.totalorder %v1397_v23, 0  ;;  %v596_v45 = vadd.s32 9, %v1384_v7  ;;  %v493_v46 = vshrl.u32 %v1369_v12, 3  ;;  %v595_v50 = vadd.s32 9, %v1397_v23 }
  0x3e   :  { %v1493_v51 = vsub.s32 %v1276_v37, %v483_v30  ;;  %v612_v53 = vsel %vm1436_vm5, %v594_v28, %v1346_v1  ;;  %v611_v54 = vsel %vm1460_vm7, %v593_v29, %v1365_v8  ;;  %v1512_v37 = vsub.s32 %v1281_v39, %v472_v34 }
  0x3f   :  { %v504_v59 = vshrl.u32 %v1390_v21, 3  ;;  %vm1518_vm11 = vcmp.lt.s32.totalorder %v610_v26, 8  ;;  %vm1522_vm13 = vcmp.lt.s32.totalorder %v609_v40, 8  ;;  %v515_v0 = vshrl.u32 %v1401_v11, 3 }
  0x40   :  { %v494_v5 = vmul.u32 9, %v493_v46  ;;  %vm544_vm14 = vcmp.ne.s32.totalorder %v1493_v51, 0  ;;  %vm543_vm15 = vcmp.ne.s32.totalorder %v1512_v37, 0  ;;  %v526_v18 = vshrl.u32 %v1445_v35, 3 }
  0x41   :  { %v516_v11 = vmul.u32 9, %v515_v0  ;;  %vm562_vm5 = vcmp.lt.s32.totalorder %v1493_v51, 0  ;;  %v597_v30 = vadd.s32 9, %v1512_v37 }
  0x42   :  { %v1582_v36 = vsub.s32 %v1333_v62, %v494_v5  ;;  %v598_v62 = vadd.s32 9, %v1493_v51 }
  0x44   :  { %vm545_vm7 = vcmp.ne.s32.totalorder %v1582_v36, 0 }
  0xf7   :  { %v873_v31 = vpop.f32.mrb[0].mxu0  ;;  %v1440_v33 = vpop.f32.mrb[0].mxu1 }
  0xf8   :  { %v694_v38 = vsel %vm1325_vm2, %v873_v31, 0.0  ;;  %778 = vst [vmem:[%s1727_s4 + $0x8] sm:$0xff] %v873_v31  ;;  %v187_v14 = vpop.f32.mrb[1].mxu0  ;;  %788 = vst [vmem:[%s1727_s4 + $0x58] sm:$0xff] %v1440_v33  ;;  %v1468_v42 = vpop.f32.mrb[1].mxu1  ;;  %vm541_vm2 = vcmp.ne.s32.totalorder %v1397_v23, 0 }
  0xf9   :  { %v736_v43 = vmul.f32 %v694_v38, %v694_v38  ;;  %v693_v44 = vsel %vm1335_vm3, %v187_v14, 0.0  ;;  %777 = vst [vmem:[%s1727_s4] sm:$0xff] %v187_v14  ;;  %787 = vst [vmem:[%s1727_s4 + $0x50] sm:$0xff] %v1468_v42 }
  0xfa   :  { %v711_v47 = vadd.f32 %v694_v38, %v693_v44  ;;  %v735_v48 = vmul.f32 %v693_v44, %v693_v44  ;;  %vm1487_vm3 = vmand %vm560_vm6, %vm542_vm4  ;;  %vm561_vm4 = vcmp.lt.s32.totalorder %v1512_v37, 0  ;;  %v527_v38 = vmul.u32 9, %v526_v18 }
  0xfb   :  { %v876_v52 = vpop.f32.mrb[2].mxu0  ;;  %vm1505_vm10 = vmand %vm559_vm9, %vm541_vm2  ;;  %v1509_v56 = vpop.f32.mrb[2].mxu1  ;;  %v614_v3 = vsel %vm1487_vm3, %v596_v45, %v1384_v7  ;;  %v505_v7 = vmul.u32 9, %v504_v59  ;;  %vm563_vm2 = vcmp.lt.s32.totalorder %v1582_v36, 0 }
  0xfc   :  { %v753_v57 = vadd.f32 %v736_v43, %v735_v48  ;;  %780 = vst [vmem:[%s1727_s4 + $0x18] sm:$0xff] %v876_v52  ;;  %v197_v60 = vpop.f32.mrb[3].mxu0  ;;  %790 = vst [vmem:[%s1727_s4 + $0x68] sm:$0xff] %v1509_v56  ;;  %v1530_v39 = vpop.f32.mrb[3].mxu1  ;;  %v696_v1 = vsel %vm1371_vm8, %v876_v52, 0.0  ;;  %vm1547_vm8 = vcmp.lt.s32.totalorder %v612_v53, 8  ;;  %v613_v13 = vsel %vm1505_vm10, %v595_v50, %v1397_v23 }
  0xfd   :  { %v695_v2 = vsel %vm1403_vm12, %v197_v60, 0.0  ;;  %779 = vst [vmem:[%s1727_s4 + $0x10] sm:$0xff] %v197_v60  ;;  %789 = vst [vmem:[%s1727_s4 + $0x60] sm:$0xff] %v1530_v39  ;;  %vm1551_vm12 = vcmp.lt.s32.totalorder %v611_v54, 8  ;;  %v738_v19 = vmul.f32 %v696_v1, %v696_v1  ;;  %v1607_v10 = vsub.s32 %v1354_v4, %v505_v7 }
  0xfe   :  { %v712_v6 = vadd.f32 %v711_v47, %v695_v2  ;;  %v737_v8 = vmul.f32 %v695_v2, %v695_v2  ;;  %vm1602_vm6 = vmand %vm561_vm4, %vm543_vm15  ;;  %v1621_v4 = vsub.s32 %v1361_v61, %v516_v11  ;;  %v599_v53 = vadd.s32 9, %v1582_v36 }
  0xff   :  { %v879_v15 = vpop.f32.mrb[4].mxu0  ;;  %v1561_v16 = vpop.f32.mrb[4].mxu1  ;;  %v615_v49 = vsel %vm1602_vm6, %v597_v30, %v1512_v37  ;;  %vm1643_vm9 = vmand %vm562_vm5, %vm544_vm14  ;;  %vm546_vm3 = vcmp.ne.s32.totalorder %v1607_v10, 0  ;;  %vm564_vm10 = vcmp.lt.s32.totalorder %v1607_v10, 0  ;;  %v528_v54 = vsub.s32 %v1393_v22, %v527_v38 }
 0x100   :  { %v754_v20 = vadd.f32 %v753_v57, %v737_v8  ;;  %782 = vst [vmem:[%s1727_s4 + $0x28] sm:$0xff] %v879_v15  ;;  %v207_v21 = vpop.f32.mrb[5].mxu0  ;;  %v713_v23 = vadd.f32 %v712_v6, %v696_v1  ;;  %792 = vst [vmem:[%s1727_s4 + $0x78] sm:$0xff] %v1561_v16  ;;  %v1571_v24 = vpop.f32.mrb[5].mxu1  ;;  %v698_v25 = vsel %vm1421_vm0, %v879_v15, 0.0  ;;  %vm1588_vm0 = vcmp.lt.s32.totalorder %v614_v3, 8 }
 0x101   :  { %v697_v26 = vsel %vm1425_vm1, %v207_v21, 0.0  ;;  %781 = vst [vmem:[%s1727_s4 + $0x20] sm:$0xff] %v207_v21  ;;  %791 = vst [vmem:[%s1727_s4 + $0x70] sm:$0xff] %v1571_v24  ;;  %vm1593_vm1 = vcmp.lt.s32.totalorder %v613_v13, 8  ;;  %v740_v14 = vmul.f32 %v698_v25, %v698_v25  ;;  %vm565_vm14 = vcmp.lt.s32.totalorder %v1621_v4, 0 }
 0x102   :  { %v714_v28 = vadd.f32 %v713_v23, %v697_v26  ;;  %v739_v17 = vmul.f32 %v697_v26, %v697_v26  ;;  %v755_v29 = vadd.f32 %v754_v20, %v738_v19  ;;  %v703_v58 = vsel %vm1593_vm1, %v1468_v42, 0.0 }
 0x103   :  { %v882_v31 = vpop.f32.mrb[6].mxu0  ;;  %v1609_v35 = vpop.f32.mrb[6].mxu1  ;;  %vm633_vm15 = vcmp.lt.s32.totalorder %v615_v49, 8  ;;  %v616_v3 = vsel %vm1643_vm9, %v598_v62, %v1493_v51  ;;  %v600_v42 = vadd.s32 9, %v1607_v10  ;;  %v601_v8 = vadd.s32 9, %v1621_v4 }
 0x104   :  { %v756_v40 = vadd.f32 %v755_v29, %v739_v17  ;;  %784 = vst [vmem:[%s1727_s4 + $0x38] sm:$0xff] %v882_v31  ;;  %v217_v41 = vpop.f32.mrb[7].mxu0  ;;  %v715_v43 = vadd.f32 %v714_v28, %v698_v25  ;;  %794 = vst [vmem:[%s1727_s4 + $0x88] sm:$0xff] %v1609_v35  ;;  %v1618_v44 = vpop.f32.mrb[7].mxu1  ;;  %v700_v45 = vsel %vm1518_vm11, %v882_v31, 0.0  ;;  %v745_v51 = vmul.f32 %v703_v58, %v703_v58 }
 0x105   :  { %v699_v46 = vsel %vm1522_vm13, %v217_v41, 0.0  ;;  %783 = vst [vmem:[%s1727_s4 + $0x30] sm:$0xff] %v217_v41  ;;  %793 = vst [vmem:[%s1727_s4 + $0x80] sm:$0xff] %v1618_v44  ;;  %v742_v55 = vmul.f32 %v700_v45, %v700_v45  ;;  %vm547_vm13 = vcmp.ne.s32.totalorder %v1621_v4, 0  ;;  %v704_v7 = vsel %vm1588_vm0, %v1440_v33, 0.0 }
 0x106   :  { %v716_v61 = vadd.f32 %v715_v43, %v699_v46  ;;  %v741_v47 = vmul.f32 %v699_v46, %v699_v46  ;;  %v757_v48 = vadd.f32 %v756_v40, %v740_v14  ;;  %vm1658_vm11 = vmand %vm563_vm2, %vm545_vm7  ;;  %v705_v18 = vsel %vm633_vm15, %v1530_v39, 0.0 }
 0x107   :  { %v885_v50 = vpop.f32.mrb[8].mxu0  ;;  %v617_v6 = vsel %vm1658_vm11, %v599_v53, %v1582_v36  ;;  %vm548_vm4 = vcmp.ne.s32.totalorder %v528_v54, 0  ;;  %vm566_vm5 = vcmp.lt.s32.totalorder %v528_v54, 0  ;;  %vm634_vm1 = vcmp.lt.s32.totalorder %v616_v3, 8 }
 0x108   :  { %v758_v59 = vadd.f32 %v757_v48, %v741_v47  ;;  %786 = vst [vmem:[%s1727_s4 + $0x48] sm:$0xff] %v885_v50  ;;  %v227_v37 = vpop.f32.mrb[9].mxu0  ;;  %v717_v57 = vadd.f32 %v716_v61, %v700_v45  ;;  %v702_v22 = vsel %vm1547_vm8, %v885_v50, 0.0  ;;  %vm1681_vm8 = vmand %vm564_vm10, %vm546_vm3  ;;  %vm635_vm6 = vcmp.lt.s32.totalorder %v617_v6, 8 }
 0x109   :  { %v701_v63 = vsel %vm1551_vm12, %v227_v37, 0.0  ;;  %785 = vst [vmem:[%s1727_s4 + $0x40] sm:$0xff] %v227_v37  ;;  %v744_v9 = vmul.f32 %v702_v22, %v702_v22  ;;  %vm1692_vm12 = vmand %vm565_vm14, %vm547_vm13  ;;  %v618_v21 = vsel %vm1681_vm8, %v600_v42, %v1607_v10  ;;  %v602_v23 = vadd.s32 9, %v528_v54 }
 0x10a   :  { %v718_v0 = vadd.f32 %v717_v57, %v701_v63  ;;  %v743_v1 = vmul.f32 %v701_v63, %v701_v63  ;;  %v759_v2 = vadd.f32 %v758_v59, %v742_v55  ;;  %v619_v11 = vsel %vm1692_vm12, %v601_v8, %v1621_v4  ;;  %vm1706_vm0 = vmand %vm566_vm5, %vm548_vm4 }
 0x10b   :  { %v746_v25 = vmul.f32 %v704_v7, %v704_v7  ;;  %v747_v36 = vmul.f32 %v705_v18, %v705_v18  ;;  %v706_v28 = vsel %vm634_vm1, %v1509_v56, 0.0  ;;  %v707_v17 = vsel %vm635_vm6, %v1571_v24, 0.0 }
 0x10c   :  { %v719_v12 = vadd.f32 %v718_v0, %v702_v22  ;;  %v760_v13 = vadd.f32 %v759_v2, %v743_v1  ;;  %vm636_vm7 = vcmp.lt.s32.totalorder %v618_v21, 8  ;;  %vm637_vm2 = vcmp.lt.s32.totalorder %v619_v11, 8 }
 0x10d   :  { %v620_v30 = vsel %vm1706_vm0, %v602_v23, %v528_v54  ;;  %v748_v31 = vmul.f32 %v706_v28, %v706_v28  ;;  %v749_v34 = vmul.f32 %v707_v17, %v707_v17  ;;  %v708_v10 = vsel %vm636_vm7, %v1561_v16, 0.0 }
 0x10e   :  { %v761_v19 = vadd.f32 %v760_v13, %v744_v9  ;;  %v720_v20 = vadd.f32 %v719_v12, %v703_v58  ;;  %v709_v38 = vsel %vm637_vm2, %v1618_v44, 0.0  ;;  %vm638_vm9 = vcmp.lt.s32.totalorder %v620_v30, 8 }
 0x10f   :  { %v750_v56 = vmul.f32 %v708_v10, %v708_v10  ;;  %v751_v43 = vmul.f32 %v709_v38, %v709_v38  ;;  %v710_v4 = vsel %vm638_vm9, %v1609_v35, 0.0 }
 0x110   :  { %v762_v26 = vadd.f32 %v761_v19, %v745_v51  ;;  %v721_v33 = vadd.f32 %v720_v20, %v704_v7  ;;  %v752_v61 = vmul.f32 %v710_v4, %v710_v4 }
 0x112   :  { %v722_v29 = vadd.f32 %v721_v33, %v705_v18  ;;  %v763_v27 = vadd.f32 %v762_v26, %v746_v25 }
 0x114   :  { %v764_v32 = vadd.f32 %v763_v27, %v747_v36  ;;  %v723_v62 = vadd.f32 %v722_v29, %v706_v28 }
 0x116   :  { %v724_v14 = vadd.f32 %v723_v62, %v707_v17  ;;  %v765_v40 = vadd.f32 %v764_v32, %v748_v31 }
 0x118   :  { %v766_v24 = vadd.f32 %v765_v40, %v749_v34  ;;  %v725_v41 = vadd.f32 %v724_v14, %v708_v10 }
 0x11a   :  { %v726_v45 = vadd.f32 %v725_v41, %v709_v38  ;;  %v767_v46 = vadd.f32 %v766_v24, %v750_v56 }
 0x11c   :  { %v727_v47 = vadd.f32 %v726_v45, %v710_v4  ;;  %v768_v48 = vadd.f32 %v767_v46, %v751_v43 }
 0x11e   :  { %v728_v49 = vrot.slane %v727_v47, 4  ;;  %v769_v50 = vadd.f32 %v768_v48, %v752_v61 }
 0x120   :  { %v729_v52 = vadd.f32 %v728_v49, %v727_v47  ;;  %v770_v16 = vrot.slane %v769_v50, 4 }
 0x122   :  { %v730_v53 = vrot.slane %v729_v52, 2  ;;  %v771_v44 = vadd.f32 %v770_v16, %v769_v50 }
 0x124   :  { %v731_v54 = vadd.f32 %v730_v53, %v729_v52  ;;  %v772_v55 = vrot.slane %v771_v44, 2 }
 0x126   :  { %v732_v59 = vrot.slane %v731_v54, 1  ;;  %v773_v37 = vadd.f32 %v772_v55, %v771_v44 }
 0x128   :  { %v733_v57 = vadd.f32 %v732_v59, %v731_v54  ;;  %v774_v60 = vrot.slane %v773_v37, 1 }
 0x12a   :  { %734 = vst [vmem:[%s1728_s5] sm:$0x1] %v733_v57  ;;  %v775_v35 = vadd.f32 %v774_v60, %v773_v37 }
 0x12c   :  { %776 = vst [vmem:[%s1728_s5 + $0x1] sm:$0x1] %v775_v35 }

// kernel: resblock_forward.3
= control target key start
LH: loop header
LB: loop body
LE: loop exit
PB: predicated region body
PF: predicated region fallthrough
CT: control target
= control target key end

     0   :  { %s3424_s18 = smov 0   ;;  %s3426_s19 = smov 0   ;;  %s4305_s0 = inlined_call_operand.vmem [shape: f32[4,2,88,4], index: 0, kind: input, shape index: {}]   ;;  %s4306_s1 = inlined_call_operand.vmem [shape: f32[9,4,128], index: 1, kind: input, shape index: {}]   ;;  %s4307_s2 = inlined_call_operand.vmem [shape: f32[4,128], index: 2, kind: input, shape index: {}]   ;;  %s4308_s3 = inlined_call_operand.vmem [shape: f32[2,72,128], index: 3, kind: output, shape index: {0}]   ;;  %s4309_s4 = inlined_call_operand.vmem [shape: f32[2,72,128], index: 4, kind: output, shape index: {1}]   ;;  %s4310_s5 = inlined_call_operand.vmem [shape: f32[2,4,128], index: 5, kind: output, shape index: {2}]  }
   0x1   :  { %s3428_s20 = smov 0  }
   0x2 LB: > { %s2622_s21 = sadd.s32 4294967295, %s3390_s20   ;;  %s3441_s22 = sadd.s32 1, %s3390_s20   ;;  %s3390_s20 = sphi %s3428_s20, %s4349_s20   ;;  %s3386_s19 = sphi %s3426_s19, %s4348_s19   ;;  %s3382_s18 = sphi %s3424_s18, %s4347_s18  }
   0x3   : > { %s20_s23 = ssub.s32 %s3390_s20, %s3441_s22  ;;  %s23_s24 = sadd.s32 1, %s3386_s19 }
   0x4   : > { %p21_p0 = scmp.eq.s32.totalorder %s20_s23, 0  ;;  %p30_p1 = scmp.ne.s32.totalorder %s3386_s19, %s3382_s18 }
   0x5   : > { %p31_p2 = scmp.eq.s32.totalorder %s3390_s20, 0  ;;  %p2625_p4 = scmp.ge.s32.totalorder %s3390_s20, 2 }
   0x6   : > { %s3450_s25 = scalar_select %p21_p0, %s3386_s19, %s23_s24  }
   0x7   : > { %p32_p3 = por %p31_p2, %p30_p1  ;;  %182 = sbr.rel (%p2625_p4) target bundleno = 41 (0x29), region = 24 }
   0xe   : > { %185 = sbr.rel (!%p32_p3) target bundleno = 41 (0x29), region = 28  ;;  %s187_s26 = sand.u32 (%p32_p3), 1, %s3386_s19  }
   0xf   : > { %s3321_s27 = smul.u32 (%p32_p3), 88, %s3390_s20 }
  0x10   : > { %s3320_s28 = smul.u32 (%p32_p3), 352, %s187_s26 }
  0x11   : > { %s3458_s6 = scalar_lea.vmem (%p32_p3), %s4305_s0, %s3321_s27 }
  0x12   : > { %v306_v0 = vld [vmem:[%s3458_s6] sm:$0xff] (%p32_p3)  ;;  %v308_v1 = vld [vmem:[%s3458_s6 + $0x8] sm:$0xff] (%p32_p3)  ;;  %v310_v2 = vld [vmem:[%s3458_s6 + $0x10] sm:$0xff] (%p32_p3)  ;;  %s3463_s7 = scalar_lea.vmem (%p32_p3), [#allocation3], %s3320_s28 }
  0x13   : > { %307 = vst [vmem:[%s3463_s7] sm:$0xff] (%p32_p3), %v306_v0  ;;  %309 = vst [vmem:[%s3463_s7 + $0x8] sm:$0xff] (%p32_p3), %v308_v1  ;;  %v312_v3 = vld [vmem:[%s3458_s6 + $0x18] sm:$0xff] (%p32_p3)  ;;  %v314_v4 = vld [vmem:[%s3458_s6 + $0x20] sm:$0xff] (%p32_p3) }
  0x14   : > { %311 = vst [vmem:[%s3463_s7 + $0x10] sm:$0xff] (%p32_p3), %v310_v2  ;;  %v316_v5 = vld [vmem:[%s3458_s6 + $0x28] sm:$0xff] (%p32_p3)  ;;  %313 = vst [vmem:[%s3463_s7 + $0x18] sm:$0xff] (%p32_p3), %v312_v3  ;;  %v318_v6 = vld [vmem:[%s3458_s6 + $0x30] sm:$0xff] (%p32_p3) }
  0x15   : > { %315 = vst [vmem:[%s3463_s7 + $0x20] sm:$0xff] %v314_v4  ;;  %317 = vst [vmem:[%s3463_s7 + $0x28] sm:$0xff] %v316_v5  ;;  %v320_v7 = vld [vmem:[%s3458_s6 + $0x38] sm:$0xff]  ;;  %v322_v8 = vld [vmem:[%s3458_s6 + $0x40] sm:$0xff] }
  0x16   : > { %319 = vst [vmem:[%s3463_s7 + $0x30] sm:$0xff] %v318_v6  ;;  %321 = vst [vmem:[%s3463_s7 + $0x38] sm:$0xff] %v320_v7  ;;  %v324_v9 = vld [vmem:[%s3458_s6 + $0x48] sm:$0xff]  ;;  %v326_v10 = vld [vmem:[%s3458_s6 + $0x50] sm:$0xff] }
  0x17   : > { %323 = vst [vmem:[%s3463_s7 + $0x40] sm:$0xff] %v322_v8  ;;  %v328_v11 = vld [vmem:[%s3458_s6 + $0xb0] sm:$0xff]  ;;  %325 = vst [vmem:[%s3463_s7 + $0x48] sm:$0xff] %v324_v9  ;;  %v330_v12 = vld [vmem:[%s3458_s6 + $0xb8] sm:$0xff] }
  0x18   : > { %327 = vst [vmem:[%s3463_s7 + $0x50] sm:$0xff] %v326_v10  ;;  %329 = vst [vmem:[%s3463_s7 + $0x58] sm:$0xff] %v328_v11  ;;  %v332_v13 = vld [vmem:[%s3458_s6 + $0xc0] sm:$0xff]  ;;  %v334_v14 = vld [vmem:[%s3458_s6 + $0xc8] sm:$0xff] }
  0x19   : > { %331 = vst [vmem:[%s3463_s7 + $0x60] sm:$0xff] %v330_v12  ;;  %333 = vst [vmem:[%s3463_s7 + $0x68] sm:$0xff] %v332_v13  ;;  %v336_v15 = vld [vmem:[%s3458_s6 + $0xd0] sm:$0xff]  ;;  %v338_v16 = vld [vmem:[%s3458_s6 + $0xd8] sm:$0xff] }
  0x1a   : > { %335 = vst [vmem:[%s3463_s7 + $0x70] sm:$0xff] %v334_v14  ;;  %v340_v17 = vld [vmem:[%s3458_s6 + $0xe0] sm:$0xff]  ;;  %337 = vst [vmem:[%s3463_s7 + $0x78] sm:$0xff] %v336_v15  ;;  %v342_v18 = vld [vmem:[%s3458_s6 + $0xe8] sm:$0xff] }
  0x1b   : > { %339 = vst [vmem:[%s3463_s7 + $0x80] sm:$0xff] %v338_v16  ;;  %341 = vst [vmem:[%s3463_s7 + $0x88] sm:$0xff] %v340_v17  ;;  %v344_v19 = vld [vmem:[%s3458_s6 + $0xf0] sm:$0xff]  ;;  %v346_v20 = vld [vmem:[%s3458_s6 + $0xf8] sm:$0xff] }
  0x1c   : > { %343 = vst [vmem:[%s3463_s7 + $0x90] sm:$0xff] %v342_v18  ;;  %345 = vst [vmem:[%s3463_s7 + $0x98] sm:$0xff] %v344_v19  ;;  %v348_v21 = vld [vmem:[%s3458_s6 + $0x100] sm:$0xff]  ;;  %v352_v23 = vld [vmem:[%s3458_s6 + $0x168] sm:$0xff] }
  0x1d   : > { %347 = vst [vmem:[%s3463_s7 + $0xa0] sm:$0xff] %v346_v20  ;;  %v350_v22 = vld [vmem:[%s3458_s6 + $0x160] sm:$0xff]  ;;  %349 = vst [vmem:[%s3463_s7 + $0xa8] sm:$0xff] %v348_v21  ;;  %v354_v24 = vld [vmem:[%s3458_s6 + $0x170] sm:$0xff] }
  0x1e   : > { %351 = vst [vmem:[%s3463_s7 + $0xb0] sm:$0xff] %v350_v22  ;;  %353 = vst [vmem:[%s3463_s7 + $0xb8] sm:$0xff] %v352_v23  ;;  %v356_v25 = vld [vmem:[%s3458_s6 + $0x178] sm:$0xff]  ;;  %v358_v26 = vld [vmem:[%s3458_s6 + $0x180] sm:$0xff] }
  0x1f   : > { %355 = vst [vmem:[%s3463_s7 + $0xc0] sm:$0xff] %v354_v24  ;;  %357 = vst [vmem:[%s3463_s7 + $0xc8] sm:$0xff] %v356_v25  ;;  %v360_v27 = vld [vmem:[%s3458_s6 + $0x188] sm:$0xff]  ;;  %v362_v28 = vld [vmem:[%s3458_s6 + $0x190] sm:$0xff] }
  0x20   : > { %359 = vst [vmem:[%s3463_s7 + $0xd0] sm:$0xff] %v358_v26  ;;  %v364_v29 = vld [vmem:[%s3458_s6 + $0x198] sm:$0xff]  ;;  %361 = vst [vmem:[%s3463_s7 + $0xd8] sm:$0xff] %v360_v27  ;;  %v366_v30 = vld [vmem:[%s3458_s6 + $0x1a0] sm:$0xff] }
  0x21   : > { %363 = vst [vmem:[%s3463_s7 + $0xe0] sm:$0xff] %v362_v28  ;;  %365 = vst [vmem:[%s3463_s7 + $0xe8] sm:$0xff] %v364_v29  ;;  %v368_v31 = vld [vmem:[%s3458_s6 + $0x1a8] sm:$0xff]  ;;  %v370_v32 = vld [vmem:[%s3458_s6 + $0x1b0] sm:$0xff] }
  0x22   : > { %367 = vst [vmem:[%s3463_s7 + $0xf0] sm:$0xff] %v366_v30  ;;  %369 = vst [vmem:[%s3463_s7 + $0xf8] sm:$0xff] %v368_v31  ;;  %v372_v33 = vld [vmem:[%s3458_s6 + $0x210] sm:$0xff]  ;;  %v374_v34 = vld [vmem:[%s3458_s6 + $0x218] sm:$0xff] }
  0x23   : > { %371 = vst [vmem:[%s3463_s7 + $0x100] sm:$0xff] %v370_v32  ;;  %v376_v35 = vld [vmem:[%s3458_s6 + $0x220] sm:$0xff]  ;;  %373 = vst [vmem:[%s3463_s7 + $0x108] sm:$0xff] %v372_v33  ;;  %v378_v36 = vld [vmem:[%s3458_s6 + $0x228] sm:$0xff] }
  0x24   : > { %375 = vst [vmem:[%s3463_s7 + $0x110] sm:$0xff] %v374_v34  ;;  %377 = vst [vmem:[%s3463_s7 + $0x118] sm:$0xff] %v376_v35  ;;  %v380_v37 = vld [vmem:[%s3458_s6 + $0x230] sm:$0xff]  ;;  %v382_v38 = vld [vmem:[%s3458_s6 + $0x238] sm:$0xff] }
  0x25   : > { %379 = vst [vmem:[%s3463_s7 + $0x120] sm:$0xff] %v378_v36  ;;  %381 = vst [vmem:[%s3463_s7 + $0x128] sm:$0xff] %v380_v37  ;;  %v384_v39 = vld [vmem:[%s3458_s6 + $0x240] sm:$0xff]  ;;  %v386_v40 = vld [vmem:[%s3458_s6 + $0x248] sm:$0xff] }
  0x26   : > { %383 = vst [vmem:[%s3463_s7 + $0x130] sm:$0xff] %v382_v38  ;;  %v388_v41 = vld [vmem:[%s3458_s6 + $0x250] sm:$0xff]  ;;  %385 = vst [vmem:[%s3463_s7 + $0x138] sm:$0xff] %v384_v39  ;;  %v390_v42 = vld [vmem:[%s3458_s6 + $0x258] sm:$0xff] }
  0x27   : > { %387 = vst [vmem:[%s3463_s7 + $0x140] sm:$0xff] %v386_v40  ;;  %389 = vst [vmem:[%s3463_s7 + $0x148] sm:$0xff] %v388_v41  ;;  %v392_v43 = vld [vmem:[%s3458_s6 + $0x260] sm:$0xff] }
  0x28   : > { %391 = vst [vmem:[%s3463_s7 + $0x150] sm:$0xff] %v390_v42  ;;  %393 = vst [vmem:[%s3463_s7 + $0x158] sm:$0xff] %v392_v43 }
  0x29 PF: > { %p2627_p5 = scmp.ge.s32.totalorder %s3390_s20, 1  ;;  %p398_p6 = scmp.lt.s32.totalorder %s3390_s20, 3 }
  0x2b   : > { %p399_p7 = pnand %p2627_p5, %p398_p6 }
  0x2c   : > { %vm493_vm0 = vcmask (!%p399_p7), 1043456   ;;  %v2701_v44 = vld [vmem:[%s4306_s1 + $0x10] sm:$0xf] (!%p399_p7)  ;;  %v464_v45 = vld [vmem:[%s4306_s1] sm:$0xf] (!%p399_p7)  ;;  %v3392_v46 = vmov (!%p399_p7), 0.0  }
  0x2d   : > { %402 = sbr.rel (%p399_p7) target bundleno = 458 (0x1ca), region = 66  ;;  %3011 = vmatprep.subr.mxu0 (!%p399_p7), %v3392_v46  ;;  %2895 = vmatprep.subr.mxu1 (!%p399_p7), %v3392_v46  ;;  %s405_s12 = sand.u32 (!%p399_p7), 1, %s3382_s18   ;;  %vm3393_vm1 = vmmov (!%p399_p7), 0   ;;  %vm465_vm2 = vcmask (!%p399_p7), 31744   ;;  %v2721_v47 = vld [vmem:[%s4306_s1 + $0x14] sm:$0xf] (!%p399_p7) }
  0x2e   : > { %3012 = vmatpush3.msk.msra.mxu0 (!%p399_p7), %vm493_vm0, %v2701_v44  ;;  %2896 = vmatpush3.msk.msra.mxu1 (!%p399_p7), %vm493_vm0, %v464_v45  ;;  %s3322_s13 = smul.u32 (!%p399_p7), 352, %s405_s12  ;;  %v2650_v48 = vld [vmem:[%s4306_s1 + $0x4] sm:$0xf] (!%p399_p7)  ;;  %v2732_v5 = vld [vmem:[%s4306_s1 + $0x18] sm:$0xf] (!%p399_p7)  ;;  %p441_p8 = scmp.lt.s32.totalorder (!%p399_p7), %s2622_s21, 1 }
  0x2f   : > { %2897 = vmatprep.mubr.msk.f32.mxu1 (!%p399_p7), %vm3393_vm1, %v3392_v46  ;;  %3013 = vmatprep.mubr.msk.f32.mxu0 (!%p399_p7), %vm3393_vm1, %v3392_v46  ;;  %v2661_v6 = vld [vmem:[%s4306_s1 + $0x8] sm:$0xf] (!%p399_p7)  ;;  %v2752_v25 = vld [vmem:[%s4306_s1 + $0x1c] sm:$0xf] (!%p399_p7)  ;;  %v2681_v26 = vld [vmem:[%s4306_s1 + $0xc] sm:$0xf] (!%p399_p7) }
  0x30   : > { %3040 = vmatprep.subr.mxu0 (!%p399_p7), %v3392_v46  ;;  %2924 = vmatprep.subr.mxu1 (!%p399_p7), %v3392_v46  ;;  %s3575_s18 = scalar_lea.vmem (!%p399_p7), [#allocation3], %s3322_s13  ;;  %v2763_v37 = vld [vmem:[%s4306_s1 + $0x20] sm:$0xf] (!%p399_p7) }
  0x31   : > { %v455_v49 = vld [vmem:[%s3575_s18] sm:$0xff] (!%p399_p7)  ;;  %v3579_v50 = vld [vmem:[%s3575_s18 + $0x108] sm:$0xff] (!%p399_p7)  ;;  %v3588_v52 = vld [vmem:[%s3575_s18 + $0x110] sm:$0xff] (!%p399_p7) }
  0x32   : > { %2898 = vmatmul.mubr.msk.f32.vlgmr.msra.gmra.mrb[0].mxu1 (!%p399_p7), %vm465_vm2, %v455_v49  ;;  %3014 = vmatmul.mubr.msk.f32.vlgmr.msra.gmra.mrb[0].mxu0 (!%p399_p7), %vm465_vm2, %v3579_v50  ;;  %v456_v51 = vld [vmem:[%s3575_s18 + $0x8] sm:$0xff] (!%p399_p7)  ;;  %v457_v53 = vld [vmem:[%s3575_s18 + $0x10] sm:$0xff] (!%p399_p7)  ;;  %v3605_v54 = vld [vmem:[%s3575_s18 + $0x118] sm:$0xff] (!%p399_p7) }
  0x33   : > { %3041 = vmatpush3.msk.msra.mxu0 (!%p399_p7), %vm493_vm0, %v2721_v47  ;;  %2925 = vmatpush3.msk.msra.mxu1 (!%p399_p7), %vm493_vm0, %v2650_v48  ;;  %v458_v55 = vld [vmem:[%s3575_s18 + $0x18] sm:$0xff] (!%p399_p7)  ;;  %v3616_v56 = vld [vmem:[%s3575_s18 + $0x120] sm:$0xff] (!%p399_p7)  ;;  %v3627_v58 = vld [vmem:[%s3575_s18 + $0x128] sm:$0xff] (!%p399_p7) }
  0x34   : > { %2900 = vmatprep.mubr.msk.f32.mxu1 %vm3393_vm1, %v3392_v46  ;;  %3016 = vmatprep.mubr.msk.f32.mxu0 %vm3393_vm1, %v3392_v46  ;;  %v459_v57 = vld [vmem:[%s3575_s18 + $0x20] sm:$0xff]  ;;  %v460_v59 = vld [vmem:[%s3575_s18 + $0x28] sm:$0xff]  ;;  %v3638_v60 = vld [vmem:[%s3575_s18 + $0x130] sm:$0xff]  ;;  %s4351_s21 = smov (!%p441_p8, %s2622_s21), 1 }
  0x35   : > { %3069 = vmatprep.subr.mxu0 %v3392_v46  ;;  %2953 = vmatprep.subr.mxu1 %v3392_v46  ;;  %v461_v61 = vld [vmem:[%s3575_s18 + $0x30] sm:$0xff]  ;;  %v3649_v62 = vld [vmem:[%s3575_s18 + $0x138] sm:$0xff]  ;;  %v3660_v0 = vld [vmem:[%s3575_s18 + $0x140] sm:$0xff]  ;;  %s3323_s20 = smul.u32 72, %s4351_s21  ;;  %s2630_s17 = sshll.u32 %s4351_s21, 2 }
  0x36   : > { %2901 = vmatmul.mubr.msk.f32.gmra.mrb[2].mxu1 %vm465_vm2, %v456_v51  ;;  %3017 = vmatmul.mubr.msk.f32.gmra.mrb[2].mxu0 %vm465_vm2, %v3588_v52  ;;  %v462_v63 = vld [vmem:[%s3575_s18 + $0x38] sm:$0xff]  ;;  %v463_v1 = vld [vmem:[%s3575_s18 + $0x40] sm:$0xff]  ;;  %v3671_v2 = vld [vmem:[%s3575_s18 + $0x148] sm:$0xff]  ;;  %s454_s24 = scalar_lea.vmem %s4310_s5, %s2630_s17 }
  0x37   : > { %2903 = vmatprep.mubr.msk.f32.mxu1 %vm3393_vm1, %v3392_v46  ;;  %3019 = vmatprep.mubr.msk.f32.mxu0 %vm3393_vm1, %v3392_v46  ;;  %v2641_v3 = vld [vmem:[%s3575_s18 + $0x58] sm:$0xff]  ;;  %v2642_v7 = vld [vmem:[%s3575_s18 + $0x60] sm:$0xff]  ;;  %v2643_v9 = vld [vmem:[%s3575_s18 + $0x68] sm:$0xff]  ;;  %s4080_s13 = scalar_lea.vmem %s4309_s4, %s3323_s20  ;;  %s4094_s16 = scalar_lea.vmem %s4308_s3, %s3323_s20 }
  0x38   : > { %v2712_v4 = vld [vmem:[%s3575_s18 + $0xb1] sm:$0xff]  ;;  %v2713_v8 = vld [vmem:[%s3575_s18 + $0xb9] sm:$0xff]  ;;  %v2714_v10 = vld [vmem:[%s3575_s18 + $0xc1] sm:$0xff] }
  0x39   : > { %v2644_v11 = vld [vmem:[%s3575_s18 + $0x70] sm:$0xff]  ;;  %v2645_v13 = vld [vmem:[%s3575_s18 + $0x78] sm:$0xff]  ;;  %v2646_v15 = vld [vmem:[%s3575_s18 + $0x80] sm:$0xff] }
  0x3a   : > { %2904 = vmatmul.mubr.msk.f32.gmra.mrb[4].mxu1 %vm465_vm2, %v457_v53  ;;  %3020 = vmatmul.mubr.msk.f32.gmra.mrb[4].mxu0 %vm465_vm2, %v3605_v54  ;;  %v2715_v12 = vld [vmem:[%s3575_s18 + $0xc9] sm:$0xff]  ;;  %v2716_v14 = vld [vmem:[%s3575_s18 + $0xd1] sm:$0xff]  ;;  %v2717_v16 = vld [vmem:[%s3575_s18 + $0xd9] sm:$0xff] }
  0x3b   : > { %2906 = vmatprep.mubr.msk.f32.mxu1 %vm3393_vm1, %v3392_v46  ;;  %3022 = vmatprep.mubr.msk.f32.mxu0 %vm3393_vm1, %v3392_v46  ;;  %v2647_v17 = vld [vmem:[%s3575_s18 + $0x88] sm:$0xff]  ;;  %v2648_v19 = vld [vmem:[%s3575_s18 + $0x90] sm:$0xff]  ;;  %v2649_v21 = vld [vmem:[%s3575_s18 + $0x98] sm:$0xff] }
  0x3c   : > { %v2718_v18 = vld [vmem:[%s3575_s18 + $0xe1] sm:$0xff]  ;;  %v2719_v20 = vld [vmem:[%s3575_s18 + $0xe9] sm:$0xff]  ;;  %v2720_v22 = vld [vmem:[%s3575_s18 + $0xf1] sm:$0xff] }
  0x3d   : > { %v795_v23 = vld [vmem:[%s3575_s18 + $0x1] sm:$0xff]  ;;  %v1509_v24 = vld [vmem:[%s3575_s18 + $0x9] sm:$0xff]  ;;  %v1510_v27 = vld [vmem:[%s3575_s18 + $0x11] sm:$0xff] }
  0x3e   : > { %2907 = vmatmul.mubr.msk.f32.gmra.mrb[6].mxu1 %vm465_vm2, %v458_v55  ;;  %3023 = vmatmul.mubr.msk.f32.gmra.mrb[6].mxu0 %vm465_vm2, %v3616_v56  ;;  %v1511_v28 = vld [vmem:[%s3575_s18 + $0x19] sm:$0xff]  ;;  %v1512_v29 = vld [vmem:[%s3575_s18 + $0x21] sm:$0xff]  ;;  %v1513_v30 = vld [vmem:[%s3575_s18 + $0x29] sm:$0xff] }
  0x3f   : > { %2909 = vmatprep.mubr.msk.f32.mxu1 %vm3393_vm1, %v3392_v46  ;;  %3025 = vmatprep.mubr.msk.f32.mxu0 %vm3393_vm1, %v3392_v46  ;;  %v1514_v31 = vld [vmem:[%s3575_s18 + $0x31] sm:$0xff]  ;;  %v1515_v32 = vld [vmem:[%s3575_s18 + $0x39] sm:$0xff]  ;;  %v1516_v33 = vld [vmem:[%s3575_s18 + $0x41] sm:$0xff] }
  0x40   : > { %v1517_v34 = vld [vmem:[%s3575_s18 + $0x49] sm:$0xff]  ;;  %v2743_v36 = vld [vmem:[%s3575_s18 + $0x61] sm:$0xff]  ;;  %v2673_v39 = vld [vmem:[%s3575_s18 + $0xb8] sm:$0xff] }
  0x41   : > { %v2672_v35 = vld [vmem:[%s3575_s18 + $0xb0] sm:$0xff]  ;;  %v2061_v38 = vld [vmem:[%s4307_s2] sm:$0xf]  ;;  %v2675_v43 = vld [vmem:[%s3575_s18 + $0xc8] sm:$0xff] }
  0x42   : > { %2910 = vmatmul.mubr.msk.f32.gmra.mrb[8].mxu1 %vm465_vm2, %v459_v57  ;;  %3026 = vmatmul.mubr.msk.f32.gmra.mrb[8].mxu0 %vm465_vm2, %v3627_v58  ;;  %v2744_v40 = vld [vmem:[%s3575_s18 + $0x69] sm:$0xff]  ;;  %v2674_v41 = vld [vmem:[%s3575_s18 + $0xc0] sm:$0xff]  ;;  %v2745_v42 = vld [vmem:[%s3575_s18 + $0x71] sm:$0xff] }
  0x43   : > { %2912 = vmatprep.mubr.msk.f32.mxu1 %vm3393_vm1, %v3392_v46  ;;  %3028 = vmatprep.mubr.msk.f32.mxu0 %vm3393_vm1, %v3392_v46  ;;  %v2746_v44 = vld [vmem:[%s3575_s18 + $0x79] sm:$0xff]  ;;  %v2676_v45 = vld [vmem:[%s3575_s18 + $0xd0] sm:$0xff]  ;;  %v2747_v47 = vld [vmem:[%s3575_s18 + $0x81] sm:$0xff] }
  0x44   : > { %v2677_v48 = vld [vmem:[%s3575_s18 + $0xd8] sm:$0xff]  ;;  %v2748_v49 = vld [vmem:[%s3575_s18 + $0x89] sm:$0xff]  ;;  %v2678_v51 = vld [vmem:[%s3575_s18 + $0xe0] sm:$0xff] }
  0x45   : > { %v2749_v53 = vld [vmem:[%s3575_s18 + $0x91] sm:$0xff]  ;;  %v2679_v55 = vld [vmem:[%s3575_s18 + $0xe8] sm:$0xff]  ;;  %v2750_v57 = vld [vmem:[%s3575_s18 + $0x99] sm:$0xff] }
  0x46   : > { %2913 = vmatmul.mubr.msk.f32.gmra.mrb[10].mxu1 %vm465_vm2, %v460_v59  ;;  %3029 = vmatmul.mubr.msk.f32.gmra.mrb[10].mxu0 %vm465_vm2, %v3638_v60  ;;  %v2680_v59 = vld [vmem:[%s3575_s18 + $0xf0] sm:$0xff] }
  0x47   : > { %2915 = vmatprep.mubr.msk.f32.mxu1 %vm3393_vm1, %v3392_v46  ;;  %3031 = vmatprep.mubr.msk.f32.mxu0 %vm3393_vm1, %v3392_v46 }
  0x4a   : > { %2916 = vmatmul.mubr.msk.f32.gmra.mrb[12].mxu1 %vm465_vm2, %v461_v61  ;;  %3032 = vmatmul.mubr.msk.f32.gmra.mrb[12].mxu0 %vm465_vm2, %v3649_v62  ;;  %v2751_v61 = vld [vmem:[%s3575_s18 + $0xa1] sm:$0xff] }
  0x4b   : > { %2918 = vmatprep.mubr.msk.f32.mxu1 %vm3393_vm1, %v3392_v46  ;;  %3034 = vmatprep.mubr.msk.f32.mxu0 %vm3393_vm1, %v3392_v46 }
  0x4e   : > { %2919 = vmatmul.mubr.msk.f32.gmra.mrb[14].mxu1 %vm465_vm2, %v462_v63  ;;  %3035 = vmatmul.mubr.msk.f32.gmra.mrb[14].mxu0 %vm465_vm2, %v3660_v0  ;;  %v1865_v63 = vld [vmem:[%s3575_s18 + $0xa] sm:$0xff] }
  0x4f   : > { %2921 = vmatprep.mubr.msk.f32.mxu1 %vm3393_vm1, %v3392_v46  ;;  %3037 = vmatprep.mubr.msk.f32.mxu0 %vm3393_vm1, %v3392_v46 }
  0x52   : > { %2922 = vmatmul.mubr.msk.f32.gmra.mrb[16].mxu1 %vm465_vm2, %v463_v1  ;;  %3038 = vmatmul.mubr.msk.f32.gmra.mrb[16].mxu0 %vm465_vm2, %v3671_v2  ;;  %v1866_v1 = vld [vmem:[%s3575_s18 + $0x12] sm:$0xff] }
  0x53   : > { %2926 = vmatprep.mubr.msk.f32.mxu1 %vm3393_vm1, %v3392_v46  ;;  %3042 = vmatprep.mubr.msk.f32.mxu0 %vm3393_vm1, %v3392_v46 }
  0x56   : > { %2927 = vmatmul.mubr.msk.f32.vlgmr.msra.gmra.mrb[0].mxu1 %vm465_vm2, %v2641_v3  ;;  %3043 = vmatmul.mubr.msk.f32.vlgmr.msra.gmra.mrb[0].mxu0 %vm465_vm2, %v2712_v4  ;;  %v1872_v3 = vld [vmem:[%s3575_s18 + $0x42] sm:$0xff] }
  0x57   : > { %3070 = vmatpush3.msk.msra.mxu0 %vm493_vm0, %v2732_v5  ;;  %2954 = vmatpush3.msk.msra.mxu1 %vm493_vm0, %v2661_v6 }
  0x58   : > { %2929 = vmatprep.mubr.msk.f32.mxu1 %vm3393_vm1, %v3392_v46  ;;  %3045 = vmatprep.mubr.msk.f32.mxu0 %vm3393_vm1, %v3392_v46 }
  0x59   : > { %3098 = vmatprep.subr.mxu0 %v3392_v46  ;;  %2982 = vmatprep.subr.mxu1 %v3392_v46 }
  0x5a   : > { %2930 = vmatmul.mubr.msk.f32.gmra.mrb[2].mxu1 %vm465_vm2, %v2642_v7  ;;  %3046 = vmatmul.mubr.msk.f32.gmra.mrb[2].mxu0 %vm465_vm2, %v2713_v8 }
  0x5b   : > { %2932 = vmatprep.mubr.msk.f32.mxu1 %vm3393_vm1, %v3392_v46  ;;  %3048 = vmatprep.mubr.msk.f32.mxu0 %vm3393_vm1, %v3392_v46 }
  0x5e   : > { %2933 = vmatmul.mubr.msk.f32.gmra.mrb[4].mxu1 %vm465_vm2, %v2643_v9  ;;  %3049 = vmatmul.mubr.msk.f32.gmra.mrb[4].mxu0 %vm465_vm2, %v2714_v10 }
  0x5f   : > { %2935 = vmatprep.mubr.msk.f32.mxu1 %vm3393_vm1, %v3392_v46  ;;  %3051 = vmatprep.mubr.msk.f32.mxu0 %vm3393_vm1, %v3392_v46 }
  0x62   : > { %2936 = vmatmul.mubr.msk.f32.gmra.mrb[6].mxu1 %vm465_vm2, %v2644_v11  ;;  %3052 = vmatmul.mubr.msk.f32.gmra.mrb[6].mxu0 %vm465_vm2, %v2715_v12 }
  0x63   : > { %2938 = vmatprep.mubr.msk.f32.mxu1 %vm3393_vm1, %v3392_v46  ;;  %3054 = vmatprep.mubr.msk.f32.mxu0 %vm3393_vm1, %v3392_v46 }
  0x66   : > { %2939 = vmatmul.mubr.msk.f32.gmra.mrb[8].mxu1 %vm465_vm2, %v2645_v13  ;;  %3055 = vmatmul.mubr.msk.f32.gmra.mrb[8].mxu0 %vm465_vm2, %v2716_v14 }
  0x67   : > { %2941 = vmatprep.mubr.msk.f32.mxu1 %vm3393_vm1, %v3392_v46  ;;  %3057 = vmatprep.mubr.msk.f32.mxu0 %vm3393_vm1, %v3392_v46 }
  0x6a   : > { %2942 = vmatmul.mubr.msk.f32.gmra.mrb[10].mxu1 %vm465_vm2, %v2646_v15  ;;  %3058 = vmatmul.mubr.msk.f32.gmra.mrb[10].mxu0 %vm465_vm2, %v2717_v16 }
  0x6b   : > { %2944 = vmatprep.mubr.msk.f32.mxu1 %vm3393_vm1, %v3392_v46  ;;  %3060 = vmatprep.mubr.msk.f32.mxu0 %vm3393_vm1, %v3392_v46 }
  0x6e   : > { %2945 = vmatmul.mubr.msk.f32.gmra.mrb[12].mxu1 %vm465_vm2, %v2647_v17  ;;  %3061 = vmatmul.mubr.msk.f32.gmra.mrb[12].mxu0 %vm465_vm2, %v2718_v18 }
  0x6f   : > { %2947 = vmatprep.mubr.msk.f32.mxu1 %vm3393_vm1, %v3392_v46  ;;  %3063 = vmatprep.mubr.msk.f32.mxu0 %vm3393_vm1, %v3392_v46 }
  0x72   : > { %2948 = vmatmul.mubr.msk.f32.gmra.mrb[14].mxu1 %vm465_vm2, %v2648_v19  ;;  %3064 = vmatmul.mubr.msk.f32.gmra.mrb[14].mxu0 %vm465_vm2, %v2719_v20 }
  0x73   : > { %2950 = vmatprep.mubr.msk.f32.mxu1 %vm3393_vm1, %v3392_v46  ;;  %3066 = vmatprep.mubr.msk.f32.mxu0 %vm3393_vm1, %v3392_v46 }
  0x76   : > { %2951 = vmatmul.mubr.msk.f32.gmra.mrb[16].mxu1 %vm465_vm2, %v2649_v21  ;;  %3067 = vmatmul.mubr.msk.f32.gmra.mrb[16].mxu0 %vm465_vm2, %v2720_v22 }
  0x77   : > { %2955 = vmatprep.mubr.msk.f32.mxu1 %vm3393_vm1, %v3392_v46  ;;  %3071 = vmatprep.mubr.msk.f32.mxu0 %vm3393_vm1, %v3392_v46 }
  0x7a   : > { %2956 = vmatmul.mubr.msk.f32.vlgmr.msra.gmra.mrb[0].mxu1 %vm465_vm2, %v795_v23  ;;  %3072 = vmatmul.mubr.msk.f32.vlgmr.msra.gmra.mrb[0].mxu0 %vm465_vm2, %v1509_v24 }
  0x7b   : > { %3099 = vmatpush3.msk.msra.mxu0 %vm493_vm0, %v2752_v25  ;;  %2983 = vmatpush3.msk.msra.mxu1 %vm493_vm0, %v2681_v26 }
  0x7c   : > { %2958 = vmatprep.mubr.msk.f32.mxu1 %vm3393_vm1, %v3392_v46  ;;  %3074 = vmatprep.mubr.msk.f32.mxu0 %vm3393_vm1, %v3392_v46 }
  0x7d   : > { %3127 = vmatprep.subr.mxu0 %v3392_v46  ;;  %3156 = vmatprep.subr.mxu1 %v3392_v46 }
  0x7e   : > { %2959 = vmatmul.mubr.msk.f32.gmra.mrb[2].mxu1 %vm465_vm2, %v1509_v24  ;;  %3075 = vmatmul.mubr.msk.f32.gmra.mrb[2].mxu0 %vm465_vm2, %v1510_v27 }
  0x7f   : > { %2961 = vmatprep.mubr.msk.f32.mxu1 %vm3393_vm1, %v3392_v46  ;;  %3077 = vmatprep.mubr.msk.f32.mxu0 %vm3393_vm1, %v3392_v46 }
  0x82   : > { %2962 = vmatmul.mubr.msk.f32.gmra.mrb[4].mxu1 %vm465_vm2, %v1510_v27  ;;  %3078 = vmatmul.mubr.msk.f32.gmra.mrb[4].mxu0 %vm465_vm2, %v1511_v28 }
  0x83   : > { %2964 = vmatprep.mubr.msk.f32.mxu1 %vm3393_vm1, %v3392_v46  ;;  %3080 = vmatprep.mubr.msk.f32.mxu0 %vm3393_vm1, %v3392_v46 }
  0x86   : > { %2965 = vmatmul.mubr.msk.f32.gmra.mrb[6].mxu1 %vm465_vm2, %v1511_v28  ;;  %3081 = vmatmul.mubr.msk.f32.gmra.mrb[6].mxu0 %vm465_vm2, %v1512_v29 }
  0x87   : > { %2967 = vmatprep.mubr.msk.f32.mxu1 %vm3393_vm1, %v3392_v46  ;;  %3083 = vmatprep.mubr.msk.f32.mxu0 %vm3393_vm1, %v3392_v46 }
  0x8a   : > { %2968 = vmatmul.mubr.msk.f32.gmra.mrb[8].mxu1 %vm465_vm2, %v1512_v29  ;;  %3084 = vmatmul.mubr.msk.f32.gmra.mrb[8].mxu0 %vm465_vm2, %v1513_v30 }
  0x8b   : > { %2970 = vmatprep.mubr.msk.f32.mxu1 %vm3393_vm1, %v3392_v46  ;;  %3086 = vmatprep.mubr.msk.f32.mxu0 %vm3393_vm1, %v3392_v46 }
  0x8e   : > { %2971 = vmatmul.mubr.msk.f32.gmra.mrb[10].mxu1 %vm465_vm2, %v1513_v30  ;;  %3087 = vmatmul.mubr.msk.f32.gmra.mrb[10].mxu0 %vm465_vm2, %v1514_v31 }
  0x8f   : > { %2973 = vmatprep.mubr.msk.f32.mxu1 %vm3393_vm1, %v3392_v46  ;;  %3089 = vmatprep.mubr.msk.f32.mxu0 %vm3393_vm1, %v3392_v46 }
  0x92   : > { %2974 = vmatmul.mubr.msk.f32.gmra.mrb[12].mxu1 %vm465_vm2, %v1514_v31  ;;  %3090 = vmatmul.mubr.msk.f32.gmra.mrb[12].mxu0 %vm465_vm2, %v1515_v32 }
  0x93   : > { %2976 = vmatprep.mubr.msk.f32.mxu1 %vm3393_vm1, %v3392_v46  ;;  %3092 = vmatprep.mubr.msk.f32.mxu0 %vm3393_vm1, %v3392_v46 }
  0x96   : > { %2977 = vmatmul.mubr.msk.f32.gmra.mrb[14].mxu1 %vm465_vm2, %v1515_v32  ;;  %3093 = vmatmul.mubr.msk.f32.gmra.mrb[14].mxu0 %vm465_vm2, %v1516_v33 }
  0x97   : > { %2979 = vmatprep.mubr.msk.f32.mxu1 %vm3393_vm1, %v3392_v46  ;;  %3095 = vmatprep.mubr.msk.f32.mxu0 %vm3393_vm1, %v3392_v46 }
  0x9a   : > { %2980 = vmatmul.mubr.msk.f32.gmra.mrb[16].mxu1 %vm465_vm2, %v1516_v33  ;;  %3096 = vmatmul.mubr.msk.f32.gmra.mrb[16].mxu0 %vm465_vm2, %v1517_v34 }
  0x9b   : > { %2984 = vmatprep.mubr.msk.f32.mxu1 %vm3393_vm1, %v3392_v46  ;;  %3100 = vmatprep.mubr.msk.f32.mxu0 %vm3393_vm1, %v3392_v46 }
  0x9e   : > { %2985 = vmatmul.mubr.msk.f32.vlgmr.msra.gmra.mrb[0].mxu1 %vm465_vm2, %v2672_v35  ;;  %3101 = vmatmul.mubr.msk.f32.vlgmr.msra.gmra.mrb[0].mxu0 %vm465_vm2, %v2743_v36 }
  0x9f   : > { %3128 = vmatpush3.msk.msra.mxu0 %vm493_vm0, %v2763_v37  ;;  %3157 = vmatpush3.msk.msra.mxu1 %vm493_vm0, %v2061_v38 }
  0xa0   : > { %2987 = vmatprep.mubr.msk.f32.mxu1 %vm3393_vm1, %v3392_v46  ;;  %3103 = vmatprep.mubr.msk.f32.mxu0 %vm3393_vm1, %v3392_v46 }
  0xa2   : > { %2988 = vmatmul.mubr.msk.f32.gmra.mrb[2].mxu1 %vm465_vm2, %v2673_v39  ;;  %3104 = vmatmul.mubr.msk.f32.gmra.mrb[2].mxu0 %vm465_vm2, %v2744_v40 }
  0xa3   : > { %2990 = vmatprep.mubr.msk.f32.mxu1 %vm3393_vm1, %v3392_v46  ;;  %3106 = vmatprep.mubr.msk.f32.mxu0 %vm3393_vm1, %v3392_v46 }
  0xa6   : > { %2991 = vmatmul.mubr.msk.f32.gmra.mrb[4].mxu1 %vm465_vm2, %v2674_v41  ;;  %3107 = vmatmul.mubr.msk.f32.gmra.mrb[4].mxu0 %vm465_vm2, %v2745_v42 }
  0xa7   : > { %2993 = vmatprep.mubr.msk.f32.mxu1 %vm3393_vm1, %v3392_v46  ;;  %3109 = vmatprep.mubr.msk.f32.mxu0 %vm3393_vm1, %v3392_v46 }
  0xaa   : > { %2994 = vmatmul.mubr.msk.f32.gmra.mrb[6].mxu1 %vm465_vm2, %v2675_v43  ;;  %3110 = vmatmul.mubr.msk.f32.gmra.mrb[6].mxu0 %vm465_vm2, %v2746_v44 }
  0xab   : > { %2996 = vmatprep.mubr.msk.f32.mxu1 %vm3393_vm1, %v3392_v46  ;;  %3112 = vmatprep.mubr.msk.f32.mxu0 %vm3393_vm1, %v3392_v46 }
  0xae   : > { %2997 = vmatmul.mubr.msk.f32.gmra.mrb[8].mxu1 %vm465_vm2, %v2676_v45  ;;  %3113 = vmatmul.mubr.msk.f32.gmra.mrb[8].mxu0 %vm465_vm2, %v2747_v47 }
  0xaf   : > { %2999 = vmatprep.mubr.msk.f32.mxu1 %vm3393_vm1, %v3392_v46  ;;  %3115 = vmatprep.mubr.msk.f32.mxu0 %vm3393_vm1, %v3392_v46 }
  0xb2   : > { %3000 = vmatmul.mubr.msk.f32.gmra.mrb[10].mxu1 %vm465_vm2, %v2677_v48  ;;  %3116 = vmatmul.mubr.msk.f32.gmra.mrb[10].mxu0 %vm465_vm2, %v2748_v49 }
  0xb3   : > { %3002 = vmatprep.mubr.msk.f32.mxu1 %vm3393_vm1, %v3392_v46  ;;  %3118 = vmatprep.mubr.msk.f32.mxu0 %vm3393_vm1, %v3392_v46 }
  0xb6   : > { %3003 = vmatmul.mubr.msk.f32.gmra.mrb[12].mxu1 %vm465_vm2, %v2678_v51  ;;  %3119 = vmatmul.mubr.msk.f32.gmra.mrb[12].mxu0 %vm465_vm2, %v2749_v53 }
  0xb7   : > { %3005 = vmatprep.mubr.msk.f32.mxu1 %vm3393_vm1, %v3392_v46  ;;  %3121 = vmatprep.mubr.msk.f32.mxu0 %vm3393_vm1, %v3392_v46 }
  0xba   : > { %3006 = vmatmul.mubr.msk.f32.gmra.mrb[14].mxu1 %vm465_vm2, %v2679_v55  ;;  %3122 = vmatmul.mubr.msk.f32.gmra.mrb[14].mxu0 %vm465_vm2, %v2750_v57 }
  0xbb   : > { %3008 = vmatprep.mubr.msk.f32.mxu1 %vm3393_vm1, %v3392_v46  ;;  %3124 = vmatprep.mubr.msk.f32.mxu0 %vm3393_vm1, %v3392_v46 }
  0xbe   : > { %3009 = vmatmul.mubr.msk.f32.gmra.mrb[16].mxu1 %vm465_vm2, %v2680_v59  ;;  %3125 = vmatmul.mubr.msk.f32.gmra.mrb[16].mxu0 %vm465_vm2, %v2751_v61 }
  0xbf   : > { %3129 = vmatprep.mubr.msk.f32.mxu0 %vm3393_vm1, %v3392_v46  ;;  %3158 = vmatprep.mubr.msk.f32.mxu1 %vm3393_vm1, %v3392_v46 }
  0xc2   : > { %3130 = vmatmul.mubr.msk.f32.vlgmr.msra.gmra.mrb[0].mxu0 %vm465_vm2, %v1865_v63  ;;  %3159 = vmatmul.mubr.msk.f32.vlgmr.msra.gmra.mrb[18].mxu1 %vm465_vm2, %v3579_v50  ;;  %v1867_v50 = vld [vmem:[%s3575_s18 + $0x1a] sm:$0xff] }
  0xc3   : > { %3132 = vmatprep.mubr.msk.f32.mxu0 %vm3393_vm1, %v3392_v46  ;;  %3161 = vmatprep.mubr.msk.f32.mxu1 %vm3393_vm1, %v3392_v46 }
  0xc6   : > { %3133 = vmatmul.mubr.msk.f32.gmra.mrb[2].mxu0 %vm465_vm2, %v1866_v1  ;;  %3162 = vmatmul.mubr.msk.f32.gmra.mrb[20].mxu1 %vm465_vm2, %v3588_v52  ;;  %v1868_v52 = vld [vmem:[%s3575_s18 + $0x22] sm:$0xff] }
  0xc7   : > { %3135 = vmatprep.mubr.msk.f32.mxu0 %vm3393_vm1, %v3392_v46  ;;  %3164 = vmatprep.mubr.msk.f32.mxu1 %vm3393_vm1, %v3392_v46 }
  0xca   : > { %3136 = vmatmul.mubr.msk.f32.gmra.mrb[4].mxu0 %vm465_vm2, %v1867_v50  ;;  %3165 = vmatmul.mubr.msk.f32.gmra.mrb[22].mxu1 %vm465_vm2, %v3605_v54  ;;  %v1869_v54 = vld [vmem:[%s3575_s18 + $0x2a] sm:$0xff] }
  0xcb   : > { %3138 = vmatprep.mubr.msk.f32.mxu0 %vm3393_vm1, %v3392_v46  ;;  %3167 = vmatprep.mubr.msk.f32.mxu1 %vm3393_vm1, %v3392_v46 }
  0xce   : > { %3139 = vmatmul.mubr.msk.f32.gmra.mrb[6].mxu0 %vm465_vm2, %v1868_v52  ;;  %3168 = vmatmul.mubr.msk.f32.gmra.mrb[24].mxu1 %vm465_vm2, %v3616_v56  ;;  %v1870_v56 = vld [vmem:[%s3575_s18 + $0x32] sm:$0xff] }
  0xcf   : > { %3141 = vmatprep.mubr.msk.f32.mxu0 %vm3393_vm1, %v3392_v46  ;;  %3170 = vmatprep.mubr.msk.f32.mxu1 %vm3393_vm1, %v3392_v46 }
  0xd2   : > { %3142 = vmatmul.mubr.msk.f32.gmra.mrb[8].mxu0 %vm465_vm2, %v1869_v54  ;;  %3171 = vmatmul.mubr.msk.f32.gmra.mrb[26].mxu1 %vm465_vm2, %v3627_v58  ;;  %v1871_v58 = vld [vmem:[%s3575_s18 + $0x3a] sm:$0xff] }
  0xd3   : > { %3144 = vmatprep.mubr.msk.f32.mxu0 %vm3393_vm1, %v3392_v46  ;;  %3173 = vmatprep.mubr.msk.f32.mxu1 %vm3393_vm1, %v3392_v46 }
  0xd6   : > { %3145 = vmatmul.mubr.msk.f32.gmra.mrb[10].mxu0 %vm465_vm2, %v1870_v56  ;;  %3174 = vmatmul.mubr.msk.f32.gmra.mrb[28].mxu1 %vm465_vm2, %v3638_v60  ;;  %v1873_v60 = vld [vmem:[%s3575_s18 + $0x4a] sm:$0xff] }
  0xd7   : > { %3147 = vmatprep.mubr.msk.f32.mxu0 %vm3393_vm1, %v3392_v46  ;;  %3176 = vmatprep.mubr.msk.f32.mxu1 %vm3393_vm1, %v3392_v46 }
  0xda   : > { %3148 = vmatmul.mubr.msk.f32.gmra.mrb[12].mxu0 %vm465_vm2, %v1871_v58  ;;  %3177 = vmatmul.mubr.msk.f32.gmra.mrb[30].mxu1 %vm465_vm2, %v3649_v62  ;;  %v2202_v62 = vlaneseq }
  0xdb   : > { %3150 = vmatprep.mubr.msk.f32.mxu0 %vm3393_vm1, %v3392_v46  ;;  %3179 = vmatprep.mubr.msk.f32.mxu1 %vm3393_vm1, %v3392_v46 }
  0xdc   : > { %v3986_v6 = vshrl.u32 %v2202_v62, 7 }
  0xde   : > { %3151 = vmatmul.mubr.msk.f32.gmra.mrb[14].mxu0 %vm465_vm2, %v1872_v3  ;;  %3180 = vmatmul.mubr.msk.f32.gmra.mrb[32].mxu1 %vm465_vm2, %v3660_v0  ;;  %v2204_v8 = vadd.s32 8, %v3986_v6  ;;  %v2205_v10 = vadd.s32 16, %v3986_v6  ;;  %v2206_v16 = vadd.s32 24, %v3986_v6  ;;  %v4014_v23 = vadd.s32 32, %v3986_v6 }
  0xdf   : > { %3153 = vmatprep.mubr.msk.f32.mxu0 %vm3393_vm1, %v3392_v46  ;;  %3182 = vmatprep.mubr.msk.f32.mxu1 %vm3393_vm1, %v3392_v46  ;;  %v3992_v9 = vmul.u32.u64.low 3817748708, %v3986_v6  ;;  %v3993_v46 = vmul.u32.u64.high 3817748708, %v3986_v6, %v3992_v9  ;;  %v4019_v28 = vadd.s32 40, %v3986_v6  ;;  %v4036_v39 = vadd.s32 48, %v3986_v6 }
  0xe0   : > { %v3998_v12 = vmul.u32.u64.low 3817748708, %v2204_v8  ;;  %v3999_v13 = vmul.u32.u64.high 3817748708, %v2204_v8, %v3998_v12  ;;  %v4001_v14 = vmul.u32.u64.low 3817748708, %v2205_v10  ;;  %v4002_v15 = vmul.u32.u64.high 3817748708, %v2205_v10, %v4001_v14 }
  0xe1   : > { %v2218_v19 = vshrl.u32 %v3993_v46, 3  ;;  %v4008_v20 = vmul.u32.u64.low 3817748708, %v2206_v16  ;;  %v4009_v21 = vmul.u32.u64.high 3817748708, %v2206_v16, %v4008_v20  ;;  %v4049_v48 = vadd.s32 56, %v3986_v6 }
  0xe2   : > { %3154 = vmatmul.mubr.msk.f32.gmra.mrb[16].mxu0 %vm465_vm2, %v1873_v60  ;;  %3183 = vmatmul.mubr.msk.f32.gmra.mrb[34].mxu1 %vm465_vm2, %v3671_v2  ;;  %v2229_v25 = vshrl.u32 %v3999_v13, 3  ;;  %v2240_v27 = vshrl.u32 %v4002_v15, 3  ;;  %v4024_v30 = vmul.u32.u64.low 3817748708, %v4014_v23  ;;  %v4025_v31 = vmul.u32.u64.high 3817748708, %v4014_v23, %v4024_v30 }
  0xe3   : > { %v2219_v26 = vmul.u32 9, %v2218_v19  ;;  %v2251_v36 = vshrl.u32 %v4009_v21, 3  ;;  %v4032_v37 = vmul.u32.u64.low 3817748708, %v4019_v28  ;;  %v4033_v38 = vmul.u32.u64.high 3817748708, %v4019_v28, %v4032_v37 }
  0xe4   : > { %v2230_v33 = vmul.u32 9, %v2229_v25  ;;  %v2241_v35 = vmul.u32 9, %v2240_v27  ;;  %v2262_v51 = vshrl.u32 %v4025_v31, 3  ;;  %v4075_v62 = vadd.s32 64, %v3986_v6 }
  0xe5   : > { %v2220_v34 = vsub.s32 %v3986_v6, %v2219_v26  ;;  %v2252_v44 = vmul.u32 9, %v2251_v36  ;;  %v4045_v45 = vmul.u32.u64.low 3817748708, %v4036_v39  ;;  %v4046_v47 = vmul.u32.u64.high 3817748708, %v4036_v39, %v4045_v45 }
  0xe6   : > { %v2231_v42 = vsub.s32 %v2204_v8, %v2230_v33  ;;  %v2242_v43 = vsub.s32 %v2205_v10, %v2241_v35  ;;  %v2273_v63 = vshrl.u32 %v4033_v38, 3  ;;  %v2263_v56 = vmul.u32 9, %v2262_v51 }
  0xe7   : > { %vm2311_vm3 = vcmp.ne.s32.totalorder %v2220_v34, 0  ;;  %vm2320_vm4 = vcmp.lt.s32.totalorder %v2220_v34, 0  ;;  %v2338_v55 = vadd.s32 9, %v2220_v34  ;;  %v4059_v61 = vsub.s32 %v2206_v16, %v2252_v44 }
  0xe8   : > { %vm2312_vm5 = vcmp.ne.s32.totalorder %v2231_v42, 0  ;;  %vm2321_vm6 = vcmp.lt.s32.totalorder %v2231_v42, 0  ;;  %vm4055_vm7 = vmand %vm2320_vm4, %vm2311_vm3  ;;  %v2339_v59 = vadd.s32 9, %v2231_v42  ;;  %vm2313_vm8 = vcmp.ne.s32.totalorder %v2242_v43, 0 }
  0xe9   : > { %vm2322_vm9 = vcmp.lt.s32.totalorder %v2242_v43, 0  ;;  %v4063_v1 = vmul.u32.u64.low 3817748708, %v4049_v48  ;;  %v4064_v50 = vmul.u32.u64.high 3817748708, %v4049_v48, %v4063_v1  ;;  %vm4068_vm10 = vmand %vm2321_vm6, %vm2312_vm5  ;;  %v2347_v3 = vsel %vm4055_vm7, %v2338_v55, %v2220_v34 }
  0xea   : > { %v2340_v60 = vadd.s32 9, %v2242_v43  ;;  %vm4082_vm11 = vmand %vm2322_vm9, %vm2313_vm8  ;;  %vm2314_vm12 = vcmp.ne.s32.totalorder %v4059_v61, 0  ;;  %vm2323_vm13 = vcmp.lt.s32.totalorder %v4059_v61, 0  ;;  %v2274_v8 = vmul.u32 9, %v2273_v63 }
  0xeb   : > { %v2284_v6 = vshrl.u32 %v4046_v47, 3  ;;  %vm4096_vm14 = vcmp.lt.s32.totalorder %v2347_v3, 8  ;;  %v4102_v12 = vsub.s32 %v4014_v23, %v2263_v56  ;;  %vm4112_vm15 = vmand %vm2323_vm13, %vm2314_vm12  ;;  %v2295_v25 = vshrl.u32 %v4064_v50, 3 }
  0xec   : > { %v2349_v16 = vsel %vm4082_vm11, %v2340_v60, %v2242_v43  ;;  %v4117_v19 = vmul.u32.u64.low 3817748708, %v4075_v62  ;;  %v4118_v20 = vmul.u32.u64.high 3817748708, %v4075_v62, %v4117_v19  ;;  %v4128_v23 = vsub.s32 %v4019_v28, %v2274_v8 }
  0xed   : > { %vm4131_vm1 = vcmp.lt.s32.totalorder %v2349_v16, 8  ;;  %vm2315_vm2 = vcmp.ne.s32.totalorder %v4102_v12, 0  ;;  %vm2324_vm3 = vcmp.lt.s32.totalorder %v4102_v12, 0  ;;  %v2296_v43 = vmul.u32 9, %v2295_v25 }
  0xee   : > { %vm2316_vm4 = vcmp.ne.s32.totalorder %v4128_v23, 0  ;;  %vm4158_vm5 = vmand %vm2324_vm3, %vm2315_vm2  ;;  %vm2325_vm6 = vcmp.lt.s32.totalorder %v4128_v23, 0  ;;  %v2306_v1 = vshrl.u32 %v4118_v20, 3  ;;  %v2343_v60 = vadd.s32 9, %v4128_v23 }
  0xef   : > { %vm4184_vm9 = vmand %vm2325_vm6, %vm2316_vm4 }
 0x171   : > { %v3984_v4 = vpop.f32.mrb[0].mxu1 }
 0x172   : > { %v2986_v5 = vpop.f32.mrb[1].mxu1 }
 0x175   : > { %v3988_v7 = vpop.f32.mrb[2].mxu1 }
 0x176   : > { %v2989_v0 = vpop.f32.mrb[3].mxu1 }
 0x177   : > { %v2348_v0 = vsel %vm4068_vm10, %v2339_v59, %v2231_v42 }
 0x178   : > { %vm4120_vm0 = vcmp.lt.s32.totalorder %v2348_v0, 8 }
 0x179   : > { %v3996_v11 = vpop.f32.mrb[4].mxu1 }
 0x17a   : > { %v2992_v2 = vpop.f32.mrb[5].mxu1 }
 0x17b   : > { %v2341_v2 = vadd.s32 9, %v4059_v61 }
 0x17d   : > { %v4005_v17 = vpop.f32.mrb[6].mxu1  ;;  %v2350_v31 = vsel %vm4112_vm15, %v2341_v2, %v4059_v61 }
 0x17e   : > { %v2995_v18 = vpop.f32.mrb[7].mxu1  ;;  %vm4168_vm7 = vcmp.lt.s32.totalorder %v2350_v31, 8 }
 0x181   : > { %v4011_v22 = vpop.f32.mrb[8].mxu1 }
 0x182   : > { %v2998_v24 = vpop.f32.mrb[9].mxu1 }
 0x183   : > { %v2285_v24 = vmul.u32 9, %v2284_v6 }
 0x185   : > { %v4021_v29 = vpop.f32.mrb[10].mxu1 }
 0x186   : > { %v3001_v32 = vpop.f32.mrb[11].mxu1 }
 0x189   : > { %v4038_v40 = vpop.f32.mrb[12].mxu1 }
 0x18a   : > { %v3004_v41 = vpop.f32.mrb[13].mxu1 }
 0x18b   : > { %v2342_v41 = vadd.s32 9, %v4102_v12 }
 0x18d   : > { %v4051_v49 = vpop.f32.mrb[14].mxu1  ;;  %v2351_v3 = vsel %vm4158_vm5, %v2342_v41, %v4102_v12 }
 0x18e   : > { %v3007_v53 = vpop.f32.mrb[15].mxu1  ;;  %vm4196_vm11 = vcmp.lt.s32.totalorder %v2351_v3, 8 }
 0x191   : > { %v4066_v52 = vpop.f32.mrb[16].mxu1 }
 0x192   : > { %v3010_v58 = vpop.f32.mrb[17].mxu1 }
 0x195   : > { %v1972_v9 = vpop.f32.mrb[0].mxu0  ;;  %v2158_v10 = vpop.f32.mrb[18].mxu1 }
 0x196   : > { %v3185_v13 = vadd.f32 %v1972_v9, %v3984_v4  ;;  %v3131_v14 = vpop.f32.mrb[1].mxu0  ;;  %2488 = vst [vmem:[%s4080_s13] sm:$0xff] %v2158_v10  ;;  %v3160_v15 = vpop.f32.mrb[19].mxu1  ;;  %v2392_v21 = vsel %vm4096_vm14, %v2158_v10, 0.0  ;;  %v4189_v10 = vsub.s32 %v4049_v48, %v2296_v43  ;;  %v2352_v48 = vsel %vm4184_vm9, %v2343_v60, %v4128_v23 }
 0x197   : > { %v2455_v36 = vmul.f32 %v2392_v21, %v2392_v21  ;;  %v2307_v15 = vmul.u32 9, %v2306_v1  ;;  %vm4222_vm15 = vcmp.lt.s32.totalorder %v2352_v48, 8 }
 0x198   : > { %2479 = vst [vmem:[%s4094_s16] sm:$0xff] %v3185_v13  ;;  %v2383_v28 = vsel %vm4096_vm14, %v3185_v13, 0.0  ;;  %vm2318_vm13 = vcmp.ne.s32.totalorder %v4189_v10, 0  ;;  %vm2327_vm14 = vcmp.lt.s32.totalorder %v4189_v10, 0  ;;  %v2345_v41 = vadd.s32 9, %v4189_v10 }
 0x199   : > { %v1977_v26 = vpop.f32.mrb[2].mxu0  ;;  %v2163_v27 = vpop.f32.mrb[20].mxu1  ;;  %v2416_v44 = vmul.f32 %v2383_v28, %v2383_v28 }
 0x19a   : > { %v3186_v32 = vadd.f32 %v1977_v26, %v3988_v7  ;;  %v2393_v33 = vsel %vm4120_vm0, %v2163_v27, 0.0  ;;  %2489 = vst [vmem:[%s4080_s13 + $0x8] sm:$0xff] %v2163_v27  ;;  %v3134_v34 = vpop.f32.mrb[3].mxu0  ;;  %v3163_v35 = vpop.f32.mrb[21].mxu1  ;;  %v4152_v7 = vsub.s32 %v4036_v39, %v2285_v24 }
 0x19b   : > { %v2440_v37 = vadd.f32 %v2393_v33, %v2392_v21  ;;  %v2456_v38 = vmul.f32 %v2393_v33, %v2393_v33  ;;  %v2308_v33 = vsub.s32 %v4075_v62, %v2307_v15 }
 0x19c   : > { %v2384_v42 = vsel %vm4120_vm0, %v3186_v32, 0.0  ;;  %2480 = vst [vmem:[%s4094_s16 + $0x8] sm:$0xff] %v3186_v32  ;;  %vm2317_vm8 = vcmp.ne.s32.totalorder %v4152_v7, 0  ;;  %vm2326_vm10 = vcmp.lt.s32.totalorder %v4152_v7, 0  ;;  %v2344_v4 = vadd.s32 9, %v4152_v7  ;;  %vm4237_vm0 = vmand %vm2327_vm14, %vm2318_vm13 }
 0x19d   : > { %v2401_v45 = vadd.f32 %v2384_v42, %v2383_v28  ;;  %v2417_v47 = vmul.f32 %v2384_v42, %v2384_v42  ;;  %v2464_v51 = vadd.f32 %v2456_v38, %v2455_v36  ;;  %v1982_v53 = vpop.f32.mrb[4].mxu0  ;;  %v2168_v55 = vpop.f32.mrb[22].mxu1  ;;  %vm4211_vm12 = vmand %vm2326_vm10, %vm2317_vm8  ;;  %vm2328_vm2 = vcmp.lt.s32.totalorder %v2308_v33, 0 }
 0x19e   : > { %v3187_v59 = vadd.f32 %v1982_v53, %v3996_v11  ;;  %v2394_v39 = vsel %vm4131_vm1, %v2168_v55, 0.0  ;;  %2490 = vst [vmem:[%s4080_s13 + $0x10] sm:$0xff] %v2168_v55  ;;  %v3137_v61 = vpop.f32.mrb[5].mxu0  ;;  %v3166_v63 = vpop.f32.mrb[23].mxu1  ;;  %v2353_v38 = vsel %vm4211_vm12, %v2344_v4, %v4152_v7  ;;  %v2346_v1 = vadd.s32 9, %v2308_v33 }
 0x19f   : > { %v2425_v50 = vadd.f32 %v2417_v47, %v2416_v44  ;;  %v2441_v54 = vadd.f32 %v2440_v37, %v2394_v39  ;;  %v2457_v56 = vmul.f32 %v2394_v39, %v2394_v39  ;;  %vm4245_vm3 = vcmp.lt.s32.totalorder %v2353_v38, 8 }
 0x1a0   : > { %v2385_v11 = vsel %vm4131_vm1, %v3187_v59, 0.0  ;;  %2481 = vst [vmem:[%s4094_s16 + $0x10] sm:$0xff] %v3187_v59  ;;  %vm2319_vm1 = vcmp.ne.s32.totalorder %v2308_v33, 0 }
 0x1a1   : > { %v2402_v5 = vadd.f32 %v2401_v45, %v2385_v11  ;;  %v2418_v0 = vmul.f32 %v2385_v11, %v2385_v11  ;;  %v2465_v8 = vadd.f32 %v2464_v51, %v2457_v56  ;;  %v1987_v6 = vpop.f32.mrb[6].mxu0  ;;  %v2173_v9 = vpop.f32.mrb[24].mxu1  ;;  %vm4256_vm4 = vmand %vm2328_vm2, %vm2319_vm1 }
 0x1a2   : > { %v3188_v2 = vadd.f32 %v1987_v6, %v4005_v17  ;;  %v2395_v12 = vsel %vm4168_vm7, %v2173_v9, 0.0  ;;  %2491 = vst [vmem:[%s4080_s13 + $0x18] sm:$0xff] %v2173_v9  ;;  %v3140_v13 = vpop.f32.mrb[7].mxu0  ;;  %v3169_v14 = vpop.f32.mrb[25].mxu1 }
 0x1a3   : > { %v2426_v16 = vadd.f32 %v2425_v50, %v2418_v0  ;;  %v2442_v18 = vadd.f32 %v2441_v54, %v2395_v12  ;;  %v2458_v19 = vmul.f32 %v2395_v12, %v2395_v12 }
 0x1a4   : > { %v2386_v17 = vsel %vm4168_vm7, %v3188_v2, 0.0  ;;  %2482 = vst [vmem:[%s4094_s16 + $0x18] sm:$0xff] %v3188_v2 }
 0x1a5   : > { %v2403_v21 = vadd.f32 %v2402_v5, %v2386_v17  ;;  %v2419_v24 = vmul.f32 %v2386_v17, %v2386_v17  ;;  %v2466_v25 = vadd.f32 %v2465_v8, %v2458_v19  ;;  %v1992_v26 = vpop.f32.mrb[8].mxu0  ;;  %v2178_v27 = vpop.f32.mrb[26].mxu1 }
 0x1a6   : > { %v3189_v23 = vadd.f32 %v1992_v26, %v4011_v22  ;;  %v2396_v31 = vsel %vm4196_vm11, %v2178_v27, 0.0  ;;  %2492 = vst [vmem:[%s4080_s13 + $0x20] sm:$0xff] %v2178_v27  ;;  %v3143_v28 = vpop.f32.mrb[9].mxu0  ;;  %v3172_v32 = vpop.f32.mrb[27].mxu1 }
 0x1a7   : > { %v2427_v34 = vadd.f32 %v2426_v16, %v2419_v24  ;;  %v2443_v35 = vadd.f32 %v2442_v18, %v2396_v31  ;;  %v2459_v36 = vmul.f32 %v2396_v31, %v2396_v31 }
 0x1a8   : > { %v2387_v22 = vsel %vm4196_vm11, %v3189_v23, 0.0  ;;  %2483 = vst [vmem:[%s4094_s16 + $0x20] sm:$0xff] %v3189_v23 }
 0x1a9   : > { %v2404_v42 = vadd.f32 %v2403_v21, %v2387_v22  ;;  %v2420_v62 = vmul.f32 %v2387_v22, %v2387_v22  ;;  %v2467_v43 = vadd.f32 %v2466_v25, %v2459_v36  ;;  %v1997_v44 = vpop.f32.mrb[10].mxu0  ;;  %v2183_v45 = vpop.f32.mrb[28].mxu1 }
 0x1aa   : > { %v3190_v51 = vadd.f32 %v1997_v44, %v4021_v29  ;;  %v2397_v7 = vsel %vm4222_vm15, %v2183_v45, 0.0  ;;  %2493 = vst [vmem:[%s4080_s13 + $0x28] sm:$0xff] %v2183_v45  ;;  %v3146_v53 = vpop.f32.mrb[11].mxu0  ;;  %v3175_v55 = vpop.f32.mrb[29].mxu1  ;;  %v2354_v29 = vsel %vm4237_vm0, %v2345_v41, %v4189_v10 }
 0x1ab   : > { %v2428_v57 = vadd.f32 %v2427_v34, %v2420_v62  ;;  %v2444_v59 = vadd.f32 %v2443_v35, %v2397_v7  ;;  %v2460_v39 = vmul.f32 %v2397_v7, %v2397_v7  ;;  %vm4264_vm5 = vcmp.lt.s32.totalorder %v2354_v29, 8 }
 0x1ac   : > { %v2388_v63 = vsel %vm4222_vm15, %v3190_v51, 0.0  ;;  %2484 = vst [vmem:[%s4094_s16 + $0x28] sm:$0xff] %v3190_v51 }
 0x1ad   : > { %v2405_v50 = vadd.f32 %v2404_v42, %v2388_v63  ;;  %v2421_v54 = vmul.f32 %v2388_v63, %v2388_v63  ;;  %v2468_v56 = vadd.f32 %v2467_v43, %v2460_v39  ;;  %v2002_v58 = vpop.f32.mrb[12].mxu0  ;;  %v2188_v11 = vpop.f32.mrb[30].mxu1 }
 0x1ae   : > { %v3191_v60 = vadd.f32 %v2002_v58, %v4038_v40  ;;  %v2398_v5 = vsel %vm4245_vm3, %v2188_v11, 0.0  ;;  %2494 = vst [vmem:[%s4080_s13 + $0x30] sm:$0xff] %v2188_v11  ;;  %v3149_v0 = vpop.f32.mrb[13].mxu0  ;;  %v3178_v8 = vpop.f32.mrb[31].mxu1  ;;  %v2355_v40 = vsel %vm4256_vm4, %v2346_v1, %v2308_v33 }
 0x1af   : > { %v2429_v6 = vadd.f32 %v2428_v57, %v2421_v54  ;;  %v2445_v9 = vadd.f32 %v2444_v59, %v2398_v5  ;;  %v2461_v46 = vmul.f32 %v2398_v5, %v2398_v5  ;;  %vm4277_vm6 = vcmp.lt.s32.totalorder %v2355_v40, 8 }
 0x1b0   : > { %v2389_v2 = vsel %vm4245_vm3, %v3191_v60, 0.0  ;;  %2485 = vst [vmem:[%s4094_s16 + $0x30] sm:$0xff] %v3191_v60 }
 0x1b1   : > { %v2406_v12 = vadd.f32 %v2405_v50, %v2389_v2  ;;  %v2422_v13 = vmul.f32 %v2389_v2, %v2389_v2  ;;  %v2469_v14 = vadd.f32 %v2468_v56, %v2461_v46  ;;  %v2007_v15 = vpop.f32.mrb[14].mxu0  ;;  %v2193_v16 = vpop.f32.mrb[32].mxu1 }
 0x1b2   : > { %v3192_v18 = vadd.f32 %v2007_v15, %v4051_v49  ;;  %v2399_v19 = vsel %vm4264_vm5, %v2193_v16, 0.0  ;;  %2495 = vst [vmem:[%s4080_s13 + $0x38] sm:$0xff] %v2193_v16  ;;  %v3152_v20 = vpop.f32.mrb[15].mxu0  ;;  %v3181_v17 = vpop.f32.mrb[33].mxu1 }
 0x1b3   : > { %v2430_v48 = vadd.f32 %v2429_v6, %v2422_v13  ;;  %v2446_v4 = vadd.f32 %v2445_v9, %v2399_v19  ;;  %v2462_v21 = vmul.f32 %v2399_v19, %v2399_v19 }
 0x1b4   : > { %v2390_v25 = vsel %vm4264_vm5, %v3192_v18, 0.0  ;;  %2486 = vst [vmem:[%s4094_s16 + $0x38] sm:$0xff] %v3192_v18 }
 0x1b5   : > { %v2407_v49 = vadd.f32 %v2406_v12, %v2390_v25  ;;  %v2423_v26 = vmul.f32 %v2390_v25, %v2390_v25  ;;  %v2470_v27 = vadd.f32 %v2469_v14, %v2462_v21  ;;  %v2012_v30 = vpop.f32.mrb[16].mxu0  ;;  %v2198_v23 = vpop.f32.mrb[34].mxu1 }
 0x1b6   : > { %v3193_v31 = vadd.f32 %v2012_v30, %v4066_v52  ;;  %v2400_v28 = vsel %vm4277_vm6, %v2198_v23, 0.0  ;;  %2496 = vst [vmem:[%s4080_s13 + $0x40] sm:$0xff] %v2198_v23  ;;  %v3155_v32 = vpop.f32.mrb[17].mxu0  ;;  %v3184_v33 = vpop.f32.mrb[35].mxu1 }
 0x1b7   : > { %v2431_v34 = vadd.f32 %v2430_v48, %v2423_v26  ;;  %v2447_v35 = vadd.f32 %v2446_v4, %v2400_v28  ;;  %v2463_v36 = vmul.f32 %v2400_v28, %v2400_v28 }
 0x1b8   : > { %v2391_v37 = vsel %vm4277_vm6, %v3193_v31, 0.0  ;;  %2487 = vst [vmem:[%s4094_s16 + $0x40] sm:$0xff] %v3193_v31 }
 0x1b9   : > { %v2408_v22 = vadd.f32 %v2407_v49, %v2391_v37  ;;  %v2424_v38 = vmul.f32 %v2391_v37, %v2391_v37  ;;  %v2448_v41 = vrot.slane %v2447_v35, 4  ;;  %v2471_v42 = vadd.f32 %v2470_v27, %v2463_v36 }
 0x1bb   : > { %v2409_v62 = vrot.slane %v2408_v22, 4  ;;  %v2432_v52 = vadd.f32 %v2431_v34, %v2424_v38  ;;  %v2449_v43 = vadd.f32 %v2448_v41, %v2447_v35  ;;  %v2472_v44 = vrot.slane %v2471_v42, 4 }
 0x1bd   : > { %v2410_v45 = vadd.f32 %v2409_v62, %v2408_v22  ;;  %v2433_v47 = vrot.slane %v2432_v52, 4  ;;  %v2450_v51 = vrot.slane %v2449_v43, 2  ;;  %v2473_v7 = vadd.f32 %v2472_v44, %v2471_v42 }
 0x1bf   : > { %v2411_v53 = vrot.slane %v2410_v45, 2  ;;  %v2434_v55 = vadd.f32 %v2433_v47, %v2432_v52  ;;  %v2451_v57 = vadd.f32 %v2450_v51, %v2449_v43  ;;  %v2474_v59 = vrot.slane %v2473_v7, 2 }
 0x1c1   : > { %v2412_v39 = vadd.f32 %v2411_v53, %v2410_v45  ;;  %v2435_v61 = vrot.slane %v2434_v55, 2  ;;  %v2452_v63 = vrot.slane %v2451_v57, 1  ;;  %v2475_v29 = vadd.f32 %v2474_v59, %v2473_v7 }
 0x1c3   : > { %v2413_v1 = vrot.slane %v2412_v39, 1  ;;  %v2436_v50 = vadd.f32 %v2435_v61, %v2434_v55  ;;  %v2453_v54 = vadd.f32 %v2452_v63, %v2451_v57  ;;  %v2476_v56 = vrot.slane %v2475_v29, 1 }
 0x1c5   : > { %v2414_v58 = vadd.f32 %v2413_v1, %v2412_v39  ;;  %v2437_v11 = vrot.slane %v2436_v50, 1  ;;  %2454 = vst [vmem:[%s454_s24 + $0x2] sm:$0x1] %v2453_v54  ;;  %v2477_v3 = vadd.f32 %v2476_v56, %v2475_v29 }
 0x1c7   : > { %2415 = vst [vmem:[%s454_s24] sm:$0x1] %v2414_v58  ;;  %v2438_v60 = vadd.f32 %v2437_v11, %v2436_v50  ;;  %2478 = vst [vmem:[%s454_s24 + $0x3] sm:$0x1] %v2477_v3 }
 0x1c9   : > { %2439 = vst [vmem:[%s454_s24 + $0x1] sm:$0x1] %v2438_v60 }
 0x1ca PF: > { %p13_p9 = scmp.ge.s32.totalorder %s3441_s22, 4   ;;  %s4347_s18 = smov %s3386_s19 }
 0x1cb   : > { %s4348_s19 = smov %s3450_s25  ;;  %s4349_s20 = smov %s3441_s22 }
 0x1cc   :  { %15 = sbr.rel (!%p13_p9) target bundleno = 2 (0x2), region = 140 }

</bundles_post_ra>
